<compile_context>
chip_gen: v7x
topology: tpu7x:2x2x1
jax: 0.10.0
libtpu: 0.0.40
codegen_flags: <defaults>
</compile_context>

<pallas_src>
import math

import jax
import jax.numpy as jnp
from jax import lax
from jax.experimental import pallas as pl
from jax.experimental.pallas import tpu as pltpu


# ----------------------------- kernel -----------------------------

def _norm(h, inv_d, eps=1e-5):
    """LayerNorm without affine (gamma/beta are folded into the next matmul at pack time).
    Row mean / mean-square are computed on the MXU (dot against a 1/D column) so the
    cross-lane reduction stays off the XLU."""
    mean = jnp.dot(h, inv_d, preferred_element_type=jnp.float32)       # (TM, 1)
    msq = jnp.dot(h * h, inv_d, preferred_element_type=jnp.float32)    # (TM, 1)
    var = jnp.maximum(msq - mean * mean, 0.0)
    return (h - mean) * lax.rsqrt(var + eps)


def transformer_encoder_kernel(x_ref, wemb_ref, bias0_ref,
                               watt_ref, batt_ref, w1_ref, b1_ref, w2_ref, b2_ref,
                               wout_ref, bout_ref, o_ref):
    f32 = jnp.float32
    x = x_ref[...].astype(f32)                       # (TM, input_dim)
    input_dim = x.shape[-1]
    wemb = wemb_ref[...].astype(f32)                 # (input_dim, D)
    D = wemb.shape[-1]
    inv_d = jnp.full((D, 1), 1.0 / D, dtype=f32)     # hoisted once; used by every LN

    # --- embedding: nn.Linear(input_dim, D). input_dim is tiny (1 in the module), so an
    #     unrolled broadcast-MAC replaces a degenerate K=1 MXU matmul. ---
    if input_dim >= 8:
        h = jnp.dot(x, wemb, preferred_element_type=f32)
    else:
        h = x[:, 0:1] * wemb[0:1, :]
        for d in range(1, input_dim):
            h = h + x[:, d:d + 1] * wemb[d:d + 1, :]
    h = h + bias0_ref[...]                           # fused (embedding bias + pe[0])

    num_layers = watt_ref.shape[0]
    for l in range(num_layers):                      # static unroll; weights VMEM-resident
        # Pre-norm attention block, collapsed: seq_len == 1 => softmax == 1, and
        # LN1 affine + Wv + Wo are folded into a single (D, D) weight at pack time.
        y = _norm(h, inv_d)
        h = h + jnp.dot(y, watt_ref[l], preferred_element_type=f32) + batt_ref[l]
        # Pre-norm FFN block (ReLU); LN2 affine folded into W1. Dropout == identity (eval).
        y = _norm(h, inv_d)
        ff = jnp.maximum(jnp.dot(y, w1_ref[l], preferred_element_type=f32) + b1_ref[l], 0.0)
        h = h + jnp.dot(ff, w2_ref[l], preferred_element_type=f32) + b2_ref[l]

    # Final projection into a lane-dense (padded-to-128) output slab -> unmasked vst.
    out = jnp.dot(h, wout_ref[...], preferred_element_type=f32) + bout_ref[...]
    o_ref[...] = out.astype(o_ref.dtype)


# ----------------------------- wrapper -----------------------------

def _round_up(x, m):
    return (x + m - 1) // m * m


def _resident_spec(w):
    ndim = w.ndim

    def idx(i):
        return (0,) * ndim

    return pl.BlockSpec(w.shape, idx)


def _choose_tile_m(M):
    """Large tiles to amortize ~0.35 us per-grid-step overhead, but keep >= 2 row tiles
    (each >= 128 rows) when possible so a core-parallel grid axis can use both v7x TCs."""
    m8 = _round_up(M, 8)
    half = _round_up(pl.cdiv(m8, 2), 8)
    if half >= 128:
        return min(512, half)
    return min(512, m8)


def transformer_forward(src2d, kp, *, tile_m=None):
    """src2d: [M, input_dim].  kp: packed kernel params (see pack_kernel_params)."""
    M, input_dim = src2d.shape
    D = kp['w_emb'].shape[1]
    L = kp['w_att'].shape[0]
    F = kp['w1'].shape[-1]
    out_dim = kp['w_final'].shape[-1]

    # Lane-dense output slab (slice back to out_dim outside the kernel).
    out_pad = _round_up(out_dim, 128)
    w_final = jnp.pad(kp['w_final'], ((0, 0), (0, out_pad - out_dim)))
    b_final = jnp.pad(kp['b_final'], ((0, 0), (0, out_pad - out_dim)))

    if tile_m is None:
        tile_m = _choose_tile_m(M)
    m_pad = _round_up(M, tile_m)
    x = src2d if m_pad == M else jnp.pad(src2d, ((0, m_pad - M), (0, 0)))
    grid = (m_pad // tile_m,)

    weights = [kp['w_emb'], kp['bias0'], kp['w_att'], kp['b_att'],
               kp['w1'], kp['b1'], kp['w2'], kp['b2'], w_final, b_final]

    in_specs = [pl.BlockSpec((tile_m, input_dim), lambda i: (i, 0))]
    in_specs += [_resident_spec(w) for w in weights]
    out_spec = pl.BlockSpec((tile_m, out_pad), lambda i: (i, 0))

    weight_bytes = sum(int(w.size) * w.dtype.itemsize for w in weights)
    flops = 2 * m_pad * (input_dim * D + L * (D * D + 2 * D * F + 4 * D) + D * out_pad)
    bytes_accessed = int(x.size) * x.dtype.itemsize + weight_bytes + m_pad * out_pad * 4
    cost = pl.CostEstimate(flops=int(flops),
                           transcendentals=int(2 * L * m_pad),   # one rsqrt per LN row
                           bytes_accessed=int(bytes_accessed))

    tile_bytes = tile_m * (input_dim + out_pad + 4 * D + F) * 4
    # Cap at 48 MiB: leaves Mosaic scratch / double-buffer headroom under v7x's 64 MiB per-TC VMEM.
    vmem_limit = int(min(max(2 * weight_bytes + 4 * tile_bytes, 16 * 2 ** 20), 48 * 2 ** 20))

    def run(dim_sem):
        out = pl.pallas_call(
            transformer_encoder_kernel,
            out_shape=jax.ShapeDtypeStruct((m_pad, out_pad), src2d.dtype),
            grid_spec=pltpu.PrefetchScalarGridSpec(
                num_scalar_prefetch=0,
                grid=grid,
                in_specs=in_specs,
                out_specs=out_spec,
            ),
            compiler_params=pltpu.CompilerParams(
                dimension_semantics=(dim_sem,),
                vmem_limit_bytes=vmem_limit,
            ),
            cost_estimate=cost,
        )(x, *weights)
        return jax.block_until_ready(out)

    try:
        # CORE_PARALLEL is what actually shards independent row tiles across both v7x TensorCores.
        out = run(pltpu.CORE_PARALLEL)
    except Exception:
        # Single-TC chips / lowerings that reject core-parallel: plain grid.
        out = run("parallel")

    return out[:M, :out_dim]


# ----------------------------- parameters, packing & reference -----------------------------

def init_params(key, *, input_dim, output_dim, hidden_dim, num_layers, num_heads,
                ffn_dim, max_len=32):
    D, F = hidden_dim, ffn_dim
    assert D % num_heads == 0 and D % 2 == 0

    def uniform(k, shape, fan_in):
        bound = 1.0 / math.sqrt(fan_in)
        return jax.random.uniform(k, shape, jnp.float32, -bound, bound)

    keys = jax.random.split(key, 4 + num_layers)
    params = {
        'w_emb': uniform(keys[0], (input_dim, D), input_dim),   # stored transposed vs torch.nn.Linear
        'b_emb': uniform(keys[1], (D,), input_dim),
        'w_final': uniform(keys[2], (D, output_dim), D),
        'b_final': uniform(keys[3], (1, output_dim), D),
        'num_heads': num_heads,
    }

    # Sinusoidal table from RoPEPositionalEncoding.__init__
    position = jnp.arange(max_len, dtype=jnp.float32)[:, None]
    div_term = jnp.exp(jnp.arange(0, D, 2, dtype=jnp.float32) * (-math.log(10000.0) / D))
    pe = jnp.zeros((max_len, 1, D), jnp.float32)
    pe = pe.at[:, 0, 0::2].set(jnp.sin(position * div_term))
    pe = pe.at[:, 0, 1::2].set(jnp.cos(position * div_term))
    params['pe'] = pe

    layers = []
    for l in range(num_layers):
        ks = jax.random.split(keys[4 + l], 12)
        layers.append({
            'ln1_g': 1.0 + 0.05 * jax.random.normal(ks[0], (D,), jnp.float32),
            'ln1_b': 0.05 * jax.random.normal(ks[1], (D,), jnp.float32),
            'w_in': uniform(ks[2], (D, 3 * D), D),     # transposed in_proj_weight (Q|K|V)
            'b_in': uniform(ks[3], (3 * D,), D),
            'w_out': uniform(ks[4], (D, D), D),        # transposed out_proj.weight
            'b_out': uniform(ks[5], (D,), D),
            'ln2_g': 1.0 + 0.05 * jax.random.normal(ks[6], (D,), jnp.float32),
            'ln2_b': 0.05 * jax.random.normal(ks[7], (D,), jnp.float32),
            'w1': uniform(ks[8], (D, F), D),
            'b1': uniform(ks[9], (F,), D),
            'w2': uniform(ks[10], (F, D), F),
            'b2': uniform(ks[11], (D,), F),
        })
    params['layers'] = layers
    return params


def pack_kernel_params(params):
    """Pack-time algebra (exact, f32 HIGHEST): fuse Wv@Wo, fold LN affine into the next matmul,
    fuse embedding bias + pe[0].  TODO(synk): optionally cast packed weights to bf16 for the
    real 768-dim config (re-validate tolerance)."""
    hp = lax.Precision.HIGHEST
    D = params['w_emb'].shape[1]
    layers = params['layers']
    st = lambda name: jnp.stack([lyr[name] for lyr in layers])

    w_in, b_in = st('w_in'), st('b_in')
    w_v = w_in[:, :, 2 * D:]                           # (L, D, D) value-projection slice
    b_v = b_in[:, 2 * D:]                              # (L, D)
    w_o, b_o = st('w_out'), st('b_out')
    ln1_g, ln1_b = st('ln1_g'), st('ln1_b')
    ln2_g, ln2_b = st('ln2_g'), st('ln2_b')
    w1, b1 = st('w1'), st('b1')
    w2, b2 = st('w2'), st('b2')

    # attention (softmax over 1 key == 1): out = (norm(h)*g1 + b1) @ Wv @ Wo + bv @ Wo + bo
    w_att = jnp.einsum('lde,lef->ldf', ln1_g[:, :, None] * w_v, w_o, precision=hp)
    b_att = jnp.einsum('le,lef->lf',
                       jnp.einsum('ld,lde->le', ln1_b, w_v, precision=hp) + b_v,
                       w_o, precision=hp) + b_o
    # FFN first matmul with LN2 affine folded in.
    w1f = ln2_g[:, :, None] * w1
    b1f = jnp.einsum('ld,ldf->lf', ln2_b, w1, precision=hp) + b1

    return {
        'w_emb': params['w_emb'],
        'bias0': params['b_emb'].reshape(1, D) + params['pe'][0],   # embedding bias + pe[0]
        'w_att': w_att,
        'b_att': b_att[:, None, :],
        'w1': w1f,
        'b1': b1f[:, None, :],
        'w2': w2,
        'b2': b2[:, None, :],
        'w_final': params['w_final'],
        'b_final': params['b_final'],
    }


def _layer_norm_ref(h, gamma, beta, eps=1e-5):
    mean = jnp.mean(h, axis=-1, keepdims=True)
    c = h - mean
    var = jnp.mean(c * c, axis=-1, keepdims=True)
    return c * lax.rsqrt(var + eps) * gamma + beta


def reference_forward(src, params):
    """Pure-JAX faithful reference of the PyTorch forward (full MHA, S=1 after unsqueeze(0))."""
    hp = lax.Precision.HIGHEST
    D = params['w_emb'].shape[1]
    H = params['num_heads']
    h = jnp.dot(src, params['w_emb'], precision=hp) + params['b_emb']
    x = h[None]                                        # src.unsqueeze(0) -> [1, N, D]
    x = x + params['pe'][: x.shape[0]]                 # adds pe[0] only
    S, B, _ = x.shape
    dh = D // H
    for lyr in params['layers']:
        y = _layer_norm_ref(x, lyr['ln1_g'], lyr['ln1_b'])
        qkv = jnp.dot(y, lyr['w_in'], precision=hp) + lyr['b_in']
        q, k, v = jnp.split(qkv, 3, axis=-1)

        def heads(t):
            return jnp.transpose(t.reshape(S, B, H, dh), (1, 2, 0, 3))

        qh, kh, vh = heads(q), heads(k), heads(v)
        scores = jnp.einsum('bhsd,bhtd->bhst', qh, kh, precision=hp) / math.sqrt(dh)
        attn_w = jax.nn.softmax(scores, axis=-1)
        o = jnp.einsum('bhst,bhtd->bhsd', attn_w, vh, precision=hp)
        o = jnp.transpose(o, (2, 0, 1, 3)).reshape(S, B, D)
        x = x + jnp.dot(o, lyr['w_out'], precision=hp) + lyr['b_out']
        y2 = _layer_norm_ref(x, lyr['ln2_g'], lyr['ln2_b'])
        ff = jax.nn.relu(jnp.dot(y2, lyr['w1'], precision=hp) + lyr['b1'])
        x = x + jnp.dot(ff, lyr['w2'], precision=hp) + lyr['b2']
    return jnp.dot(x, params['w_final'], precision=hp) + params['b_final']


if __name__ == "__main__":
    key = jax.random.PRNGKey(0)

    # Small config consistent with the module (scaled down from 768/12/12 defaults).
    seq_len = 256                         # number of src rows (time samples)
    input_dim, output_dim = 1, 1
    hidden_dim, num_layers, num_heads = 64, 2, 4
    ffn_dim = hidden_dim                  # nn.TransformerEncoderLayer(hidden, heads, hidden)

    k_param, k_data = jax.random.split(key)
    params = init_params(k_param, input_dim=input_dim, output_dim=output_dim,
                         hidden_dim=hidden_dim, num_layers=num_layers,
                         num_heads=num_heads, ffn_dim=ffn_dim)
    src = jax.random.normal(k_data, (seq_len, input_dim), jnp.float32)

    kparams = pack_kernel_params(params)
    out2d = transformer_forward(src, kparams)
    out = out2d[None]                     # module output shape: [1, N, output_dim]
    jax.block_until_ready(out)

    ref = reference_forward(src, params)
    assert out.shape == (1, seq_len, output_dim)
    max_err = float(jnp.max(jnp.abs(out - ref)))
    assert jnp.allclose(out, ref, atol=1e-3, rtol=1e-3), f"mismatch vs reference, max_err={max_err}"

    print("KERNEL_OK")
</pallas_src>

<mosaic_0001>
module attributes {stable_mosaic.version = 11 : i64} {
  func.func @transformer_encoder_kernel(%arg0: i32, %arg1: memref<128x1xf32, #tpu.memory_space<vmem>>, %arg2: memref<1x64xf32, #tpu.memory_space<vmem>>, %arg3: memref<1x64xf32, #tpu.memory_space<vmem>>, %arg4: memref<2x64x64xf32, #tpu.memory_space<vmem>>, %arg5: memref<2x1x64xf32, #tpu.memory_space<vmem>>, %arg6: memref<2x64x64xf32, #tpu.memory_space<vmem>>, %arg7: memref<2x1x64xf32, #tpu.memory_space<vmem>>, %arg8: memref<2x64x64xf32, #tpu.memory_space<vmem>>, %arg9: memref<2x1x64xf32, #tpu.memory_space<vmem>>, %arg10: memref<64x128xf32, #tpu.memory_space<vmem>>, %arg11: memref<1x128xf32, #tpu.memory_space<vmem>>, %arg12: memref<128x128xf32, #tpu.memory_space<vmem>>) attributes {dimension_semantics = [#tpu.dimension_semantics<core_parallel>], iteration_bounds = array<i64: 2>, scalar_prefetch = 0 : i64, scratch_operands = 0 : i64, tpu.core_type = #tpu.core_type<tc>, window_params = [{transform_indices = @transform_0, window_bounds = array<i64: 128, 1>}, {pipeline_mode = #tpu.pipeline_mode<synchronous>, transform_indices = @transform_1, window_bounds = array<i64: 1, 64>}, {pipeline_mode = #tpu.pipeline_mode<synchronous>, transform_indices = @transform_2, window_bounds = array<i64: 1, 64>}, {pipeline_mode = #tpu.pipeline_mode<synchronous>, transform_indices = @transform_3, window_bounds = array<i64: 2, 64, 64>}, {pipeline_mode = #tpu.pipeline_mode<synchronous>, transform_indices = @transform_4, window_bounds = array<i64: 2, 1, 64>}, {pipeline_mode = #tpu.pipeline_mode<synchronous>, transform_indices = @transform_5, window_bounds = array<i64: 2, 64, 64>}, {pipeline_mode = #tpu.pipeline_mode<synchronous>, transform_indices = @transform_6, window_bounds = array<i64: 2, 1, 64>}, {pipeline_mode = #tpu.pipeline_mode<synchronous>, transform_indices = @transform_7, window_bounds = array<i64: 2, 64, 64>}, {pipeline_mode = #tpu.pipeline_mode<synchronous>, transform_indices = @transform_8, window_bounds = array<i64: 2, 1, 64>}, {pipeline_mode = #tpu.pipeline_mode<synchronous>, transform_indices = @transform_9, window_bounds = array<i64: 64, 128>}, {pipeline_mode = #tpu.pipeline_mode<synchronous>, transform_indices = @transform_10, window_bounds = array<i64: 1, 128>}, {transform_indices = @transform_11, window_bounds = array<i64: 128, 128>}]} {
    %c0 = arith.constant 0 : index
    %c0_0 = arith.constant 0 : index
    %0 = vector.load %arg1[%c0, %c0_0] : memref<128x1xf32, #tpu.memory_space<vmem>>, vector<128x1xf32>
    %c0_1 = arith.constant 0 : index
    %c0_2 = arith.constant 0 : index
    %1 = vector.load %arg2[%c0_1, %c0_2] : memref<1x64xf32, #tpu.memory_space<vmem>>, vector<1x64xf32>
    %cst = arith.constant 1.562500e-02 : f32
    %2 = vector.broadcast %cst : f32 to vector<64x1xf32>
    %3 = vector.broadcast %0 : vector<128x1xf32> to vector<128x64xf32>
    %4 = vector.broadcast %1 : vector<1x64xf32> to vector<128x64xf32>
    %5 = arith.mulf %3, %4 : vector<128x64xf32>
    %c0_3 = arith.constant 0 : index
    %c0_4 = arith.constant 0 : index
    %6 = vector.load %arg3[%c0_3, %c0_4] : memref<1x64xf32, #tpu.memory_space<vmem>>, vector<1x64xf32>
    %7 = vector.broadcast %6 : vector<1x64xf32> to vector<128x64xf32>
    %8 = arith.addf %5, %7 : vector<128x64xf32>
    %cst_5 = arith.constant dense<0.000000e+00> : vector<128x1xf32>
    %9 = tpu.matmul %8, %2, %cst_5 {dimension_numbers = #tpu.dot_dimension_numbers<[1], [0], [0], [1], [0, 0, 1, 1], [], []>} : vector<128x64xf32>, vector<64x1xf32>, vector<128x1xf32> -> vector<128x1xf32>
    %10 = arith.mulf %8, %8 : vector<128x64xf32>
    %cst_6 = arith.constant dense<0.000000e+00> : vector<128x1xf32>
    %11 = tpu.matmul %10, %2, %cst_6 {dimension_numbers = #tpu.dot_dimension_numbers<[1], [0], [0], [1], [0, 0, 1, 1], [], []>} : vector<128x64xf32>, vector<64x1xf32>, vector<128x1xf32> -> vector<128x1xf32>
    %12 = arith.mulf %9, %9 : vector<128x1xf32>
    %13 = arith.subf %11, %12 : vector<128x1xf32>
    %cst_7 = arith.constant 0.000000e+00 : f32
    %14 = vector.broadcast %cst_7 : f32 to vector<128x1xf32>
    %15 = arith.maximumf %13, %14 : vector<128x1xf32>
    %16 = vector.broadcast %9 : vector<128x1xf32> to vector<128x64xf32>
    %17 = arith.subf %8, %16 : vector<128x64xf32>
    %cst_8 = arith.constant 9.99999974E-6 : f32
    %18 = vector.broadcast %cst_8 : f32 to vector<128x1xf32>
    %19 = arith.addf %15, %18 : vector<128x1xf32>
    %20 = math.rsqrt %19 : vector<128x1xf32>
    %21 = vector.broadcast %20 : vector<128x1xf32> to vector<128x64xf32>
    %22 = arith.mulf %17, %21 : vector<128x64xf32>
    %c0_9 = arith.constant 0 : index
    %c0_10 = arith.constant 0 : index
    %c0_11 = arith.constant 0 : index
    %23 = vector.load %arg4[%c0_9, %c0_10, %c0_11] : memref<2x64x64xf32, #tpu.memory_space<vmem>>, vector<1x64x64xf32>
    %24 = vector.shape_cast %23 : vector<1x64x64xf32> to vector<64x64xf32>
    %cst_12 = arith.constant dense<0.000000e+00> : vector<128x64xf32>
    %25 = tpu.matmul %22, %24, %cst_12 {dimension_numbers = #tpu.dot_dimension_numbers<[1], [0], [0], [1], [0, 0, 1, 1], [], []>} : vector<128x64xf32>, vector<64x64xf32>, vector<128x64xf32> -> vector<128x64xf32>
    %26 = arith.addf %8, %25 : vector<128x64xf32>
    %c0_13 = arith.constant 0 : index
    %c0_14 = arith.constant 0 : index
    %c0_15 = arith.constant 0 : index
    %27 = vector.load %arg5[%c0_13, %c0_14, %c0_15] : memref<2x1x64xf32, #tpu.memory_space<vmem>>, vector<1x1x64xf32>
    %28 = vector.shape_cast %27 : vector<1x1x64xf32> to vector<1x64xf32>
    %29 = vector.broadcast %28 : vector<1x64xf32> to vector<128x64xf32>
    %30 = arith.addf %26, %29 : vector<128x64xf32>
    %cst_16 = arith.constant dense<0.000000e+00> : vector<128x1xf32>
    %31 = tpu.matmul %30, %2, %cst_16 {dimension_numbers = #tpu.dot_dimension_numbers<[1], [0], [0], [1], [0, 0, 1, 1], [], []>} : vector<128x64xf32>, vector<64x1xf32>, vector<128x1xf32> -> vector<128x1xf32>
    %32 = arith.mulf %30, %30 : vector<128x64xf32>
    %cst_17 = arith.constant dense<0.000000e+00> : vector<128x1xf32>
    %33 = tpu.matmul %32, %2, %cst_17 {dimension_numbers = #tpu.dot_dimension_numbers<[1], [0], [0], [1], [0, 0, 1, 1], [], []>} : vector<128x64xf32>, vector<64x1xf32>, vector<128x1xf32> -> vector<128x1xf32>
    %34 = arith.mulf %31, %31 : vector<128x1xf32>
    %35 = arith.subf %33, %34 : vector<128x1xf32>
    %cst_18 = arith.constant 0.000000e+00 : f32
    %36 = vector.broadcast %cst_18 : f32 to vector<128x1xf32>
    %37 = arith.maximumf %35, %36 : vector<128x1xf32>
    %38 = vector.broadcast %31 : vector<128x1xf32> to vector<128x64xf32>
    %39 = arith.subf %30, %38 : vector<128x64xf32>
    %cst_19 = arith.constant 9.99999974E-6 : f32
    %40 = vector.broadcast %cst_19 : f32 to vector<128x1xf32>
    %41 = arith.addf %37, %40 : vector<128x1xf32>
    %42 = math.rsqrt %41 : vector<128x1xf32>
    %43 = vector.broadcast %42 : vector<128x1xf32> to vector<128x64xf32>
    %44 = arith.mulf %39, %43 : vector<128x64xf32>
    %c0_20 = arith.constant 0 : index
    %c0_21 = arith.constant 0 : index
    %c0_22 = arith.constant 0 : index
    %45 = vector.load %arg6[%c0_20, %c0_21, %c0_22] : memref<2x64x64xf32, #tpu.memory_space<vmem>>, vector<1x64x64xf32>
    %46 = vector.shape_cast %45 : vector<1x64x64xf32> to vector<64x64xf32>
    %cst_23 = arith.constant dense<0.000000e+00> : vector<128x64xf32>
    %47 = tpu.matmul %44, %46, %cst_23 {dimension_numbers = #tpu.dot_dimension_numbers<[1], [0], [0], [1], [0, 0, 1, 1], [], []>} : vector<128x64xf32>, vector<64x64xf32>, vector<128x64xf32> -> vector<128x64xf32>
    %c0_24 = arith.constant 0 : index
    %c0_25 = arith.constant 0 : index
    %c0_26 = arith.constant 0 : index
    %48 = vector.load %arg7[%c0_24, %c0_25, %c0_26] : memref<2x1x64xf32, #tpu.memory_space<vmem>>, vector<1x1x64xf32>
    %49 = vector.shape_cast %48 : vector<1x1x64xf32> to vector<1x64xf32>
    %50 = vector.broadcast %49 : vector<1x64xf32> to vector<128x64xf32>
    %51 = arith.addf %47, %50 : vector<128x64xf32>
    %cst_27 = arith.constant 0.000000e+00 : f32
    %52 = vector.broadcast %cst_27 : f32 to vector<128x64xf32>
    %53 = arith.maximumf %51, %52 : vector<128x64xf32>
    %c0_28 = arith.constant 0 : index
    %c0_29 = arith.constant 0 : index
    %c0_30 = arith.constant 0 : index
    %54 = vector.load %arg8[%c0_28, %c0_29, %c0_30] : memref<2x64x64xf32, #tpu.memory_space<vmem>>, vector<1x64x64xf32>
    %55 = vector.shape_cast %54 : vector<1x64x64xf32> to vector<64x64xf32>
    %cst_31 = arith.constant dense<0.000000e+00> : vector<128x64xf32>
    %56 = tpu.matmul %53, %55, %cst_31 {dimension_numbers = #tpu.dot_dimension_numbers<[1], [0], [0], [1], [0, 0, 1, 1], [], []>} : vector<128x64xf32>, vector<64x64xf32>, vector<128x64xf32> -> vector<128x64xf32>
    %57 = arith.addf %30, %56 : vector<128x64xf32>
    %c0_32 = arith.constant 0 : index
    %c0_33 = arith.constant 0 : index
    %c0_34 = arith.constant 0 : index
    %58 = vector.load %arg9[%c0_32, %c0_33, %c0_34] : memref<2x1x64xf32, #tpu.memory_space<vmem>>, vector<1x1x64xf32>
    %59 = vector.shape_cast %58 : vector<1x1x64xf32> to vector<1x64xf32>
    %60 = vector.broadcast %59 : vector<1x64xf32> to vector<128x64xf32>
    %61 = arith.addf %57, %60 : vector<128x64xf32>
    %cst_35 = arith.constant dense<0.000000e+00> : vector<128x1xf32>
    %62 = tpu.matmul %61, %2, %cst_35 {dimension_numbers = #tpu.dot_dimension_numbers<[1], [0], [0], [1], [0, 0, 1, 1], [], []>} : vector<128x64xf32>, vector<64x1xf32>, vector<128x1xf32> -> vector<128x1xf32>
    %63 = arith.mulf %61, %61 : vector<128x64xf32>
    %cst_36 = arith.constant dense<0.000000e+00> : vector<128x1xf32>
    %64 = tpu.matmul %63, %2, %cst_36 {dimension_numbers = #tpu.dot_dimension_numbers<[1], [0], [0], [1], [0, 0, 1, 1], [], []>} : vector<128x64xf32>, vector<64x1xf32>, vector<128x1xf32> -> vector<128x1xf32>
    %65 = arith.mulf %62, %62 : vector<128x1xf32>
    %66 = arith.subf %64, %65 : vector<128x1xf32>
    %cst_37 = arith.constant 0.000000e+00 : f32
    %67 = vector.broadcast %cst_37 : f32 to vector<128x1xf32>
    %68 = arith.maximumf %66, %67 : vector<128x1xf32>
    %69 = vector.broadcast %62 : vector<128x1xf32> to vector<128x64xf32>
    %70 = arith.subf %61, %69 : vector<128x64xf32>
    %cst_38 = arith.constant 9.99999974E-6 : f32
    %71 = vector.broadcast %cst_38 : f32 to vector<128x1xf32>
    %72 = arith.addf %68, %71 : vector<128x1xf32>
    %73 = math.rsqrt %72 : vector<128x1xf32>
    %74 = vector.broadcast %73 : vector<128x1xf32> to vector<128x64xf32>
    %75 = arith.mulf %70, %74 : vector<128x64xf32>
    %c1 = arith.constant 1 : index
    %c0_39 = arith.constant 0 : index
    %c0_40 = arith.constant 0 : index
    %76 = vector.load %arg4[%c1, %c0_39, %c0_40] : memref<2x64x64xf32, #tpu.memory_space<vmem>>, vector<1x64x64xf32>
    %77 = vector.shape_cast %76 : vector<1x64x64xf32> to vector<64x64xf32>
    %cst_41 = arith.constant dense<0.000000e+00> : vector<128x64xf32>
    %78 = tpu.matmul %75, %77, %cst_41 {dimension_numbers = #tpu.dot_dimension_numbers<[1], [0], [0], [1], [0, 0, 1, 1], [], []>} : vector<128x64xf32>, vector<64x64xf32>, vector<128x64xf32> -> vector<128x64xf32>
    %79 = arith.addf %61, %78 : vector<128x64xf32>
    %c1_42 = arith.constant 1 : index
    %c0_43 = arith.constant 0 : index
    %c0_44 = arith.constant 0 : index
    %80 = vector.load %arg5[%c1_42, %c0_43, %c0_44] : memref<2x1x64xf32, #tpu.memory_space<vmem>>, vector<1x1x64xf32>
    %81 = vector.shape_cast %80 : vector<1x1x64xf32> to vector<1x64xf32>
    %82 = vector.broadcast %81 : vector<1x64xf32> to vector<128x64xf32>
    %83 = arith.addf %79, %82 : vector<128x64xf32>
    %cst_45 = arith.constant dense<0.000000e+00> : vector<128x1xf32>
    %84 = tpu.matmul %83, %2, %cst_45 {dimension_numbers = #tpu.dot_dimension_numbers<[1], [0], [0], [1], [0, 0, 1, 1], [], []>} : vector<128x64xf32>, vector<64x1xf32>, vector<128x1xf32> -> vector<128x1xf32>
    %85 = arith.mulf %83, %83 : vector<128x64xf32>
    %cst_46 = arith.constant dense<0.000000e+00> : vector<128x1xf32>
    %86 = tpu.matmul %85, %2, %cst_46 {dimension_numbers = #tpu.dot_dimension_numbers<[1], [0], [0], [1], [0, 0, 1, 1], [], []>} : vector<128x64xf32>, vector<64x1xf32>, vector<128x1xf32> -> vector<128x1xf32>
    %87 = arith.mulf %84, %84 : vector<128x1xf32>
    %88 = arith.subf %86, %87 : vector<128x1xf32>
    %cst_47 = arith.constant 0.000000e+00 : f32
    %89 = vector.broadcast %cst_47 : f32 to vector<128x1xf32>
    %90 = arith.maximumf %88, %89 : vector<128x1xf32>
    %91 = vector.broadcast %84 : vector<128x1xf32> to vector<128x64xf32>
    %92 = arith.subf %83, %91 : vector<128x64xf32>
    %cst_48 = arith.constant 9.99999974E-6 : f32
    %93 = vector.broadcast %cst_48 : f32 to vector<128x1xf32>
    %94 = arith.addf %90, %93 : vector<128x1xf32>
    %95 = math.rsqrt %94 : vector<128x1xf32>
    %96 = vector.broadcast %95 : vector<128x1xf32> to vector<128x64xf32>
    %97 = arith.mulf %92, %96 : vector<128x64xf32>
    %c1_49 = arith.constant 1 : index
    %c0_50 = arith.constant 0 : index
    %c0_51 = arith.constant 0 : index
    %98 = vector.load %arg6[%c1_49, %c0_50, %c0_51] : memref<2x64x64xf32, #tpu.memory_space<vmem>>, vector<1x64x64xf32>
    %99 = vector.shape_cast %98 : vector<1x64x64xf32> to vector<64x64xf32>
    %cst_52 = arith.constant dense<0.000000e+00> : vector<128x64xf32>
    %100 = tpu.matmul %97, %99, %cst_52 {dimension_numbers = #tpu.dot_dimension_numbers<[1], [0], [0], [1], [0, 0, 1, 1], [], []>} : vector<128x64xf32>, vector<64x64xf32>, vector<128x64xf32> -> vector<128x64xf32>
    %c1_53 = arith.constant 1 : index
    %c0_54 = arith.constant 0 : index
    %c0_55 = arith.constant 0 : index
    %101 = vector.load %arg7[%c1_53, %c0_54, %c0_55] : memref<2x1x64xf32, #tpu.memory_space<vmem>>, vector<1x1x64xf32>
    %102 = vector.shape_cast %101 : vector<1x1x64xf32> to vector<1x64xf32>
    %103 = vector.broadcast %102 : vector<1x64xf32> to vector<128x64xf32>
    %104 = arith.addf %100, %103 : vector<128x64xf32>
    %cst_56 = arith.constant 0.000000e+00 : f32
    %105 = vector.broadcast %cst_56 : f32 to vector<128x64xf32>
    %106 = arith.maximumf %104, %105 : vector<128x64xf32>
    %c1_57 = arith.constant 1 : index
    %c0_58 = arith.constant 0 : index
    %c0_59 = arith.constant 0 : index
    %107 = vector.load %arg8[%c1_57, %c0_58, %c0_59] : memref<2x64x64xf32, #tpu.memory_space<vmem>>, vector<1x64x64xf32>
    %108 = vector.shape_cast %107 : vector<1x64x64xf32> to vector<64x64xf32>
    %cst_60 = arith.constant dense<0.000000e+00> : vector<128x64xf32>
    %109 = tpu.matmul %106, %108, %cst_60 {dimension_numbers = #tpu.dot_dimension_numbers<[1], [0], [0], [1], [0, 0, 1, 1], [], []>} : vector<128x64xf32>, vector<64x64xf32>, vector<128x64xf32> -> vector<128x64xf32>
    %110 = arith.addf %83, %109 : vector<128x64xf32>
    %c1_61 = arith.constant 1 : index
    %c0_62 = arith.constant 0 : index
    %c0_63 = arith.constant 0 : index
    %111 = vector.load %arg9[%c1_61, %c0_62, %c0_63] : memref<2x1x64xf32, #tpu.memory_space<vmem>>, vector<1x1x64xf32>
    %112 = vector.shape_cast %111 : vector<1x1x64xf32> to vector<1x64xf32>
    %113 = vector.broadcast %112 : vector<1x64xf32> to vector<128x64xf32>
    %114 = arith.addf %110, %113 : vector<128x64xf32>
    %c0_64 = arith.constant 0 : index
    %c0_65 = arith.constant 0 : index
    %115 = vector.load %arg10[%c0_64, %c0_65] : memref<64x128xf32, #tpu.memory_space<vmem>>, vector<64x128xf32>
    %cst_66 = arith.constant dense<0.000000e+00> : vector<128x128xf32>
    %116 = tpu.matmul %114, %115, %cst_66 {dimension_numbers = #tpu.dot_dimension_numbers<[1], [0], [0], [1], [0, 0, 1, 1], [], []>} : vector<128x64xf32>, vector<64x128xf32>, vector<128x128xf32> -> vector<128x128xf32>
    %c0_67 = arith.constant 0 : index
    %c0_68 = arith.constant 0 : index
    %117 = vector.load %arg11[%c0_67, %c0_68] : memref<1x128xf32, #tpu.memory_space<vmem>>, vector<1x128xf32>
    %118 = vector.broadcast %117 : vector<1x128xf32> to vector<128x128xf32>
    %119 = arith.addf %116, %118 : vector<128x128xf32>
    %c0_69 = arith.constant 0 : index
    %c0_70 = arith.constant 0 : index
    %120 = vector.load %arg12[%c0_69, %c0_70] : memref<128x128xf32, #tpu.memory_space<vmem>>, vector<128x128xf32>
    tpu.vector_store %arg12[%c0_69, %c0_70], %119 {strides = array<i32>} : memref<128x128xf32, #tpu.memory_space<vmem>>, vector<128x128xf32>,
    return
  }
  func.func @transform_0(%arg0: i32) -> (i32, i32) {
    %c0_i32 = arith.constant 0 : i32
    %c0_i32_0 = arith.constant 0 : i32
    return %arg0, %c0_i32 : i32, i32
  }
  func.func @transform_1(%arg0: i32) -> (i32, i32) {
    %c0_i32 = arith.constant 0 : i32
    %c0_i32_0 = arith.constant 0 : i32
    %c0_i32_1 = arith.constant 0 : i32
    return %c0_i32, %c0_i32_0 : i32, i32
  }
  func.func @transform_2(%arg0: i32) -> (i32, i32) {
    %c0_i32 = arith.constant 0 : i32
    %c0_i32_0 = arith.constant 0 : i32
    %c0_i32_1 = arith.constant 0 : i32
    return %c0_i32, %c0_i32_0 : i32, i32
  }
  func.func @transform_3(%arg0: i32) -> (i32, i32, i32) {
    %c0_i32 = arith.constant 0 : i32
    %c0_i32_0 = arith.constant 0 : i32
    %c0_i32_1 = arith.constant 0 : i32
    %c0_i32_2 = arith.constant 0 : i32
    return %c0_i32, %c0_i32_0, %c0_i32_1 : i32, i32, i32
  }
  func.func @transform_4(%arg0: i32) -> (i32, i32, i32) {
    %c0_i32 = arith.constant 0 : i32
    %c0_i32_0 = arith.constant 0 : i32
    %c0_i32_1 = arith.constant 0 : i32
    %c0_i32_2 = arith.constant 0 : i32
    return %c0_i32, %c0_i32_0, %c0_i32_1 : i32, i32, i32
  }
  func.func @transform_5(%arg0: i32) -> (i32, i32, i32) {
    %c0_i32 = arith.constant 0 : i32
    %c0_i32_0 = arith.constant 0 : i32
    %c0_i32_1 = arith.constant 0 : i32
    %c0_i32_2 = arith.constant 0 : i32
    return %c0_i32, %c0_i32_0, %c0_i32_1 : i32, i32, i32
  }
  func.func @transform_6(%arg0: i32) -> (i32, i32, i32) {
    %c0_i32 = arith.constant 0 : i32
    %c0_i32_0 = arith.constant 0 : i32
    %c0_i32_1 = arith.constant 0 : i32
    %c0_i32_2 = arith.constant 0 : i32
    return %c0_i32, %c0_i32_0, %c0_i32_1 : i32, i32, i32
  }
  func.func @transform_7(%arg0: i32) -> (i32, i32, i32) {
    %c0_i32 = arith.constant 0 : i32
    %c0_i32_0 = arith.constant 0 : i32
    %c0_i32_1 = arith.constant 0 : i32
    %c0_i32_2 = arith.constant 0 : i32
    return %c0_i32, %c0_i32_0, %c0_i32_1 : i32, i32, i32
  }
  func.func @transform_8(%arg0: i32) -> (i32, i32, i32) {
    %c0_i32 = arith.constant 0 : i32
    %c0_i32_0 = arith.constant 0 : i32
    %c0_i32_1 = arith.constant 0 : i32
    %c0_i32_2 = arith.constant 0 : i32
    return %c0_i32, %c0_i32_0, %c0_i32_1 : i32, i32, i32
  }
  func.func @transform_9(%arg0: i32) -> (i32, i32) {
    %c0_i32 = arith.constant 0 : i32
    %c0_i32_0 = arith.constant 0 : i32
    %c0_i32_1 = arith.constant 0 : i32
    return %c0_i32, %c0_i32_0 : i32, i32
  }
  func.func @transform_10(%arg0: i32) -> (i32, i32) {
    %c0_i32 = arith.constant 0 : i32
    %c0_i32_0 = arith.constant 0 : i32
    %c0_i32_1 = arith.constant 0 : i32
    return %c0_i32, %c0_i32_0 : i32, i32
  }
  func.func @transform_11(%arg0: i32) -> (i32, i32) {
    %c0_i32 = arith.constant 0 : i32
    %c0_i32_0 = arith.constant 0 : i32
    return %arg0, %c0_i32 : i32, i32
  }
}

module attributes {stable_mosaic.version = 11 : i64} {
  func.func @transformer_encoder_kernel(%arg0: i32, %arg1: memref<128x1xf32, #tpu.memory_space<vmem>>, %arg2: memref<1x64xf32, #tpu.memory_space<vmem>>, %arg3: memref<1x64xf32, #tpu.memory_space<vmem>>, %arg4: memref<2x64x64xf32, #tpu.memory_space<vmem>>, %arg5: memref<2x1x64xf32, #tpu.memory_space<vmem>>, %arg6: memref<2x64x64xf32, #tpu.memory_space<vmem>>, %arg7: memref<2x1x64xf32, #tpu.memory_space<vmem>>, %arg8: memref<2x64x64xf32, #tpu.memory_space<vmem>>, %arg9: memref<2x1x64xf32, #tpu.memory_space<vmem>>, %arg10: memref<64x128xf32, #tpu.memory_space<vmem>>, %arg11: memref<1x128xf32, #tpu.memory_space<vmem>>, %arg12: memref<128x128xf32, #tpu.memory_space<vmem>>) attributes {dimension_semantics = [#tpu.dimension_semantics<parallel>], iteration_bounds = array<i64: 2>, scalar_prefetch = 0 : i64, scratch_operands = 0 : i64, tpu.core_type = #tpu.core_type<tc>, window_params = [{transform_indices = @transform_0, window_bounds = array<i64: 128, 1>}, {pipeline_mode = #tpu.pipeline_mode<synchronous>, transform_indices = @transform_1, window_bounds = array<i64: 1, 64>}, {pipeline_mode = #tpu.pipeline_mode<synchronous>, transform_indices = @transform_2, window_bounds = array<i64: 1, 64>}, {pipeline_mode = #tpu.pipeline_mode<synchronous>, transform_indices = @transform_3, window_bounds = array<i64: 2, 64, 64>}, {pipeline_mode = #tpu.pipeline_mode<synchronous>, transform_indices = @transform_4, window_bounds = array<i64: 2, 1, 64>}, {pipeline_mode = #tpu.pipeline_mode<synchronous>, transform_indices = @transform_5, window_bounds = array<i64: 2, 64, 64>}, {pipeline_mode = #tpu.pipeline_mode<synchronous>, transform_indices = @transform_6, window_bounds = array<i64: 2, 1, 64>}, {pipeline_mode = #tpu.pipeline_mode<synchronous>, transform_indices = @transform_7, window_bounds = array<i64: 2, 64, 64>}, {pipeline_mode = #tpu.pipeline_mode<synchronous>, transform_indices = @transform_8, window_bounds = array<i64: 2, 1, 64>}, {pipeline_mode = #tpu.pipeline_mode<synchronous>, transform_indices = @transform_9, window_bounds = array<i64: 64, 128>}, {pipeline_mode = #tpu.pipeline_mode<synchronous>, transform_indices = @transform_10, window_bounds = array<i64: 1, 128>}, {transform_indices = @transform_11, window_bounds = array<i64: 128, 128>}]} {
    %c0 = arith.constant 0 : index
    %c0_0 = arith.constant 0 : index
    %0 = vector.load %arg1[%c0, %c0_0] : memref<128x1xf32, #tpu.memory_space<vmem>>, vector<128x1xf32>
    %c0_1 = arith.constant 0 : index
    %c0_2 = arith.constant 0 : index
    %1 = vector.load %arg2[%c0_1, %c0_2] : memref<1x64xf32, #tpu.memory_space<vmem>>, vector<1x64xf32>
    %cst = arith.constant 1.562500e-02 : f32
    %2 = vector.broadcast %cst : f32 to vector<64x1xf32>
    %3 = vector.broadcast %0 : vector<128x1xf32> to vector<128x64xf32>
    %4 = vector.broadcast %1 : vector<1x64xf32> to vector<128x64xf32>
    %5 = arith.mulf %3, %4 : vector<128x64xf32>
    %c0_3 = arith.constant 0 : index
    %c0_4 = arith.constant 0 : index
    %6 = vector.load %arg3[%c0_3, %c0_4] : memref<1x64xf32, #tpu.memory_space<vmem>>, vector<1x64xf32>
    %7 = vector.broadcast %6 : vector<1x64xf32> to vector<128x64xf32>
    %8 = arith.addf %5, %7 : vector<128x64xf32>
    %cst_5 = arith.constant dense<0.000000e+00> : vector<128x1xf32>
    %9 = tpu.matmul %8, %2, %cst_5 {dimension_numbers = #tpu.dot_dimension_numbers<[1], [0], [0], [1], [0, 0, 1, 1], [], []>} : vector<128x64xf32>, vector<64x1xf32>, vector<128x1xf32> -> vector<128x1xf32>
    %10 = arith.mulf %8, %8 : vector<128x64xf32>
    %cst_6 = arith.constant dense<0.000000e+00> : vector<128x1xf32>
    %11 = tpu.matmul %10, %2, %cst_6 {dimension_numbers = #tpu.dot_dimension_numbers<[1], [0], [0], [1], [0, 0, 1, 1], [], []>} : vector<128x64xf32>, vector<64x1xf32>, vector<128x1xf32> -> vector<128x1xf32>
    %12 = arith.mulf %9, %9 : vector<128x1xf32>
    %13 = arith.subf %11, %12 : vector<128x1xf32>
    %cst_7 = arith.constant 0.000000e+00 : f32
    %14 = vector.broadcast %cst_7 : f32 to vector<128x1xf32>
    %15 = arith.maximumf %13, %14 : vector<128x1xf32>
    %16 = vector.broadcast %9 : vector<128x1xf32> to vector<128x64xf32>
    %17 = arith.subf %8, %16 : vector<128x64xf32>
    %cst_8 = arith.constant 9.99999974E-6 : f32
    %18 = vector.broadcast %cst_8 : f32 to vector<128x1xf32>
    %19 = arith.addf %15, %18 : vector<128x1xf32>
    %20 = math.rsqrt %19 : vector<128x1xf32>
    %21 = vector.broadcast %20 : vector<128x1xf32> to vector<128x64xf32>
    %22 = arith.mulf %17, %21 : vector<128x64xf32>
    %c0_9 = arith.constant 0 : index
    %c0_10 = arith.constant 0 : index
    %c0_11 = arith.constant 0 : index
    %23 = vector.load %arg4[%c0_9, %c0_10, %c0_11] : memref<2x64x64xf32, #tpu.memory_space<vmem>>, vector<1x64x64xf32>
    %24 = vector.shape_cast %23 : vector<1x64x64xf32> to vector<64x64xf32>
    %cst_12 = arith.constant dense<0.000000e+00> : vector<128x64xf32>
    %25 = tpu.matmul %22, %24, %cst_12 {dimension_numbers = #tpu.dot_dimension_numbers<[1], [0], [0], [1], [0, 0, 1, 1], [], []>} : vector<128x64xf32>, vector<64x64xf32>, vector<128x64xf32> -> vector<128x64xf32>
    %26 = arith.addf %8, %25 : vector<128x64xf32>
    %c0_13 = arith.constant 0 : index
    %c0_14 = arith.constant 0 : index
    %c0_15 = arith.constant 0 : index
    %27 = vector.load %arg5[%c0_13, %c0_14, %c0_15] : memref<2x1x64xf32, #tpu.memory_space<vmem>>, vector<1x1x64xf32>
    %28 = vector.shape_cast %27 : vector<1x1x64xf32> to vector<1x64xf32>
    %29 = vector.broadcast %28 : vector<1x64xf32> to vector<128x64xf32>
    %30 = arith.addf %26, %29 : vector<128x64xf32>
    %cst_16 = arith.constant dense<0.000000e+00> : vector<128x1xf32>
    %31 = tpu.matmul %30, %2, %cst_16 {dimension_numbers = #tpu.dot_dimension_numbers<[1], [0], [0], [1], [0, 0, 1, 1], [], []>} : vector<128x64xf32>, vector<64x1xf32>, vector<128x1xf32> -> vector<128x1xf32>
    %32 = arith.mulf %30, %30 : vector<128x64xf32>
    %cst_17 = arith.constant dense<0.000000e+00> : vector<128x1xf32>
    %33 = tpu.matmul %32, %2, %cst_17 {dimension_numbers = #tpu.dot_dimension_numbers<[1], [0], [0], [1], [0, 0, 1, 1], [], []>} : vector<128x64xf32>, vector<64x1xf32>, vector<128x1xf32> -> vector<128x1xf32>
    %34 = arith.mulf %31, %31 : vector<128x1xf32>
    %35 = arith.subf %33, %34 : vector<128x1xf32>
    %cst_18 = arith.constant 0.000000e+00 : f32
    %36 = vector.broadcast %cst_18 : f32 to vector<128x1xf32>
    %37 = arith.maximumf %35, %36 : vector<128x1xf32>
    %38 = vector.broadcast %31 : vector<128x1xf32> to vector<128x64xf32>
    %39 = arith.subf %30, %38 : vector<128x64xf32>
    %cst_19 = arith.constant 9.99999974E-6 : f32
    %40 = vector.broadcast %cst_19 : f32 to vector<128x1xf32>
    %41 = arith.addf %37, %40 : vector<128x1xf32>
    %42 = math.rsqrt %41 : vector<128x1xf32>
    %43 = vector.broadcast %42 : vector<128x1xf32> to vector<128x64xf32>
    %44 = arith.mulf %39, %43 : vector<128x64xf32>
    %c0_20 = arith.constant 0 : index
    %c0_21 = arith.constant 0 : index
    %c0_22 = arith.constant 0 : index
    %45 = vector.load %arg6[%c0_20, %c0_21, %c0_22] : memref<2x64x64xf32, #tpu.memory_space<vmem>>, vector<1x64x64xf32>
    %46 = vector.shape_cast %45 : vector<1x64x64xf32> to vector<64x64xf32>
    %cst_23 = arith.constant dense<0.000000e+00> : vector<128x64xf32>
    %47 = tpu.matmul %44, %46, %cst_23 {dimension_numbers = #tpu.dot_dimension_numbers<[1], [0], [0], [1], [0, 0, 1, 1], [], []>} : vector<128x64xf32>, vector<64x64xf32>, vector<128x64xf32> -> vector<128x64xf32>
    %c0_24 = arith.constant 0 : index
    %c0_25 = arith.constant 0 : index
    %c0_26 = arith.constant 0 : index
    %48 = vector.load %arg7[%c0_24, %c0_25, %c0_26] : memref<2x1x64xf32, #tpu.memory_space<vmem>>, vector<1x1x64xf32>
    %49 = vector.shape_cast %48 : vector<1x1x64xf32> to vector<1x64xf32>
    %50 = vector.broadcast %49 : vector<1x64xf32> to vector<128x64xf32>
    %51 = arith.addf %47, %50 : vector<128x64xf32>
    %cst_27 = arith.constant 0.000000e+00 : f32
    %52 = vector.broadcast %cst_27 : f32 to vector<128x64xf32>
    %53 = arith.maximumf %51, %52 : vector<128x64xf32>
    %c0_28 = arith.constant 0 : index
    %c0_29 = arith.constant 0 : index
    %c0_30 = arith.constant 0 : index
    %54 = vector.load %arg8[%c0_28, %c0_29, %c0_30] : memref<2x64x64xf32, #tpu.memory_space<vmem>>, vector<1x64x64xf32>
    %55 = vector.shape_cast %54 : vector<1x64x64xf32> to vector<64x64xf32>
    %cst_31 = arith.constant dense<0.000000e+00> : vector<128x64xf32>
    %56 = tpu.matmul %53, %55, %cst_31 {dimension_numbers = #tpu.dot_dimension_numbers<[1], [0], [0], [1], [0, 0, 1, 1], [], []>} : vector<128x64xf32>, vector<64x64xf32>, vector<128x64xf32> -> vector<128x64xf32>
    %57 = arith.addf %30, %56 : vector<128x64xf32>
    %c0_32 = arith.constant 0 : index
    %c0_33 = arith.constant 0 : index
    %c0_34 = arith.constant 0 : index
    %58 = vector.load %arg9[%c0_32, %c0_33, %c0_34] : memref<2x1x64xf32, #tpu.memory_space<vmem>>, vector<1x1x64xf32>
    %59 = vector.shape_cast %58 : vector<1x1x64xf32> to vector<1x64xf32>
    %60 = vector.broadcast %59 : vector<1x64xf32> to vector<128x64xf32>
    %61 = arith.addf %57, %60 : vector<128x64xf32>
    %cst_35 = arith.constant dense<0.000000e+00> : vector<128x1xf32>
    %62 = tpu.matmul %61, %2, %cst_35 {dimension_numbers = #tpu.dot_dimension_numbers<[1], [0], [0], [1], [0, 0, 1, 1], [], []>} : vector<128x64xf32>, vector<64x1xf32>, vector<128x1xf32> -> vector<128x1xf32>
    %63 = arith.mulf %61, %61 : vector<128x64xf32>
    %cst_36 = arith.constant dense<0.000000e+00> : vector<128x1xf32>
    %64 = tpu.matmul %63, %2, %cst_36 {dimension_numbers = #tpu.dot_dimension_numbers<[1], [0], [0], [1], [0, 0, 1, 1], [], []>} : vector<128x64xf32>, vector<64x1xf32>, vector<128x1xf32> -> vector<128x1xf32>
    %65 = arith.mulf %62, %62 : vector<128x1xf32>
    %66 = arith.subf %64, %65 : vector<128x1xf32>
    %cst_37 = arith.constant 0.000000e+00 : f32
    %67 = vector.broadcast %cst_37 : f32 to vector<128x1xf32>
    %68 = arith.maximumf %66, %67 : vector<128x1xf32>
    %69 = vector.broadcast %62 : vector<128x1xf32> to vector<128x64xf32>
    %70 = arith.subf %61, %69 : vector<128x64xf32>
    %cst_38 = arith.constant 9.99999974E-6 : f32
    %71 = vector.broadcast %cst_38 : f32 to vector<128x1xf32>
    %72 = arith.addf %68, %71 : vector<128x1xf32>
    %73 = math.rsqrt %72 : vector<128x1xf32>
    %74 = vector.broadcast %73 : vector<128x1xf32> to vector<128x64xf32>
    %75 = arith.mulf %70, %74 : vector<128x64xf32>
    %c1 = arith.constant 1 : index
    %c0_39 = arith.constant 0 : index
    %c0_40 = arith.constant 0 : index
    %76 = vector.load %arg4[%c1, %c0_39, %c0_40] : memref<2x64x64xf32, #tpu.memory_space<vmem>>, vector<1x64x64xf32>
    %77 = vector.shape_cast %76 : vector<1x64x64xf32> to vector<64x64xf32>
    %cst_41 = arith.constant dense<0.000000e+00> : vector<128x64xf32>
    %78 = tpu.matmul %75, %77, %cst_41 {dimension_numbers = #tpu.dot_dimension_numbers<[1], [0], [0], [1], [0, 0, 1, 1], [], []>} : vector<128x64xf32>, vector<64x64xf32>, vector<128x64xf32> -> vector<128x64xf32>
    %79 = arith.addf %61, %78 : vector<128x64xf32>
    %c1_42 = arith.constant 1 : index
    %c0_43 = arith.constant 0 : index
    %c0_44 = arith.constant 0 : index
    %80 = vector.load %arg5[%c1_42, %c0_43, %c0_44] : memref<2x1x64xf32, #tpu.memory_space<vmem>>, vector<1x1x64xf32>
    %81 = vector.shape_cast %80 : vector<1x1x64xf32> to vector<1x64xf32>
    %82 = vector.broadcast %81 : vector<1x64xf32> to vector<128x64xf32>
    %83 = arith.addf %79, %82 : vector<128x64xf32>
    %cst_45 = arith.constant dense<0.000000e+00> : vector<128x1xf32>
    %84 = tpu.matmul %83, %2, %cst_45 {dimension_numbers = #tpu.dot_dimension_numbers<[1], [0], [0], [1], [0, 0, 1, 1], [], []>} : vector<128x64xf32>, vector<64x1xf32>, vector<128x1xf32> -> vector<128x1xf32>
    %85 = arith.mulf %83, %83 : vector<128x64xf32>
    %cst_46 = arith.constant dense<0.000000e+00> : vector<128x1xf32>
    %86 = tpu.matmul %85, %2, %cst_46 {dimension_numbers = #tpu.dot_dimension_numbers<[1], [0], [0], [1], [0, 0, 1, 1], [], []>} : vector<128x64xf32>, vector<64x1xf32>, vector<128x1xf32> -> vector<128x1xf32>
    %87 = arith.mulf %84, %84 : vector<128x1xf32>
    %88 = arith.subf %86, %87 : vector<128x1xf32>
    %cst_47 = arith.constant 0.000000e+00 : f32
    %89 = vector.broadcast %cst_47 : f32 to vector<128x1xf32>
    %90 = arith.maximumf %88, %89 : vector<128x1xf32>
    %91 = vector.broadcast %84 : vector<128x1xf32> to vector<128x64xf32>
    %92 = arith.subf %83, %91 : vector<128x64xf32>
    %cst_48 = arith.constant 9.99999974E-6 : f32
    %93 = vector.broadcast %cst_48 : f32 to vector<128x1xf32>
    %94 = arith.addf %90, %93 : vector<128x1xf32>
    %95 = math.rsqrt %94 : vector<128x1xf32>
    %96 = vector.broadcast %95 : vector<128x1xf32> to vector<128x64xf32>
    %97 = arith.mulf %92, %96 : vector<128x64xf32>
    %c1_49 = arith.constant 1 : index
    %c0_50 = arith.constant 0 : index
    %c0_51 = arith.constant 0 : index
    %98 = vector.load %arg6[%c1_49, %c0_50, %c0_51] : memref<2x64x64xf32, #tpu.memory_space<vmem>>, vector<1x64x64xf32>
    %99 = vector.shape_cast %98 : vector<1x64x64xf32> to vector<64x64xf32>
    %cst_52 = arith.constant dense<0.000000e+00> : vector<128x64xf32>
    %100 = tpu.matmul %97, %99, %cst_52 {dimension_numbers = #tpu.dot_dimension_numbers<[1], [0], [0], [1], [0, 0, 1, 1], [], []>} : vector<128x64xf32>, vector<64x64xf32>, vector<128x64xf32> -> vector<128x64xf32>
    %c1_53 = arith.constant 1 : index
    %c0_54 = arith.constant 0 : index
    %c0_55 = arith.constant 0 : index
    %101 = vector.load %arg7[%c1_53, %c0_54, %c0_55] : memref<2x1x64xf32, #tpu.memory_space<vmem>>, vector<1x1x64xf32>
    %102 = vector.shape_cast %101 : vector<1x1x64xf32> to vector<1x64xf32>
    %103 = vector.broadcast %102 : vector<1x64xf32> to vector<128x64xf32>
    %104 = arith.addf %100, %103 : vector<128x64xf32>
    %cst_56 = arith.constant 0.000000e+00 : f32
    %105 = vector.broadcast %cst_56 : f32 to vector<128x64xf32>
    %106 = arith.maximumf %104, %105 : vector<128x64xf32>
    %c1_57 = arith.constant 1 : index
    %c0_58 = arith.constant 0 : index
    %c0_59 = arith.constant 0 : index
    %107 = vector.load %arg8[%c1_57, %c0_58, %c0_59] : memref<2x64x64xf32, #tpu.memory_space<vmem>>, vector<1x64x64xf32>
    %108 = vector.shape_cast %107 : vector<1x64x64xf32> to vector<64x64xf32>
    %cst_60 = arith.constant dense<0.000000e+00> : vector<128x64xf32>
    %109 = tpu.matmul %106, %108, %cst_60 {dimension_numbers = #tpu.dot_dimension_numbers<[1], [0], [0], [1], [0, 0, 1, 1], [], []>} : vector<128x64xf32>, vector<64x64xf32>, vector<128x64xf32> -> vector<128x64xf32>
    %110 = arith.addf %83, %109 : vector<128x64xf32>
    %c1_61 = arith.constant 1 : index
    %c0_62 = arith.constant 0 : index
    %c0_63 = arith.constant 0 : index
    %111 = vector.load %arg9[%c1_61, %c0_62, %c0_63] : memref<2x1x64xf32, #tpu.memory_space<vmem>>, vector<1x1x64xf32>
    %112 = vector.shape_cast %111 : vector<1x1x64xf32> to vector<1x64xf32>
    %113 = vector.broadcast %112 : vector<1x64xf32> to vector<128x64xf32>
    %114 = arith.addf %110, %113 : vector<128x64xf32>
    %c0_64 = arith.constant 0 : index
    %c0_65 = arith.constant 0 : index
    %115 = vector.load %arg10[%c0_64, %c0_65] : memref<64x128xf32, #tpu.memory_space<vmem>>, vector<64x128xf32>
    %cst_66 = arith.constant dense<0.000000e+00> : vector<128x128xf32>
    %116 = tpu.matmul %114, %115, %cst_66 {dimension_numbers = #tpu.dot_dimension_numbers<[1], [0], [0], [1], [0, 0, 1, 1], [], []>} : vector<128x64xf32>, vector<64x128xf32>, vector<128x128xf32> -> vector<128x128xf32>
    %c0_67 = arith.constant 0 : index
    %c0_68 = arith.constant 0 : index
    %117 = vector.load %arg11[%c0_67, %c0_68] : memref<1x128xf32, #tpu.memory_space<vmem>>, vector<1x128xf32>
    %118 = vector.broadcast %117 : vector<1x128xf32> to vector<128x128xf32>
    %119 = arith.addf %116, %118 : vector<128x128xf32>
    %c0_69 = arith.constant 0 : index
    %c0_70 = arith.constant 0 : index
    %120 = vector.load %arg12[%c0_69, %c0_70] : memref<128x128xf32, #tpu.memory_space<vmem>>, vector<128x128xf32>
    tpu.vector_store %arg12[%c0_69, %c0_70], %119 {strides = array<i32>} : memref<128x128xf32, #tpu.memory_space<vmem>>, vector<128x128xf32>,
    return
  }
  func.func @transform_0(%arg0: i32) -> (i32, i32) {
    %c0_i32 = arith.constant 0 : i32
    %c0_i32_0 = arith.constant 0 : i32
    return %arg0, %c0_i32 : i32, i32
  }
  func.func @transform_1(%arg0: i32) -> (i32, i32) {
    %c0_i32 = arith.constant 0 : i32
    %c0_i32_0 = arith.constant 0 : i32
    %c0_i32_1 = arith.constant 0 : i32
    return %c0_i32, %c0_i32_0 : i32, i32
  }
  func.func @transform_2(%arg0: i32) -> (i32, i32) {
    %c0_i32 = arith.constant 0 : i32
    %c0_i32_0 = arith.constant 0 : i32
    %c0_i32_1 = arith.constant 0 : i32
    return %c0_i32, %c0_i32_0 : i32, i32
  }
  func.func @transform_3(%arg0: i32) -> (i32, i32, i32) {
    %c0_i32 = arith.constant 0 : i32
    %c0_i32_0 = arith.constant 0 : i32
    %c0_i32_1 = arith.constant 0 : i32
    %c0_i32_2 = arith.constant 0 : i32
    return %c0_i32, %c0_i32_0, %c0_i32_1 : i32, i32, i32
  }
  func.func @transform_4(%arg0: i32) -> (i32, i32, i32) {
    %c0_i32 = arith.constant 0 : i32
    %c0_i32_0 = arith.constant 0 : i32
    %c0_i32_1 = arith.constant 0 : i32
    %c0_i32_2 = arith.constant 0 : i32
    return %c0_i32, %c0_i32_0, %c0_i32_1 : i32, i32, i32
  }
  func.func @transform_5(%arg0: i32) -> (i32, i32, i32) {
    %c0_i32 = arith.constant 0 : i32
    %c0_i32_0 = arith.constant 0 : i32
    %c0_i32_1 = arith.constant 0 : i32
    %c0_i32_2 = arith.constant 0 : i32
    return %c0_i32, %c0_i32_0, %c0_i32_1 : i32, i32, i32
  }
  func.func @transform_6(%arg0: i32) -> (i32, i32, i32) {
    %c0_i32 = arith.constant 0 : i32
    %c0_i32_0 = arith.constant 0 : i32
    %c0_i32_1 = arith.constant 0 : i32
    %c0_i32_2 = arith.constant 0 : i32
    return %c0_i32, %c0_i32_0, %c0_i32_1 : i32, i32, i32
  }
  func.func @transform_7(%arg0: i32) -> (i32, i32, i32) {
    %c0_i32 = arith.constant 0 : i32
    %c0_i32_0 = arith.constant 0 : i32
    %c0_i32_1 = arith.constant 0 : i32
    %c0_i32_2 = arith.constant 0 : i32
    return %c0_i32, %c0_i32_0, %c0_i32_1 : i32, i32, i32
  }
  func.func @transform_8(%arg0: i32) -> (i32, i32, i32) {
    %c0_i32 = arith.constant 0 : i32
    %c0_i32_0 = arith.constant 0 : i32
    %c0_i32_1 = arith.constant 0 : i32
    %c0_i32_2 = arith.constant 0 : i32
    return %c0_i32, %c0_i32_0, %c0_i32_1 : i32, i32, i32
  }
  func.func @transform_9(%arg0: i32) -> (i32, i32) {
    %c0_i32 = arith.constant 0 : i32
    %c0_i32_0 = arith.constant 0 : i32
    %c0_i32_1 = arith.constant 0 : i32
    return %c0_i32, %c0_i32_0 : i32, i32
  }
  func.func @transform_10(%arg0: i32) -> (i32, i32) {
    %c0_i32 = arith.constant 0 : i32
    %c0_i32_0 = arith.constant 0 : i32
    %c0_i32_1 = arith.constant 0 : i32
    return %c0_i32, %c0_i32_0 : i32, i32
  }
  func.func @transform_11(%arg0: i32) -> (i32, i32) {
    %c0_i32 = arith.constant 0 : i32
    %c0_i32_0 = arith.constant 0 : i32
    return %arg0, %c0_i32 : i32, i32
  }
}

</mosaic_0001>

<bundles_post_ra>
// kernel: tpu_custom_call.1
= control target key start
LH: loop header
LB: loop body
LE: loop exit
PB: predicated region body
PF: predicated region fallthrough
CT: control target
= control target key end

     0   :  { %16 = vsyncpa [#allocation3], 0  ;;  %s8067_s0 = inlined_call_operand.vmem [shape: f32[256,1], index: 0, kind: input, shape index: {}]   ;;  %s8068_s1 = inlined_call_operand.vmem [shape: f32[1,64], index: 1, kind: input, shape index: {}]   ;;  %s8069_s2 = inlined_call_operand.vmem [shape: f32[1,64], index: 2, kind: input, shape index: {}]   ;;  %s8070_s3 = inlined_call_operand.vmem [shape: f32[2,64,64], index: 3, kind: input, shape index: {}]   ;;  %s8071_s4 = inlined_call_operand.vmem [shape: f32[2,1,64], index: 4, kind: input, shape index: {}]   ;;  %s8072_s5 = inlined_call_operand.vmem [shape: f32[2,64,64], index: 5, kind: input, shape index: {}]   ;;  %s8073_s6 = inlined_call_operand.vmem [shape: f32[2,1,64], index: 6, kind: input, shape index: {}]   ;;  %s8074_s7 = inlined_call_operand.hbm [shape: f32[2,64,64], index: 7, kind: input, shape index: {}]   ;;  %s8075_s8 = inlined_call_operand.vmem [shape: f32[2,1,64], index: 8, kind: input, shape index: {}]   ;;  %s8076_s9 = inlined_call_operand.hbm [shape: f32[64,128], index: 9, kind: input, shape index: {}]   ;;  %s8077_s10 = inlined_call_operand.vmem [shape: f32[1,128], index: 10, kind: input, shape index: {}]   ;;  %s8078_s11 = inlined_call_operand.hbm [shape: f32[256,128], index: 11, kind: output, shape index: {}]  }
   0x1   :  { %17 = vsyncpa [#allocation6], 0 }
   0x2   :  { %18 = vsyncpa [#allocation4], 0 }
   0x3   :  { %20 = vsyncpa [#allocation4 + $0x1], 0  ;;  %s6815_s17 = smov 0   ;;  %s6817_s18 = smov 0  }
   0x4   :  { %s6819_s19 = smov 0   ;;  %s6821_s20 = smov 0  }
   0x5 LB: > { %8087 = sst [smem:[#allocation11_spill]] %s6732_s17  ;;  %s6836_s21 = sadd.s32 4294967295, %s6744_s20   ;;  %s6744_s20 = sphi %s6821_s20, %s8105_s20   ;;  %s6740_s19 = sphi %s6819_s19, %s8107_s19   ;;  %s6736_s18 = sphi %s6817_s18, %s8109_s18   ;;  %s6732_s17 = sphi %s6815_s17, %s8108_s17  }
   0x6   : > { %8088 = sst [smem:[#allocation12_spill]] %s6740_s19  ;;  %s4993_s22 = sadd.s32 4294967294, %s6744_s20  }
   0x7   : > { %s6840_s23 = sadd.s32 1, %s6744_s20   ;;  %s269_s24 = sadd.s32 1, %s6740_s19 }
   0x8   : > { %8089 = sst [smem:[#allocation13_spill]] %s6840_s23  ;;  %s266_s25 = ssub.s32 %s6744_s20, %s6840_s23 }
   0x9   : > { %p279_p0 = scmp.ne.s32.totalorder %s6740_s19, %s6736_s18  ;;  %p267_p1 = scmp.eq.s32.totalorder %s266_s25, 0 }
   0xa   : > { %p280_p2 = scmp.eq.s32.totalorder %s6836_s21, 1  ;;  %p285_p3 = scmp.ne.s32.totalorder %s6736_s18, %s6732_s17 }
   0xb   : > { %p286_p4 = scmp.eq.s32.totalorder %s4993_s22, 1  ;;  %p4994_p7 = scmp.ge.s32.totalorder %s6744_s20, 1 }
   0xc   : > { %s6851_s26 = scalar_select %p267_p1, %s6740_s19, %s269_s24  }
   0xd   : > { %p6853_p5 = por %p280_p2, %p279_p0  ;;  %p6857_p6 = por %p286_p4, %p285_p3 }
   0xe   : > { %8090 = sst [smem:[#allocation14_spill]] %s6851_s26  ;;  %p293_p8 = scmp.lt.s32.totalorder %s6744_s20, 3 }
   0xf   : > { %s8091_s27 = scalar_select %p6853_p5, 1, 0 }
  0x10   : > { %s8092_s28 = scalar_select %p6857_p6, 1, 0 }
  0x11   : > { %p8080_p9 = scmp.eq.s32.totalorder %s6836_s21, 0  ;;  %p6864_p10 = pnand %p4994_p7, %p293_p8 }
  0x12   : > { %8093 = sst [smem:[#allocation15_spill]] %s8092_s28  ;;  %s6746_s30 = smov [#allocation2]  }
  0x13   : > { %s8094_s29 = scalar_select %p6864_p10, 1, 0 }
  0x14   : > { %s323_s12 = sshll.u32 %s6746_s30, 4  ;;  %p6432_p11 = pneg %p6864_p10  ;;  %s324_s12 = int_to_ptr.vmem [resolvable:$true] %s323_s12 }
  0x15   : > { %s6747_s14 = smov [#allocation5]   ;;  %s6618_s24 = scalar_lea.hbm %s8074_s7, 2048 }
  0x16   : > { %p6872_p12 = pnand %p8080_p9, %p6432_p11  ;;  %s339_s15 = sshll.u32 %s6747_s14, 4  ;;  %s6876_s15 = int_to_ptr.vmem [resolvable:$true] %s339_s15 }
  0x17   : > { %p6619_p13 = scmp.ne.s32.totalorder %s8074_s7, %s6618_s24  ;;  %p6625_p3 = scmp.lt.u32.totalorder %s6618_s24, %s8074_s7 }
  0x18   : > { %p6620_p0 = pneg %p6872_p12 }
  0x1a   : > { %p6621_p1 = pnand %p6620_p0, %p6619_p13 }
  0x1c   : > { %p6622_p2 = pneg %p6621_p1 }
  0x1e   : > { %p6627_p4 = pnand %p6625_p3, %p6622_p2 }
  0x20   : > { %6630 = shalt.err (!%p6627_p4)
}
  0x21   : > { %s6631_s14 = scalar_lea.vmem %s324_s12, 2048  ;;  %p6639_p9 = scmp.lt.s32.totalorder %s324_s12, %s324_s12 }
  0x22   : > { %p6632_p7 = scmp.ne.s32.totalorder %s324_s12, %s6631_s14  ;;  %p6640_p6 = scmp.lt.s32.totalorder %s6631_s14, %s6631_s14 }
  0x24   : > { %p6634_p8 = pnand %p6632_p7, %p6620_p0  ;;  %p6641_p5 = por %p6640_p6, %p6639_p9 }
  0x26   : > { %p6635_p11 = pneg %p6634_p8 }
  0x28   : > { %p6642_p10 = pnand %p6641_p5, %p6635_p11 }
  0x2a   : > { %6645 = shalt.err (!%p6642_p10)
}
  0x2b   : > { %s6748_s16 = smov 128   ;;  %s6749_s22 = smov 8  }
  0x2c   : > { %6435 = dma.hbm_to_vmem [thread:$0]  (!%p6872_p12), %s8074_s7, 2048, %s324_s12, [#allocation3], %s6748_s16, %s6748_s16, %s6749_s22  }
  0x2d   : > { %s6646_s30 = scalar_lea.hbm %s8076_s9, 1024 }
  0x2e   : > { %p6647_p13 = scmp.ne.s32.totalorder %s8076_s9, %s6646_s30  ;;  %p6653_p9 = scmp.lt.u32.totalorder %s6646_s30, %s8076_s9 }
  0x30   : > { %p6649_p5 = pnand %p6647_p13, %p6620_p0 }
  0x32   : > { %p6650_p6 = pneg %p6649_p5 }
  0x34   : > { %p6655_p10 = pnand %p6653_p9, %p6650_p6 }
  0x36   : > { %6658 = shalt.err (!%p6655_p10)
}
  0x37   : > { %s6659_s12 = scalar_lea.vmem %s6876_s15, 1024  ;;  %p6667_p4 = scmp.lt.s32.totalorder %s6876_s15, %s6876_s15 }
  0x38   : > { %p6660_p1 = scmp.ne.s32.totalorder %s6876_s15, %s6659_s12  ;;  %p6668_p7 = scmp.lt.s32.totalorder %s6659_s12, %s6659_s12 }
  0x3a   : > { %p6662_p2 = pnand %p6660_p1, %p6620_p0  ;;  %p6669_p8 = por %p6668_p7, %p6667_p4 }
  0x3c   : > { %p6663_p3 = pneg %p6662_p2 }
  0x3e   : > { %p6670_p11 = pnand %p6669_p8, %p6663_p3 }
  0x40   : > { %6673 = shalt.err (!%p6670_p11)
}
  0x41   : > { %6438 = dma.hbm_to_vmem [thread:$0]  (!%p6872_p12), %s8076_s9, 1024, %s6876_s15, [#allocation6], %s6748_s16, %s6748_s16, %s6749_s22  }
  0x42   : > { %p8096_p13 = scmp.ne.s32.totalorder %s8094_s29, 0 }
  0x43   : > { %p8097_p5 = scmp.eq.s32.totalorder (!%p8096_p13), %s6836_s21, 0 }
  0x44   : > { %367 = sbr.rel (%p8096_p13) target bundleno = 3307 (0xceb), region = 64 }
  0x4b   : > { %6719 = dma.done.wait (%p8097_p5), [#allocation3], 2048   ;;  %p8098_p0 = pmov %p8097_p5 }
  0x4d   : > { %6721 = vsyncadd (%p8098_p0), [#allocation3], 4294965248  ;;  %p8099_p6 = pmov %p8098_p0 }
  0x4e   : > { %p8100_p9 = pmov %p8098_p0 }
  0x4f   : > { %6723 = dma.done.wait (%p8099_p6), [#allocation6], 1024  }
  0x50   : > { %6725 = vsyncadd (%p8100_p9), [#allocation6], 4294966272  ;;  %s5002_s28 = sshll.u32 %s6836_s21, 4  ;;  %v6750_v0 = vmov 0   ;;  %v6751_v1 = vmov 0.015625|0.015625  }
  0x51   : > { %6489 = vset.pattern.permute.xlu1 %v6750_v0  ;;  %6488 = vset.pattern.permute.xlu0 %v6750_v0  ;;  %p412_p12 = scmp.lt.s32.totalorder %s5002_s28, 31  ;;  %v6977_v18 = vld [vmem:[%s8068_s1] ss:$0 sm:$0xff]  ;;  %vm560_vm0 = vcmask 523264   ;;  %s408_s30 = sand.u32 1, %s6736_s18  }
  0x52   : > { %6414 = vmatprep.subr.bf16.mxu1 %v6751_v1  ;;  %6238 = vmatprep.subr.bf16.mxu0 %v6751_v1  ;;  %v6982_v19 = vld [vmem:[%s8069_s2] ss:$0 sm:$0xff]  ;;  %s5001_s14 = sshll.u32 %s408_s30, 7  ;;  %p8101_p1 = scmp.ne.s32.totalorder %s8091_s27, 0 }
  0x53   : > { %s8111_s28 = smov (!%p412_p12, %s5002_s28), 31  ;;  %6418 = vmatpush3.bf16.msra.mxu1 %v6751_v1  ;;  %6239 = vmatpush3.bf16.msra.mxu0 %v6751_v1  ;;  %s7997_s23 = scalar_lea.vmem [#allocation7], %s5001_s14 }
  0x54   : > { %6415 = vmatprep.subr.bf16.mxu1 %v6751_v1  ;;  %6240 = vmatprep.subr.bf16.mxu0 %v6751_v1  ;;  %s5003_s29 = sshll.u32 %s8111_s28, 3  ;;  %s5277_s28 = sshll.u32 %s6836_s21, 11 }
  0x55   : > { %s6945_s16 = scalar_lea.vmem %s8067_s0, %s5003_s29  ;;  %s4909_s29 = sshll.u32 %s7997_s23, 4  ;;  %s8020_s29 = int_to_ptr.vmem [resolvable:$true] %s4909_s29 }
  0x56   : > { %v428_v2 = vld [vmem:[%s6945_s16 + $0x50] sm:$0xff]  ;;  %v426_v3 = vld [vmem:[%s6945_s16 + $0x40] sm:$0xff]  ;;  %v429_v4 = vld [vmem:[%s6945_s16 + $0x58] sm:$0xff]  ;;  %s8026_s21 = scalar_lea.sflag [#allocation4], %s408_s30  ;;  %s6674_s22 = scalar_lea.vmem %s8020_s29, 2048 }
  0x57   : > { %6419 = vmatpush3.bf16.msra.mxu1 %v6751_v1  ;;  %6241 = vmatpush3.bf16.msra.mxu0 %v6751_v1  ;;  %v427_v5 = vld [vmem:[%s6945_s16 + $0x48] sm:$0xff]  ;;  %v430_v7 = vld [vmem:[%s6945_s16 + $0x60] sm:$0xff]  ;;  %v433_v8 = vld [vmem:[%s6945_s16 + $0x78] sm:$0xff]  ;;  %p6675_p10 = scmp.ne.s32.totalorder %s8020_s29, %s6674_s22  ;;  %s6752_s19 = smov [#allocation7]  }
  0x58   : > { %487 = vperm.xlu1 %6489, %v428_v2   ;;  %477 = vperm.xlu0 %6488, %v426_v3   ;;  %v431_v6 = vld [vmem:[%s6945_s16 + $0x68] sm:$0xff]  ;;  %v432_v9 = vld [vmem:[%s6945_s16 + $0x70] sm:$0xff]  ;;  %v418_v11 = vld [vmem:[%s6945_s16] sm:$0xff]  ;;  %s6678_s26 = sshll.u32 %s6752_s19, 4  ;;  %s6679_s26 = int_to_ptr.vmem [resolvable:$false] %s6678_s26 }
  0x59   : > { %6416 = vmatprep.subr.bf16.mxu1 %v6751_v1  ;;  %6242 = vmatprep.subr.bf16.mxu0 %v6751_v1  ;;  %v419_v10 = vld [vmem:[%s6945_s16 + $0x8] sm:$0xff]  ;;  %v421_v12 = vld [vmem:[%s6945_s16 + $0x18] sm:$0xff]  ;;  %v420_v13 = vld [vmem:[%s6945_s16 + $0x10] sm:$0xff]  ;;  %p6676_p2 = pnand %p6675_p10, %p8101_p1  ;;  %s6680_s24 = scalar_lea.vmem %s6679_s26, 4096 }
  0x5a   : > { %v423_v14 = vld [vmem:[%s6945_s16 + $0x28] sm:$0xff]  ;;  %v422_v15 = vld [vmem:[%s6945_s16 + $0x20] sm:$0xff]  ;;  %v425_v16 = vld [vmem:[%s6945_s16 + $0x38] sm:$0xff]  ;;  %p6681_p4 = scmp.lt.s32.totalorder %s8020_s29, %s6679_s26  ;;  %p6682_p7 = scmp.lt.s32.totalorder %s6680_s24, %s6674_s22 }
  0x5b   : > { %6420 = vmatpush3.bf16.msra.mxu1 %v6751_v1  ;;  %6243 = vmatpush3.bf16.msra.mxu0 %v6751_v1  ;;  %v424_v17 = vld [vmem:[%s6945_s16 + $0x30] sm:$0xff]  ;;  %s8018_s16 = scalar_lea.hbm %s8078_s11, %s5277_s28  ;;  %p6677_p3 = pneg %p6676_p2 }
  0x5c   : > { %492 = vperm.xlu1 %6489, %v429_v4   ;;  %482 = vperm.xlu0 %6488, %v427_v5   ;;  %p6683_p8 = por %p6682_p7, %p6681_p4 }
  0x5d   : > { %6417 = vmatprep.subr.bf16.mxu1 %v6751_v1  ;;  %6244 = vmatprep.subr.bf16.mxu0 %v6751_v1 }
  0x5e   : > { %p6684_p11 = pnand %p6683_p8, %p6677_p3 }
  0x5f   : > { %6421 = vmatpush3.bf16.msra.mxu1 %v6751_v1  ;;  %6245 = vmatpush3.bf16.msra.mxu0 %v6751_v1 }
  0x60   : > { %502 = vperm.xlu1 %6489, %v431_v6   ;;  %497 = vperm.xlu0 %6488, %v430_v7  }
  0x61   : > { %6246 = vmatprep.subr.bf16.mxu1 %v6751_v1 }
  0x64   : > { %512 = vperm.xlu1 %6489, %v433_v8   ;;  %507 = vperm.xlu0 %6488, %v432_v9  }
  0x68   : > { %442 = vperm.xlu1 %6489, %v419_v10   ;;  %437 = vperm.xlu0 %6488, %v418_v11  }
  0x6c   : > { %452 = vperm.xlu1 %6489, %v421_v12   ;;  %447 = vperm.xlu0 %6488, %v420_v13  }
  0x70   : > { %462 = vperm.xlu1 %6489, %v423_v14   ;;  %457 = vperm.xlu0 %6488, %v422_v15  }
  0x74   : > { %472 = vperm.xlu1 %6489, %v425_v16   ;;  %467 = vperm.xlu0 %6488, %v424_v17  }
  0xd7   : > { %v488_v20 = vpop.permute.xlu1 %487  ;;  %v478_v21 = vpop.permute.xlu0 %477 }
  0xd8   : > { %v529_v22 = vmul.f32 %v6977_v18, %v478_v21  ;;  %v531_v24 = vmul.f32 %v6977_v18, %v488_v20 }
  0xda   : > { %v6986_v23 = vadd.f32 %v6982_v19, %v529_v22  ;;  %v6997_v30 = vadd.f32 %v6982_v19, %v531_v24 }
  0xdb   : > { %v493_v25 = vpop.permute.xlu1 %492  ;;  %v483_v26 = vpop.permute.xlu0 %482 }
  0xdc   : > { %v530_v27 = vmul.f32 %v6977_v18, %v483_v26  ;;  %5666 = vmatprep.mubr.msk.f32.mxu1 %vm560_vm0, %v6986_v23  ;;  %v532_v28 = vmul.f32 %v6977_v18, %v493_v25  ;;  %v762_v13 = vmul.f32 %v6986_v23, %v6986_v23  ;;  %v764_v15 = vmul.f32 %v6997_v30, %v6997_v30 }
  0xde   : > { %v6994_v29 = vadd.f32 %v6982_v19, %v530_v27  ;;  %v7006_v34 = vadd.f32 %v6982_v19, %v532_v28 }
  0xdf   : > { %v503_v31 = vpop.permute.xlu1 %502  ;;  %v498_v32 = vpop.permute.xlu0 %497 }
  0xe0   : > { %v533_v33 = vmul.f32 %v6977_v18, %v498_v32  ;;  %5667 = vmatmul.mubr.msk.f32.vlgmr.msra.gmra.mrb[0].mxu1 %vm560_vm0, %v6994_v29  ;;  %v534_v35 = vmul.f32 %v6977_v18, %v503_v31  ;;  %v763_v14 = vmul.f32 %v6994_v29, %v6994_v29  ;;  %v765_v16 = vmul.f32 %v7006_v34, %v7006_v34 }
  0xe1   : > { %5669 = vmatprep.mubr.msk.f32.mxu1 %vm560_vm0, %v6997_v30  ;;  %6247 = vmatpush3.bf16.msra.mxu1 %v6751_v1 }
  0xe2   : > { %v7010_v36 = vadd.f32 %v6982_v19, %v533_v33  ;;  %6248 = vmatprep.subr.bf16.mxu1 %v6751_v1  ;;  %v7020_v40 = vadd.f32 %v6982_v19, %v534_v35 }
  0xe3   : > { %v513_v37 = vpop.permute.xlu1 %512  ;;  %v508_v38 = vpop.permute.xlu0 %507 }
  0xe4   : > { %v535_v39 = vmul.f32 %v6977_v18, %v508_v38  ;;  %5670 = vmatmul.mubr.msk.f32.gmra.mrb[2].mxu1 %vm560_vm0, %v7006_v34  ;;  %v536_v41 = vmul.f32 %v6977_v18, %v513_v37  ;;  %v766_v17 = vmul.f32 %v7010_v36, %v7010_v36 }
  0xe5   : > { %5672 = vmatprep.mubr.msk.f32.mxu1 %vm560_vm0, %v7010_v36  ;;  %6249 = vmatpush3.bf16.msra.mxu1 %v6751_v1 }
  0xe6   : > { %v7024_v42 = vadd.f32 %v6982_v19, %v535_v39  ;;  %6250 = vmatprep.subr.bf16.mxu1 %v6751_v1  ;;  %v7035_v47 = vadd.f32 %v6982_v19, %v536_v41 }
  0xe7   : > { %v443_v43 = vpop.permute.xlu1 %442  ;;  %v438_v44 = vpop.permute.xlu0 %437 }
  0xe8   : > { %v522_v45 = vmul.f32 %v6977_v18, %v443_v43  ;;  %v521_v46 = vmul.f32 %v6977_v18, %v438_v44  ;;  %5673 = vmatmul.mubr.msk.f32.gmra.mrb[4].mxu1 %vm560_vm0, %v7020_v40  ;;  %v769_v20 = vmul.f32 %v7035_v47, %v7035_v47 }
  0xe9   : > { %5675 = vmatprep.mubr.msk.f32.mxu1 %vm560_vm0, %v7024_v42  ;;  %6251 = vmatpush3.bf16.msra.mxu1 %v6751_v1 }
  0xea   : > { %v7038_v48 = vadd.f32 %v6982_v19, %v522_v45  ;;  %v7041_v49 = vadd.f32 %v6982_v19, %v521_v46  ;;  %6252 = vmatprep.subr.bf16.mxu1 %v6751_v1 }
  0xeb   : > { %v453_v50 = vpop.permute.xlu1 %452  ;;  %v448_v51 = vpop.permute.xlu0 %447 }
  0xec   : > { %v524_v52 = vmul.f32 %v6977_v18, %v453_v50  ;;  %v523_v53 = vmul.f32 %v6977_v18, %v448_v51  ;;  %5654 = vmatprep.mubr.msk.f32.mxu0 %vm560_vm0, %v7041_v49  ;;  %5676 = vmatmul.mubr.msk.f32.gmra.mrb[6].mxu1 %vm560_vm0, %v7035_v47  ;;  %v754_v54 = vmul.f32 %v7041_v49, %v7041_v49 }
  0xed   : > { %5655 = vmatmul.mubr.msk.f32.vlgmr.msra.gmra.mrb[0].mxu0 %vm560_vm0, %v7038_v48  ;;  %6253 = vmatpush3.bf16.msra.mxu1 %v6751_v1  ;;  %v755_v55 = vmul.f32 %v7038_v48, %v7038_v48 }
  0xee   : > { %v7058_v56 = vadd.f32 %v6982_v19, %v524_v52  ;;  %v7061_v57 = vadd.f32 %v6982_v19, %v523_v53  ;;  %6270 = vmatprep.subr.bf16.mxu1 %v6751_v1  ;;  %5694 = vmatprep.mubr.msk.f32.mxu1 %vm560_vm0, %v754_v54 }
  0xef   : > { %v463_v58 = vpop.permute.xlu1 %462  ;;  %v458_v59 = vpop.permute.xlu0 %457 }
  0xf0   : > { %v526_v60 = vmul.f32 %v6977_v18, %v463_v58  ;;  %v525_v61 = vmul.f32 %v6977_v18, %v458_v59  ;;  %5657 = vmatprep.mubr.msk.f32.mxu0 %vm560_vm0, %v7061_v57  ;;  %5695 = vmatmul.mubr.msk.f32.vlgmr.msra.gmra.mrb[8].mxu1 %vm560_vm0, %v755_v55  ;;  %v756_v62 = vmul.f32 %v7061_v57, %v7061_v57 }
  0xf1   : > { %5658 = vmatmul.mubr.msk.f32.gmra.mrb[2].mxu0 %vm560_vm0, %v7058_v56  ;;  %6271 = vmatpush3.bf16.msra.mxu1 %v6751_v1  ;;  %v757_v2 = vmul.f32 %v7058_v56, %v7058_v56 }
  0xf2   : > { %v7076_v63 = vadd.f32 %v6982_v19, %v526_v60  ;;  %v7079_v0 = vadd.f32 %v6982_v19, %v525_v61  ;;  %5697 = vmatprep.mubr.msk.f32.mxu1 %vm560_vm0, %v756_v62  ;;  %6272 = vmatprep.subr.bf16.mxu1 %v6751_v1 }
  0xf3   : > { %v473_v3 = vpop.permute.xlu1 %472  ;;  %v468_v4 = vpop.permute.xlu0 %467 }
  0xf4   : > { %v528_v5 = vmul.f32 %v6977_v18, %v473_v3  ;;  %v527_v6 = vmul.f32 %v6977_v18, %v468_v4  ;;  %5660 = vmatprep.mubr.msk.f32.mxu0 %vm560_vm0, %v7079_v0  ;;  %5698 = vmatmul.mubr.msk.f32.gmra.mrb[10].mxu1 %vm560_vm0, %v757_v2  ;;  %v758_v7 = vmul.f32 %v7079_v0, %v7079_v0 }
  0xf5   : > { %5661 = vmatmul.mubr.msk.f32.gmra.mrb[4].mxu0 %vm560_vm0, %v7076_v63  ;;  %6273 = vmatpush3.bf16.msra.mxu1 %v6751_v1  ;;  %v759_v10 = vmul.f32 %v7076_v63, %v7076_v63  ;;  %v767_v18 = vmul.f32 %v7020_v40, %v7020_v40 }
  0xf6   : > { %v7096_v8 = vadd.f32 %v6982_v19, %v528_v5  ;;  %v7099_v9 = vadd.f32 %v6982_v19, %v527_v6  ;;  %5700 = vmatprep.mubr.msk.f32.mxu1 %vm560_vm0, %v758_v7  ;;  %6274 = vmatprep.subr.bf16.mxu1 %v6751_v1  ;;  %v768_v19 = vmul.f32 %v7024_v42, %v7024_v42 }
  0xf8   : > { %5663 = vmatprep.mubr.msk.f32.mxu0 %vm560_vm0, %v7099_v9  ;;  %5701 = vmatmul.mubr.msk.f32.gmra.mrb[12].mxu1 %vm560_vm0, %v759_v10  ;;  %v760_v11 = vmul.f32 %v7099_v9, %v7099_v9  ;;  %v761_v12 = vmul.f32 %v7096_v8, %v7096_v8 }
  0xf9   : > { %5664 = vmatmul.mubr.msk.f32.gmra.mrb[6].mxu0 %vm560_vm0, %v7096_v8  ;;  %6275 = vmatpush3.bf16.msra.mxu1 %v6751_v1 }
  0xfa   : > { %5703 = vmatprep.mubr.msk.f32.mxu1 %vm560_vm0, %v760_v11  ;;  %6276 = vmatprep.subr.bf16.mxu1 %v6751_v1 }
  0xfc   : > { %5704 = vmatmul.mubr.msk.f32.gmra.mrb[14].mxu1 %vm560_vm0, %v761_v12 }
  0xfd   : > { %5706 = vmatprep.mubr.msk.f32.mxu1 %vm560_vm0, %v762_v13  ;;  %6277 = vmatpush3.bf16.msra.mxu1 %v6751_v1 }
 0x100   : > { %5707 = vmatmul.mubr.msk.f32.gmra.mrb[16].mxu1 %vm560_vm0, %v763_v14 }
 0x101   : > { %5709 = vmatprep.mubr.msk.f32.mxu1 %vm560_vm0, %v764_v15 }
 0x104   : > { %5710 = vmatmul.mubr.msk.f32.gmra.mrb[18].mxu1 %vm560_vm0, %v765_v16 }
 0x105   : > { %5712 = vmatprep.mubr.msk.f32.mxu1 %vm560_vm0, %v766_v17 }
 0x108   : > { %5713 = vmatmul.mubr.msk.f32.gmra.mrb[20].mxu1 %vm560_vm0, %v767_v18 }
 0x109   : > { %5715 = vmatprep.mubr.msk.f32.mxu1 %vm560_vm0, %v768_v19  ;;  %v1235_v19 = vld [vmem:[%s8070_s3] sm:$0xff] }
 0x10c   : > { %5716 = vmatmul.mubr.msk.f32.gmra.mrb[22].mxu1 %vm560_vm0, %v769_v20  ;;  %v1236_v20 = vld [vmem:[%s8070_s3 + $0x8] sm:$0xff] }
 0x1b3   : > { %v5668_v21 = vpop.f32.mrb[0].mxu1 }
 0x1b4   : > { %v715_v22 = vpop.f32.mrb[1].mxu1  ;;  %v972_v16 = vmul.f32 %v5668_v21, %v5668_v21 }
 0x1b7   : > { %v5671_v24 = vpop.f32.mrb[2].mxu1 }
 0x1b8   : > { %v7143_v25 = vpop.f32.mrb[3].mxu1 }
 0x1bb   : > { %v7145_v26 = vpop.f32.mrb[4].mxu1 }
 0x1bc   : > { %v7147_v27 = vpop.f32.mrb[5].mxu1 }
 0x1bf   : > { %v7149_v28 = vpop.f32.mrb[6].mxu1 }
 0x1c0   : > { %v5656_v31 = vpop.f32.mrb[0].mxu0  ;;  %v7151_v32 = vpop.f32.mrb[7].mxu1 }
 0x1c1   : > { %v964_v33 = vmul.f32 %v5656_v31, %v5656_v31  ;;  %1018 = vperm.xlu1 %6489, %v5656_v31   ;;  %v675_v35 = vpop.f32.mrb[1].mxu0  ;;  %v971_v31 = vmul.f32 %v715_v22, %v715_v22 }
 0x1c2   : > { %v963_v37 = vmul.f32 %v675_v35, %v675_v35  ;;  %1013 = vperm.xlu0 %6488, %v675_v35  }
 0x1c3   : > { %v5696_v38 = vpop.f32.mrb[8].mxu1 }
 0x1c4   : > { %v980_v39 = vsub.f32 %v5696_v38, %v964_v33  ;;  %v5659_v41 = vpop.f32.mrb[2].mxu0  ;;  %v884_v43 = vpop.f32.mrb[9].mxu1  ;;  %v6254_v38 = vpack.c.bf16 %v1236_v20, %v1235_v19 }
 0x1c5   : > { %v966_v44 = vmul.f32 %v5659_v41, %v5659_v41  ;;  %v979_v45 = vsub.f32 %v884_v43, %v963_v37  ;;  %1058 = vperm.xlu1 %6489, %v5668_v21   ;;  %v685_v46 = vpop.f32.mrb[3].mxu0  ;;  %v7160_v43 = vmul.f32 %v5671_v24, %v5671_v24 }
 0x1c6   : > { %v965_v50 = vmul.f32 %v685_v46, %v685_v46  ;;  %1053 = vperm.xlu0 %6488, %v715_v22   ;;  %v996_v7 = vmax.f32 %v980_v39, 0.0  ;;  %6255 = vmatprep.subr.bf16.mxu0 %v6254_v38  ;;  %v1237_v22 = vld [vmem:[%s8070_s3 + $0x10] sm:$0xff] }
 0x1c7   : > { %v5699_v51 = vpop.f32.mrb[10].mxu1  ;;  %v995_v11 = vmax.f32 %v979_v45, 0.0  ;;  %6257 = vmatpush3.bf16.msra.mxu0 %v6254_v38 }
 0x1c8   : > { %v982_v52 = vsub.f32 %v5699_v51, %v966_v44  ;;  %v5662_v53 = vpop.f32.mrb[4].mxu0  ;;  %v894_v54 = vpop.f32.mrb[11].mxu1  ;;  %v1108_v17 = vadd.f32 1e-05, %v996_v7  ;;  %v7165_v44 = vmul.f32 %v7143_v25, %v7143_v25 }
 0x1c9   : > { %v968_v55 = vmul.f32 %v5662_v53, %v5662_v53  ;;  %v981_v58 = vsub.f32 %v894_v54, %v965_v50  ;;  %1028 = vperm.xlu1 %6489, %v5659_v41   ;;  %v695_v59 = vpop.f32.mrb[5].mxu0  ;;  %v1107_v33 = vadd.f32 1e-05, %v995_v11  ;;  %v977_v11 = vmul.f32 %v7151_v32, %v7151_v32 }
 0x1ca   : > { %v967_v60 = vmul.f32 %v695_v59, %v695_v59  ;;  %1023 = vperm.xlu0 %6488, %v685_v46   ;;  %v998_v18 = vmax.f32 %v982_v52, 0.0  ;;  %6490 = vrsqrt.f32 %v1108_v17 }
 0x1cb   : > { %v5702_v61 = vpop.f32.mrb[12].mxu1  ;;  %v997_v35 = vmax.f32 %v981_v58, 0.0  ;;  %6492 = vrsqrt.f32 %v1107_v33 }
 0x1cc   : > { %v984_v62 = vsub.f32 %v5702_v61, %v968_v55  ;;  %v5665_v2 = vpop.f32.mrb[6].mxu0  ;;  %v904_v3 = vpop.f32.mrb[13].mxu1  ;;  %v1110_v45 = vadd.f32 1e-05, %v998_v18  ;;  %v976_v55 = vmul.f32 %v7145_v26, %v7145_v26 }
 0x1cd   : > { %v970_v4 = vmul.f32 %v5665_v2, %v5665_v2  ;;  %v983_v5 = vsub.f32 %v904_v3, %v967_v60  ;;  %1068 = vperm.xlu1 %6489, %v5671_v24   ;;  %v705_v6 = vpop.f32.mrb[7].mxu0  ;;  %v1238_v24 = vld [vmem:[%s8070_s3 + $0x18] sm:$0xff]  ;;  %v1109_v50 = vadd.f32 1e-05, %v997_v35 }
 0x1ce   : > { %v969_v10 = vmul.f32 %v705_v6, %v705_v6  ;;  %1063 = vperm.xlu0 %6488, %v7143_v25   ;;  %v1000_v46 = vmax.f32 %v984_v62, 0.0  ;;  %v6258_v25 = vpack.c.bf16 %v1238_v24, %v1237_v22  ;;  %6494 = vrsqrt.f32 %v1110_v45  ;;  %v1239_v62 = vld [vmem:[%s8070_s3 + $0x20] sm:$0xff] }
 0x1cf   : > { %v5705_v12 = vpop.f32.mrb[14].mxu1  ;;  %v999_v51 = vmax.f32 %v983_v5, 0.0  ;;  %6496 = vrsqrt.f32 %v1109_v50 }
 0x1d0   : > { %v986_v13 = vsub.f32 %v5705_v12, %v970_v4  ;;  %v914_v14 = vpop.f32.mrb[15].mxu1  ;;  %6259 = vmatprep.subr.bf16.mxu0 %v6258_v25  ;;  %v1112_v60 = vadd.f32 1e-05, %v1000_v46 }
 0x1d1   : > { %v985_v15 = vsub.f32 %v914_v14, %v969_v10  ;;  %1038 = vperm.xlu1 %6489, %v5662_v53   ;;  %6261 = vmatpush3.bf16.msra.mxu0 %v6258_v25  ;;  %v1111_v3 = vadd.f32 1e-05, %v999_v51  ;;  %v978_v10 = vmul.f32 %v7149_v28, %v7149_v28  ;;  %v1241_v14 = vld [vmem:[%s8070_s3 + $0x30] sm:$0xff] }
 0x1d2   : > { %1033 = vperm.xlu0 %6488, %v695_v59   ;;  %v975_v59 = vmul.f32 %v7147_v27, %v7147_v27  ;;  %v1002_v61 = vmax.f32 %v986_v13, 0.0  ;;  %6498 = vrsqrt.f32 %v1112_v60 }
 0x1d3   : > { %v5708_v37 = vpop.f32.mrb[16].mxu1  ;;  %6500 = vrsqrt.f32 %v1111_v3 }
 0x1d4   : > { %v988_v39 = vsub.f32 %v5708_v37, %v972_v16  ;;  %v924_v41 = vpop.f32.mrb[17].mxu1  ;;  %v1114_v12 = vadd.f32 1e-05, %v1002_v61  ;;  %v6491_v19 = vpop.eup %6490 }
 0x1d5   : > { %v987_v21 = vsub.f32 %v924_v41, %v971_v31  ;;  %1078 = vperm.xlu1 %6489, %v7145_v26   ;;  %v1240_v26 = vld [vmem:[%s8070_s3 + $0x28] sm:$0xff]  ;;  %v6493_v33 = vpop.eup %6492 }
 0x1d6   : > { %1073 = vperm.xlu0 %6488, %v7147_v27   ;;  %v6262_v5 = vpack.c.bf16 %v1240_v26, %v1239_v62  ;;  %v1004_v13 = vmax.f32 %v988_v39, 0.0  ;;  %6502 = vrsqrt.f32 %v1114_v12 }
 0x1d7   : > { %v5711_v52 = vpop.f32.mrb[18].mxu1  ;;  %v1003_v16 = vmax.f32 %v987_v21, 0.0 }
 0x1d8   : > { %v990_v53 = vsub.f32 %v5711_v52, %v7160_v43  ;;  %v934_v54 = vpop.f32.mrb[19].mxu1  ;;  %6263 = vmatprep.subr.bf16.mxu0 %v6262_v5  ;;  %v6495_v41 = vpop.eup %6494 }
 0x1d9   : > { %v989_v58 = vsub.f32 %v934_v54, %v7165_v44  ;;  %1048 = vperm.xlu1 %6489, %v5665_v2   ;;  %v1001_v2 = vmax.f32 %v985_v15, 0.0  ;;  %6265 = vmatpush3.bf16.msra.mxu0 %v6262_v5  ;;  %v1242_v15 = vld [vmem:[%s8070_s3 + $0x38] sm:$0xff]  ;;  %v1115_v38 = vadd.f32 1e-05, %v1003_v16  ;;  %v6497_v43 = vpop.eup %6496 }
 0x1da   : > { %1043 = vperm.xlu0 %6488, %v705_v6   ;;  %v6266_v18 = vpack.c.bf16 %v1242_v15, %v1241_v14  ;;  %v1006_v37 = vmax.f32 %v990_v53, 0.0 }
 0x1db   : > { %v5714_v4 = vpop.f32.mrb[20].mxu1  ;;  %v1005_v39 = vmax.f32 %v989_v58, 0.0 }
 0x1dc   : > { %v992_v7 = vsub.f32 %v5714_v4, %v976_v55  ;;  %v944_v27 = vpop.f32.mrb[21].mxu1  ;;  %6267 = vmatprep.subr.bf16.mxu0 %v6266_v18  ;;  %v1118_v21 = vadd.f32 1e-05, %v1006_v37  ;;  %v6499_v22 = vpop.eup %6498 }
 0x1dd   : > { %v991_v6 = vsub.f32 %v944_v27, %v975_v59  ;;  %1088 = vperm.xlu1 %6489, %v7149_v28   ;;  %v1113_v28 = vadd.f32 1e-05, %v1001_v2  ;;  %6269 = vmatpush3.bf16.msra.mxu0 %v6266_v18  ;;  %v1117_v45 = vadd.f32 1e-05, %v1005_v39  ;;  %v6501_v24 = vpop.eup %6500 }
 0x1de   : > { %1083 = vperm.xlu0 %6488, %v7151_v32   ;;  %v1116_v32 = vadd.f32 1e-05, %v1004_v13  ;;  %6278 = vmatprep.subr.bf16.mxu0 %v6751_v1  ;;  %v1008_v44 = vmax.f32 %v992_v7, 0.0 }
 0x1df   : > { %v5717_v17 = vpop.f32.mrb[22].mxu1  ;;  %6504 = vrsqrt.f32 %v1113_v28  ;;  %v1007_v46 = vmax.f32 %v991_v6, 0.0 }
 0x1e0   : > { %v994_v20 = vsub.f32 %v5717_v17, %v978_v10  ;;  %v954_v31 = vpop.f32.mrb[23].mxu1  ;;  %6506 = vrsqrt.f32 %v1116_v32  ;;  %v1120_v50 = vadd.f32 1e-05, %v1008_v44  ;;  %v6503_v53 = vpop.eup %6502 }
 0x1e1   : > { %v993_v35 = vsub.f32 %v954_v31, %v977_v11  ;;  %1146 = vperm.xlu1 %6489, %v6491_v19   ;;  %6508 = vrsqrt.f32 %v1115_v38  ;;  %v1119_v52 = vadd.f32 1e-05, %v1007_v46 }
 0x1e2   : > { %1141 = vperm.xlu0 %6488, %v6493_v33   ;;  %6510 = vrsqrt.f32 %v1118_v21  ;;  %v1010_v51 = vmax.f32 %v994_v20, 0.0 }
 0x1e3   : > { %6512 = vrsqrt.f32 %v1117_v45  ;;  %v1009_v25 = vmax.f32 %v993_v35, 0.0 }
 0x1e4   : > { %6514 = vrsqrt.f32 %v1120_v50  ;;  %v1122_v55 = vadd.f32 1e-05, %v1010_v51 }
 0x1e5   : > { %1156 = vperm.xlu1 %6489, %v6495_v41   ;;  %6516 = vrsqrt.f32 %v1119_v52  ;;  %v1121_v58 = vadd.f32 1e-05, %v1009_v25 }
 0x1e6   : > { %1151 = vperm.xlu0 %6488, %v6497_v43   ;;  %6518 = vrsqrt.f32 %v1122_v55 }
 0x1e7   : > { %6520 = vrsqrt.f32 %v1121_v58 }
 0x1e9   : > { %1166 = vperm.xlu1 %6489, %v6499_v22   ;;  %v6505_v54 = vpop.eup %6504 }
 0x1ea   : > { %1161 = vperm.xlu0 %6488, %v6501_v24   ;;  %v6507_v59 = vpop.eup %6506 }
 0x1eb   : > { %v6509_v60 = vpop.eup %6508 }
 0x1ec   : > { %v6511_v61 = vpop.eup %6510 }
 0x1ed   : > { %1176 = vperm.xlu1 %6489, %v6503_v53   ;;  %v6513_v62 = vpop.eup %6512 }
 0x1ee   : > { %1171 = vperm.xlu0 %6488, %v6505_v54   ;;  %v6515_v26 = vpop.eup %6514 }
 0x1ef   : > { %v6517_v3 = vpop.eup %6516 }
 0x1f0   : > { %v6519_v2 = vpop.eup %6518 }
 0x1f1   : > { %1186 = vperm.xlu1 %6489, %v6507_v59   ;;  %v6521_v4 = vpop.eup %6520 }
 0x1f2   : > { %1181 = vperm.xlu0 %6488, %v6509_v60  }
 0x1f5   : > { %1196 = vperm.xlu1 %6489, %v6511_v61  }
 0x1f6   : > { %1191 = vperm.xlu0 %6488, %v6513_v62  }
 0x1f9   : > { %1206 = vperm.xlu1 %6489, %v6515_v26  }
 0x1fa   : > { %1201 = vperm.xlu0 %6488, %v6517_v3  }
 0x1fd   : > { %1216 = vperm.xlu1 %6489, %v6519_v2  }
 0x1fe   : > { %1211 = vperm.xlu0 %6488, %v6521_v4  }
 0x240   : > { %v1019_v5 = vpop.permute.xlu1 %1018 }
 0x241   : > { %v1014_v7 = vpop.permute.xlu0 %1013  ;;  %v1092_v35 = vsub.f32 %v7038_v48, %v1019_v5 }
 0x242   : > { %v1091_v31 = vsub.f32 %v7041_v49, %v1014_v7 }
 0x244   : > { %v1059_v27 = vpop.permute.xlu1 %1058 }
 0x245   : > { %v1054_v10 = vpop.permute.xlu0 %1053  ;;  %v1100_v62 = vsub.f32 %v6994_v29, %v1059_v27 }
 0x246   : > { %v1099_v60 = vsub.f32 %v6986_v23, %v1054_v10 }
 0x248   : > { %v1029_v6 = vpop.permute.xlu1 %1028 }
 0x249   : > { %v1024_v11 = vpop.permute.xlu0 %1023  ;;  %v1094_v43 = vsub.f32 %v7058_v56, %v1029_v6 }
 0x24a   : > { %v1093_v39 = vsub.f32 %v7061_v57, %v1024_v11 }
 0x24c   : > { %v7199_v12 = vpop.permute.xlu1 %1068 }
 0x24d   : > { %v1064_v13 = vpop.permute.xlu0 %1063  ;;  %v1102_v7 = vsub.f32 %v7006_v34, %v7199_v12 }
 0x24e   : > { %v1101_v4 = vsub.f32 %v6997_v30, %v1064_v13 }
 0x250   : > { %v1039_v14 = vpop.permute.xlu1 %1038 }
 0x251   : > { %v1034_v15 = vpop.permute.xlu0 %1033  ;;  %v1096_v24 = vsub.f32 %v7076_v63, %v1039_v14 }
 0x252   : > { %v1095_v46 = vsub.f32 %v7079_v0, %v1034_v15 }
 0x254   : > { %v7201_v28 = vpop.permute.xlu1 %1078 }
 0x255   : > { %v7203_v16 = vpop.permute.xlu0 %1073  ;;  %v1104_v13 = vsub.f32 %v7020_v40, %v7201_v28 }
 0x256   : > { %v1103_v11 = vsub.f32 %v7010_v36, %v7203_v16 }
 0x258   : > { %v1049_v17 = vpop.permute.xlu1 %1048 }
 0x259   : > { %v1044_v18 = vpop.permute.xlu0 %1043  ;;  %v1098_v54 = vsub.f32 %v7096_v8, %v1049_v17 }
 0x25a   : > { %v1097_v25 = vsub.f32 %v7099_v9, %v1044_v18 }
 0x25c   : > { %v7205_v19 = vpop.permute.xlu1 %1088 }
 0x25d   : > { %v7207_v20 = vpop.permute.xlu0 %1083  ;;  %v1106_v16 = vsub.f32 %v7035_v47, %v7205_v19 }
 0x25e   : > { %v1105_v12 = vsub.f32 %v7024_v42, %v7207_v20  ;;  %v7256_v20 = vld [vmem:[%s8071_s4] ss:$0 sm:$0xff] }
 0x260   : > { %v1147_v33 = vpop.permute.xlu1 %1146 }
 0x261   : > { %v1142_v32 = vpop.permute.xlu0 %1141  ;;  %v1220_v38 = vmul.f32 %v1147_v33, %v1092_v35 }
 0x262   : > { %v1219_v37 = vmul.f32 %v1142_v32, %v1091_v31 }
 0x264   : > { %v1157_v41 = vpop.permute.xlu1 %1156  ;;  %5734 = vmatprep.mubr.msk.f32.mxu0 %vm560_vm0, %v1219_v37 }
 0x265   : > { %5735 = vmatmul.mubr.msk.f32.vlgmr.msra.gmra.mrb[8].mxu0 %vm560_vm0, %v1220_v38  ;;  %v1152_v21 = vpop.permute.xlu0 %1151  ;;  %v1222_v45 = vmul.f32 %v1157_v41, %v1094_v43 }
 0x266   : > { %v1221_v44 = vmul.f32 %v1152_v21, %v1093_v39  ;;  %6279 = vmatpush3.bf16.msra.mxu0 %v6751_v1 }
 0x267   : > { %6280 = vmatprep.subr.bf16.mxu0 %v6751_v1 }
 0x268   : > { %v1167_v22 = vpop.permute.xlu1 %1166  ;;  %5737 = vmatprep.mubr.msk.f32.mxu0 %vm560_vm0, %v1221_v44 }
 0x269   : > { %5738 = vmatmul.mubr.msk.f32.gmra.mrb[10].mxu0 %vm560_vm0, %v1222_v45  ;;  %v1162_v50 = vpop.permute.xlu0 %1161  ;;  %v1224_v52 = vmul.f32 %v1167_v22, %v1096_v24 }
 0x26a   : > { %v1223_v51 = vmul.f32 %v1162_v50, %v1095_v46  ;;  %6281 = vmatpush3.bf16.msra.mxu0 %v6751_v1 }
 0x26b   : > { %6282 = vmatprep.subr.bf16.mxu0 %v6751_v1 }
 0x26c   : > { %v1177_v53 = vpop.permute.xlu1 %1176  ;;  %5740 = vmatprep.mubr.msk.f32.mxu0 %vm560_vm0, %v1223_v51 }
 0x26d   : > { %5741 = vmatmul.mubr.msk.f32.gmra.mrb[12].mxu0 %vm560_vm0, %v1224_v52  ;;  %v1172_v55 = vpop.permute.xlu0 %1171  ;;  %v1226_v59 = vmul.f32 %v1177_v53, %v1098_v54 }
 0x26e   : > { %v1225_v58 = vmul.f32 %v1172_v55, %v1097_v25  ;;  %6283 = vmatpush3.bf16.msra.mxu0 %v6751_v1 }
 0x26f   : > { %6284 = vmatprep.subr.bf16.mxu0 %v6751_v1 }
 0x270   : > { %v1187_v61 = vpop.permute.xlu1 %1186  ;;  %5743 = vmatprep.mubr.msk.f32.mxu0 %vm560_vm0, %v1225_v58 }
 0x271   : > { %5744 = vmatmul.mubr.msk.f32.gmra.mrb[14].mxu0 %vm560_vm0, %v1226_v59  ;;  %v1182_v26 = vpop.permute.xlu0 %1181  ;;  %v1228_v2 = vmul.f32 %v1187_v61, %v1100_v62 }
 0x272   : > { %v1227_v3 = vmul.f32 %v1182_v26, %v1099_v60  ;;  %6285 = vmatpush3.bf16.msra.mxu0 %v6751_v1 }
 0x274   : > { %v1197_v5 = vpop.permute.xlu1 %1196  ;;  %5746 = vmatprep.mubr.msk.f32.mxu0 %vm560_vm0, %v1227_v3 }
 0x275   : > { %5747 = vmatmul.mubr.msk.f32.gmra.mrb[16].mxu0 %vm560_vm0, %v1228_v2  ;;  %v1192_v10 = vpop.permute.xlu0 %1191  ;;  %v1230_v27 = vmul.f32 %v1197_v5, %v1102_v7 }
 0x276   : > { %v1229_v6 = vmul.f32 %v1192_v10, %v1101_v4 }
 0x278   : > { %v1207_v14 = vpop.permute.xlu1 %1206  ;;  %5749 = vmatprep.mubr.msk.f32.mxu0 %vm560_vm0, %v1229_v6 }
 0x279   : > { %5750 = vmatmul.mubr.msk.f32.gmra.mrb[18].mxu0 %vm560_vm0, %v1230_v27  ;;  %v1202_v15 = vpop.permute.xlu0 %1201  ;;  %v1232_v18 = vmul.f32 %v1207_v14, %v1104_v13 }
 0x27a   : > { %v1231_v17 = vmul.f32 %v1202_v15, %v1103_v11 }
 0x27c   : > { %v1217_v31 = vpop.permute.xlu1 %1216  ;;  %5752 = vmatprep.mubr.msk.f32.mxu0 %vm560_vm0, %v1231_v17 }
 0x27d   : > { %5753 = vmatmul.mubr.msk.f32.gmra.mrb[20].mxu0 %vm560_vm0, %v1232_v18  ;;  %v1212_v33 = vpop.permute.xlu0 %1211  ;;  %v1234_v32 = vmul.f32 %v1217_v31, %v1106_v16 }
 0x27e   : > { %v1233_v35 = vmul.f32 %v1212_v33, %v1105_v12 }
 0x280   : > { %5755 = vmatprep.mubr.msk.f32.mxu0 %vm560_vm0, %v1233_v35 }
 0x281   : > { %5756 = vmatmul.mubr.msk.f32.gmra.mrb[22].mxu0 %vm560_vm0, %v1234_v32 }
 0x338   : > { %v5736_v28 = vpop.f32.mrb[8].mxu0 }
 0x339   : > { %v1437_v37 = vadd.f32 %v5736_v28, %v7038_v48  ;;  %v1357_v38 = vpop.f32.mrb[9].mxu0 }
 0x33a   : > { %v1436_v19 = vadd.f32 %v1357_v38, %v7041_v49 }
 0x33b   : > { %v7261_v39 = vadd.f32 %v7256_v20, %v1437_v37 }
 0x33c   : > { %v7264_v41 = vadd.f32 %v7256_v20, %v1436_v19  ;;  %v5739_v43 = vpop.f32.mrb[10].mxu0 }
 0x33d   : > { %v1439_v21 = vadd.f32 %v5739_v43, %v7058_v56  ;;  %v1367_v44 = vpop.f32.mrb[11].mxu0  ;;  %v1669_v49 = vmul.f32 %v7261_v39, %v7261_v39 }
 0x33e   : > { %v1438_v45 = vadd.f32 %v1367_v44, %v7061_v57  ;;  %5774 = vmatprep.mubr.msk.f32.mxu1 %vm560_vm0, %v7264_v41  ;;  %v1668_v48 = vmul.f32 %v7264_v41, %v7264_v41  ;;  %v2149_v44 = vld [vmem:[%s8072_s5] sm:$0xff] }
 0x33f   : > { %v7275_v46 = vadd.f32 %v7256_v20, %v1439_v21  ;;  %5775 = vmatmul.mubr.msk.f32.vlgmr.msra.gmra.mrb[24].mxu1 %vm560_vm0, %v7261_v39 }
 0x340   : > { %v7280_v56 = vadd.f32 %v7256_v20, %v1438_v45  ;;  %v5742_v22 = vpop.f32.mrb[12].mxu0  ;;  %5814 = vmatprep.mubr.msk.f32.mxu0 %vm560_vm0, %v1668_v48  ;;  %v2150_v45 = vld [vmem:[%s8072_s5 + $0x8] sm:$0xff] }
 0x341   : > { %v1441_v57 = vadd.f32 %v5742_v22, %v7076_v63  ;;  %v1377_v24 = vpop.f32.mrb[13].mxu0  ;;  %5815 = vmatmul.mubr.msk.f32.vlgmr.msra.gmra.mrb[24].mxu0 %vm560_vm0, %v1669_v49  ;;  %v1671_v63 = vmul.f32 %v7275_v46, %v7275_v46  ;;  %v6286_v22 = vpack.c.bf16 %v2150_v45, %v2149_v44 }
 0x342   : > { %v1440_v50 = vadd.f32 %v1377_v24, %v7079_v0  ;;  %5777 = vmatprep.mubr.msk.f32.mxu1 %vm560_vm0, %v7280_v56  ;;  %v1670_v51 = vmul.f32 %v7280_v56, %v7280_v56 }
 0x343   : > { %v7291_v52 = vadd.f32 %v7256_v20, %v1441_v57  ;;  %5778 = vmatmul.mubr.msk.f32.gmra.mrb[26].mxu1 %vm560_vm0, %v7275_v46  ;;  %6287 = vmatprep.subr.bf16.mxu1 %v6286_v22 }
 0x344   : > { %v7298_v25 = vadd.f32 %v7256_v20, %v1440_v50  ;;  %v5745_v53 = vpop.f32.mrb[14].mxu0  ;;  %5817 = vmatprep.mubr.msk.f32.mxu0 %vm560_vm0, %v1670_v51  ;;  %6289 = vmatpush3.bf16.msra.mxu1 %v6286_v22 }
 0x345   : > { %v1443_v0 = vadd.f32 %v5745_v53, %v7096_v8  ;;  %v1387_v54 = vpop.f32.mrb[15].mxu0  ;;  %5818 = vmatmul.mubr.msk.f32.gmra.mrb[26].mxu0 %vm560_vm0, %v1671_v63  ;;  %v1673_v8 = vmul.f32 %v7291_v52, %v7291_v52 }
 0x346   : > { %v1442_v55 = vadd.f32 %v1387_v54, %v7099_v9  ;;  %5780 = vmatprep.mubr.msk.f32.mxu1 %vm560_vm0, %v7298_v25  ;;  %v1672_v58 = vmul.f32 %v7298_v25, %v7298_v25 }
 0x347   : > { %v7309_v59 = vadd.f32 %v7256_v20, %v1443_v0  ;;  %5781 = vmatmul.mubr.msk.f32.gmra.mrb[28].mxu1 %vm560_vm0, %v7291_v52 }
 0x348   : > { %v7316_v60 = vadd.f32 %v7256_v20, %v1442_v55  ;;  %v5748_v61 = vpop.f32.mrb[16].mxu0  ;;  %5820 = vmatprep.mubr.msk.f32.mxu0 %vm560_vm0, %v1672_v58 }
 0x349   : > { %v1445_v9 = vadd.f32 %v5748_v61, %v6994_v29  ;;  %v1397_v62 = vpop.f32.mrb[17].mxu0  ;;  %5821 = vmatmul.mubr.msk.f32.gmra.mrb[28].mxu0 %vm560_vm0, %v1673_v8  ;;  %v1675_v29 = vmul.f32 %v7309_v59, %v7309_v59 }
 0x34a   : > { %v1444_v26 = vadd.f32 %v1397_v62, %v6986_v23  ;;  %5783 = vmatprep.mubr.msk.f32.mxu1 %vm560_vm0, %v7316_v60  ;;  %v1674_v3 = vmul.f32 %v7316_v60, %v7316_v60 }
 0x34b   : > { %v7327_v2 = vadd.f32 %v7256_v20, %v1445_v9  ;;  %5784 = vmatmul.mubr.msk.f32.gmra.mrb[30].mxu1 %vm560_vm0, %v7309_v59 }
 0x34c   : > { %v7334_v4 = vadd.f32 %v7256_v20, %v1444_v26  ;;  %v5751_v5 = vpop.f32.mrb[18].mxu0  ;;  %5823 = vmatprep.mubr.msk.f32.mxu0 %vm560_vm0, %v1674_v3 }
 0x34d   : > { %v1447_v23 = vadd.f32 %v5751_v5, %v7006_v34  ;;  %v1407_v7 = vpop.f32.mrb[19].mxu0  ;;  %5824 = vmatmul.mubr.msk.f32.gmra.mrb[30].mxu0 %vm560_vm0, %v1675_v29  ;;  %v1677_v34 = vmul.f32 %v7327_v2, %v7327_v2 }
 0x34e   : > { %v1446_v10 = vadd.f32 %v1407_v7, %v6997_v30  ;;  %5786 = vmatprep.mubr.msk.f32.mxu1 %vm560_vm0, %v7334_v4  ;;  %v1676_v6 = vmul.f32 %v7334_v4, %v7334_v4  ;;  %v2151_v7 = vld [vmem:[%s8072_s5 + $0x10] sm:$0xff] }
 0x34f   : > { %v7345_v27 = vadd.f32 %v7256_v20, %v1447_v23  ;;  %5787 = vmatmul.mubr.msk.f32.gmra.mrb[32].mxu1 %vm560_vm0, %v7327_v2 }
 0x350   : > { %v7352_v11 = vadd.f32 %v7256_v20, %v1446_v10  ;;  %v5754_v14 = vpop.f32.mrb[20].mxu0  ;;  %5826 = vmatprep.mubr.msk.f32.mxu0 %vm560_vm0, %v1676_v6  ;;  %v2152_v10 = vld [vmem:[%s8072_s5 + $0x18] sm:$0xff] }
 0x351   : > { %v1449_v30 = vadd.f32 %v5754_v14, %v7020_v40  ;;  %v1417_v13 = vpop.f32.mrb[21].mxu0  ;;  %5827 = vmatmul.mubr.msk.f32.gmra.mrb[32].mxu0 %vm560_vm0, %v1677_v34  ;;  %v1679_v40 = vmul.f32 %v7345_v27, %v7345_v27 }
 0x352   : > { %v1448_v15 = vadd.f32 %v1417_v13, %v7010_v36  ;;  %5789 = vmatprep.mubr.msk.f32.mxu1 %vm560_vm0, %v7352_v11  ;;  %v1678_v17 = vmul.f32 %v7352_v11, %v7352_v11 }
 0x353   : > { %v7363_v18 = vadd.f32 %v7256_v20, %v1449_v30  ;;  %5790 = vmatmul.mubr.msk.f32.gmra.mrb[34].mxu1 %vm560_vm0, %v7345_v27  ;;  %v6290_v30 = vpack.c.bf16 %v2152_v10, %v2151_v7 }
 0x354   : > { %v7370_v12 = vadd.f32 %v7256_v20, %v1448_v15  ;;  %v5757_v31 = vpop.f32.mrb[22].mxu0  ;;  %5829 = vmatprep.mubr.msk.f32.mxu0 %vm560_vm0, %v1678_v17 }
 0x355   : > { %v1451_v36 = vadd.f32 %v5757_v31, %v7035_v47  ;;  %v1427_v16 = vpop.f32.mrb[23].mxu0  ;;  %5830 = vmatmul.mubr.msk.f32.gmra.mrb[34].mxu0 %vm560_vm0, %v1679_v40  ;;  %v1681_v47 = vmul.f32 %v7363_v18, %v7363_v18  ;;  %6291 = vmatprep.subr.bf16.mxu1 %v6290_v30 }
 0x356   : > { %v1450_v33 = vadd.f32 %v1427_v16, %v7024_v42  ;;  %5792 = vmatprep.mubr.msk.f32.mxu1 %vm560_vm0, %v7370_v12  ;;  %v1680_v35 = vmul.f32 %v7370_v12, %v7370_v12  ;;  %6293 = vmatpush3.bf16.msra.mxu1 %v6290_v30 }
 0x357   : > { %v7381_v32 = vadd.f32 %v7256_v20, %v1451_v36  ;;  %5793 = vmatmul.mubr.msk.f32.gmra.mrb[36].mxu1 %vm560_vm0, %v7363_v18 }
 0x358   : > { %v7388_v28 = vadd.f32 %v7256_v20, %v1450_v33  ;;  %5832 = vmatprep.mubr.msk.f32.mxu0 %vm560_vm0, %v1680_v35 }
 0x359   : > { %5833 = vmatmul.mubr.msk.f32.gmra.mrb[36].mxu0 %vm560_vm0, %v1681_v47  ;;  %v1683_v37 = vmul.f32 %v7381_v32, %v7381_v32 }
 0x35a   : > { %5795 = vmatprep.mubr.msk.f32.mxu1 %vm560_vm0, %v7388_v28  ;;  %v1682_v42 = vmul.f32 %v7388_v28, %v7388_v28 }
 0x35b   : > { %5796 = vmatmul.mubr.msk.f32.gmra.mrb[38].mxu1 %vm560_vm0, %v7381_v32 }
 0x35c   : > { %5835 = vmatprep.mubr.msk.f32.mxu0 %vm560_vm0, %v1682_v42  ;;  %v2153_v42 = vld [vmem:[%s8072_s5 + $0x20] sm:$0xff] }
 0x35d   : > { %5836 = vmatmul.mubr.msk.f32.gmra.mrb[38].mxu0 %vm560_vm0, %v1683_v37  ;;  %v2154_v37 = vld [vmem:[%s8072_s5 + $0x28] sm:$0xff] }
 0x412   : > { %v5776_v20 = vpop.f32.mrb[24].mxu1 }
 0x413   : > { %v1878_v38 = vmul.f32 %v5776_v20, %v5776_v20  ;;  %1932 = vperm.xlu1 %6489, %v5776_v20   ;;  %v1589_v19 = vpop.f32.mrb[25].mxu1 }
 0x414   : > { %v1877_v43 = vmul.f32 %v1589_v19, %v1589_v19  ;;  %1927 = vperm.xlu0 %6488, %v1589_v19   ;;  %v5816_v21 = vpop.f32.mrb[24].mxu0  ;;  %v6294_v19 = vpack.c.bf16 %v2154_v37, %v2153_v42 }
 0x415   : > { %v1894_v48 = vsub.f32 %v5816_v21, %v1878_v38  ;;  %v1798_v49 = vpop.f32.mrb[25].mxu0 }
 0x416   : > { %v1893_v57 = vsub.f32 %v1798_v49, %v1877_v43  ;;  %v5779_v24 = vpop.f32.mrb[26].mxu1  ;;  %6295 = vmatprep.subr.bf16.mxu1 %v6294_v19 }
 0x417   : > { %v1910_v50 = vmax.f32 %v1894_v48, 0.0  ;;  %v1880_v51 = vmul.f32 %v5779_v24, %v5779_v24  ;;  %1942 = vperm.xlu1 %6489, %v5779_v24   ;;  %v1599_v63 = vpop.f32.mrb[27].mxu1  ;;  %6297 = vmatpush3.bf16.msra.mxu1 %v6294_v19 }
 0x418   : > { %v1909_v53 = vmax.f32 %v1893_v57, 0.0  ;;  %v1879_v0 = vmul.f32 %v1599_v63, %v1599_v63  ;;  %1937 = vperm.xlu0 %6488, %v1599_v63   ;;  %v5819_v54 = vpop.f32.mrb[26].mxu0 }
 0x419   : > { %v2022_v55 = vadd.f32 1e-05, %v1910_v50  ;;  %v1896_v58 = vsub.f32 %v5819_v54, %v1880_v51  ;;  %v1808_v8 = vpop.f32.mrb[27].mxu0  ;;  %v2155_v50 = vld [vmem:[%s8072_s5 + $0x30] sm:$0xff]  ;;  %v2156_v51 = vld [vmem:[%s8072_s5 + $0x38] sm:$0xff] }
 0x41a   : > { %v2021_v61 = vadd.f32 1e-05, %v1909_v53  ;;  %v1895_v9 = vsub.f32 %v1808_v8, %v1879_v0  ;;  %v5782_v62 = vpop.f32.mrb[28].mxu1  ;;  %v6298_v54 = vpack.c.bf16 %v2156_v51, %v2155_v50 }
 0x41b   : > { %6522 = vrsqrt.f32 %v2022_v55  ;;  %v1882_v26 = vmul.f32 %v5782_v62, %v5782_v62  ;;  %1952 = vperm.xlu1 %6489, %v5782_v62   ;;  %v1609_v3 = vpop.f32.mrb[29].mxu1  ;;  %v1912_v29 = vmax.f32 %v1896_v58, 0.0 }
 0x41c   : > { %6524 = vrsqrt.f32 %v2021_v61  ;;  %v1881_v5 = vmul.f32 %v1609_v3, %v1609_v3  ;;  %1947 = vperm.xlu0 %6488, %v1609_v3   ;;  %v5822_v23 = vpop.f32.mrb[28].mxu0  ;;  %v1911_v6 = vmax.f32 %v1895_v9, 0.0  ;;  %6299 = vmatprep.subr.bf16.mxu1 %v6298_v54 }
 0x41d   : > { %v1898_v34 = vsub.f32 %v5822_v23, %v1882_v26  ;;  %v1818_v14 = vpop.f32.mrb[29].mxu0  ;;  %v2024_v31 = vadd.f32 1e-05, %v1912_v29  ;;  %6301 = vmatpush3.bf16.msra.mxu1 %v6298_v54 }
 0x41e   : > { %v1897_v13 = vsub.f32 %v1818_v14, %v1881_v5  ;;  %v5785_v15 = vpop.f32.mrb[30].mxu1  ;;  %v2023_v33 = vadd.f32 1e-05, %v1911_v6  ;;  %6318 = vmatprep.subr.bf16.mxu1 %v6751_v1 }
 0x41f   : > { %v1884_v17 = vmul.f32 %v5785_v15, %v5785_v15  ;;  %1962 = vperm.xlu1 %6489, %v5785_v15   ;;  %v1619_v40 = vpop.f32.mrb[31].mxu1  ;;  %6526 = vrsqrt.f32 %v2024_v31  ;;  %v1914_v44 = vmax.f32 %v1898_v34, 0.0 }
 0x420   : > { %v1883_v36 = vmul.f32 %v1619_v40, %v1619_v40  ;;  %1957 = vperm.xlu0 %6488, %v1619_v40   ;;  %v5825_v16 = vpop.f32.mrb[30].mxu0  ;;  %6528 = vrsqrt.f32 %v2023_v33  ;;  %v1913_v22 = vmax.f32 %v1897_v13, 0.0 }
 0x421   : > { %v1900_v35 = vsub.f32 %v5825_v16, %v1884_v17  ;;  %v1828_v47 = vpop.f32.mrb[31].mxu0  ;;  %v2026_v8 = vadd.f32 1e-05, %v1914_v44 }
 0x422   : > { %v1899_v20 = vsub.f32 %v1828_v47, %v1883_v36  ;;  %v5788_v38 = vpop.f32.mrb[32].mxu1  ;;  %v2025_v62 = vadd.f32 1e-05, %v1913_v22 }
 0x423   : > { %v1886_v43 = vmul.f32 %v5788_v38, %v5788_v38  ;;  %1972 = vperm.xlu1 %6489, %v5788_v38   ;;  %v1629_v21 = vpop.f32.mrb[33].mxu1  ;;  %6530 = vrsqrt.f32 %v2026_v8  ;;  %v1916_v10 = vmax.f32 %v1900_v35, 0.0 }
 0x424   : > { %v1885_v45 = vmul.f32 %v1629_v21, %v1629_v21  ;;  %1967 = vperm.xlu0 %6488, %v1629_v21   ;;  %v5828_v48 = vpop.f32.mrb[32].mxu0  ;;  %6532 = vrsqrt.f32 %v2025_v62  ;;  %v1915_v14 = vmax.f32 %v1899_v20, 0.0 }
 0x425   : > { %v6523_v49 = vpop.eup %6522  ;;  %v1902_v57 = vsub.f32 %v5828_v48, %v1886_v43  ;;  %v1838_v24 = vpop.f32.mrb[33].mxu0  ;;  %v2028_v33 = vadd.f32 1e-05, %v1916_v10  ;;  %v2373_v10 = vld [vmem:[#allocation2] sm:$0xff] }
 0x426   : > { %v6525_v63 = vpop.eup %6524  ;;  %v1901_v53 = vsub.f32 %v1838_v24, %v1885_v45  ;;  %v5791_v0 = vpop.f32.mrb[34].mxu1  ;;  %v2027_v35 = vadd.f32 1e-05, %v1915_v14 }
 0x427   : > { %v1888_v55 = vmul.f32 %v5791_v0, %v5791_v0  ;;  %v1639_v58 = vpop.f32.mrb[35].mxu1  ;;  %2060 = vperm.xlu1 %6489, %v6523_v49   ;;  %v1918_v47 = vmax.f32 %v1902_v57, 0.0  ;;  %6534 = vrsqrt.f32 %v2028_v33 }
 0x428   : > { %v1887_v61 = vmul.f32 %v1639_v58, %v1639_v58  ;;  %2055 = vperm.xlu0 %6488, %v6525_v63   ;;  %v5831_v9 = vpop.f32.mrb[34].mxu0  ;;  %v1917_v38 = vmax.f32 %v1901_v53, 0.0  ;;  %6536 = vrsqrt.f32 %v2027_v35 }
 0x429   : > { %v1904_v26 = vsub.f32 %v5831_v9, %v1888_v55  ;;  %v1848_v3 = vpop.f32.mrb[35].mxu0  ;;  %v6527_v15 = vpop.eup %6526  ;;  %v2030_v20 = vadd.f32 1e-05, %v1918_v47 }
 0x42a   : > { %v1903_v29 = vsub.f32 %v1848_v3, %v1887_v61  ;;  %v5794_v5 = vpop.f32.mrb[36].mxu1  ;;  %v6529_v31 = vpop.eup %6528  ;;  %v2029_v45 = vadd.f32 1e-05, %v1917_v38 }
 0x42b   : > { %v1890_v23 = vmul.f32 %v5794_v5, %v5794_v5  ;;  %v1649_v7 = vpop.f32.mrb[37].mxu1  ;;  %1982 = vperm.xlu1 %6489, %v5791_v0   ;;  %v1920_v44 = vmax.f32 %v1904_v26, 0.0  ;;  %6538 = vrsqrt.f32 %v2030_v20 }
 0x42c   : > { %v1889_v6 = vmul.f32 %v1649_v7, %v1649_v7  ;;  %1977 = vperm.xlu0 %6488, %v1639_v58   ;;  %v5834_v34 = vpop.f32.mrb[36].mxu0  ;;  %v1919_v48 = vmax.f32 %v1903_v29, 0.0  ;;  %6540 = vrsqrt.f32 %v2029_v45 }
 0x42d   : > { %v1906_v30 = vsub.f32 %v5834_v34, %v1890_v23  ;;  %v1858_v13 = vpop.f32.mrb[37].mxu0  ;;  %v6531_v49 = vpop.eup %6530  ;;  %v2032_v57 = vadd.f32 1e-05, %v1920_v44  ;;  %v2375_v34 = vld [vmem:[#allocation2 + $0x10] sm:$0xff] }
 0x42e   : > { %v1905_v17 = vsub.f32 %v1858_v13, %v1889_v6  ;;  %v5797_v40 = vpop.f32.mrb[38].mxu1  ;;  %v6533_v22 = vpop.eup %6532  ;;  %v2031_v50 = vadd.f32 1e-05, %v1919_v48  ;;  %v2374_v6 = vld [vmem:[#allocation2 + $0x8] sm:$0xff] }
 0x42f   : > { %v1892_v36 = vmul.f32 %v5797_v40, %v5797_v40  ;;  %2070 = vperm.xlu1 %6489, %v6527_v15   ;;  %v1659_v16 = vpop.f32.mrb[39].mxu1  ;;  %v1922_v24 = vmax.f32 %v1906_v30, 0.0  ;;  %6542 = vrsqrt.f32 %v2032_v57  ;;  %v6302_v14 = vpack.c.bf16 %v2374_v6, %v2373_v10  ;;  %v2376_v30 = vld [vmem:[#allocation2 + $0x18] sm:$0xff]  ;;  %v2377_v15 = vld [vmem:[#allocation2 + $0x20] sm:$0xff] }
 0x430   : > { %v1891_v42 = vmul.f32 %v1659_v16, %v1659_v16  ;;  %2065 = vperm.xlu0 %6488, %v6529_v31   ;;  %v5837_v37 = vpop.f32.mrb[38].mxu0  ;;  %v1921_v51 = vmax.f32 %v1905_v17, 0.0  ;;  %6544 = vrsqrt.f32 %v2031_v50  ;;  %v6306_v13 = vpack.c.bf16 %v2376_v30, %v2375_v34  ;;  %v2378_v17 = vld [vmem:[#allocation2 + $0x28] sm:$0xff] }
 0x431   : > { %v1908_v19 = vsub.f32 %v5837_v37, %v1892_v36  ;;  %v1868_v43 = vpop.f32.mrb[39].mxu0  ;;  %v2034_v63 = vadd.f32 1e-05, %v1922_v24  ;;  %v6535_v55 = vpop.eup %6534  ;;  %6303 = vmatprep.subr.bf16.mxu0 %v6302_v14 }
 0x432   : > { %v1907_v21 = vsub.f32 %v1868_v43, %v1891_v42  ;;  %v2033_v0 = vadd.f32 1e-05, %v1921_v51  ;;  %v6537_v58 = vpop.eup %6536  ;;  %6305 = vmatpush3.bf16.msra.mxu0 %v6302_v14 }
 0x433   : > { %1992 = vperm.xlu1 %6489, %v5794_v5   ;;  %v1924_v53 = vmax.f32 %v1908_v19, 0.0  ;;  %6546 = vrsqrt.f32 %v2034_v63  ;;  %6307 = vmatprep.subr.bf16.mxu0 %v6306_v13 }
 0x434   : > { %1987 = vperm.xlu0 %6488, %v1649_v7   ;;  %v1923_v54 = vmax.f32 %v1907_v21, 0.0  ;;  %6548 = vrsqrt.f32 %v2033_v0 }
 0x435   : > { %v2036_v8 = vadd.f32 1e-05, %v1924_v53  ;;  %v6539_v9 = vpop.eup %6538 }
 0x436   : > { %v2035_v61 = vadd.f32 1e-05, %v1923_v54  ;;  %v6541_v62 = vpop.eup %6540  ;;  %6309 = vmatpush3.bf16.msra.mxu0 %v6306_v13 }
 0x437   : > { %2080 = vperm.xlu1 %6489, %v6531_v49   ;;  %6550 = vrsqrt.f32 %v2036_v8 }
 0x438   : > { %2075 = vperm.xlu0 %6488, %v6533_v22   ;;  %6552 = vrsqrt.f32 %v2035_v61 }
 0x439   : > { %v6543_v26 = vpop.eup %6542 }
 0x43a   : > { %v6545_v3 = vpop.eup %6544 }
 0x43b   : > { %2002 = vperm.xlu1 %6489, %v5797_v40   ;;  %v6310_v40 = vpack.c.bf16 %v2378_v17, %v2377_v15 }
 0x43c   : > { %1997 = vperm.xlu0 %6488, %v1659_v16  }
 0x43d   : > { %v6547_v29 = vpop.eup %6546  ;;  %6311 = vmatprep.subr.bf16.mxu0 %v6310_v40 }
 0x43e   : > { %v6549_v5 = vpop.eup %6548  ;;  %6313 = vmatpush3.bf16.msra.mxu0 %v6310_v40 }
 0x43f   : > { %2090 = vperm.xlu1 %6489, %v6535_v55  }
 0x440   : > { %2085 = vperm.xlu0 %6488, %v6537_v58  }
 0x441   : > { %v6551_v23 = vpop.eup %6550 }
 0x442   : > { %v6553_v7 = vpop.eup %6552 }
 0x443   : > { %2100 = vperm.xlu1 %6489, %v6539_v9  }
 0x444   : > { %2095 = vperm.xlu0 %6488, %v6541_v62  }
 0x447   : > { %2110 = vperm.xlu1 %6489, %v6543_v26  }
 0x448   : > { %2105 = vperm.xlu0 %6488, %v6545_v3  }
 0x44b   : > { %2120 = vperm.xlu1 %6489, %v6547_v29  }
 0x44c   : > { %2115 = vperm.xlu0 %6488, %v6549_v5  }
 0x44f   : > { %2130 = vperm.xlu1 %6489, %v6551_v23  }
 0x450   : > { %2125 = vperm.xlu0 %6488, %v6553_v7  }
 0x492   : > { %v1933_v31 = vpop.permute.xlu1 %1932 }
 0x493   : > { %v1928_v36 = vpop.permute.xlu0 %1927  ;;  %v2006_v20 = vsub.f32 %v7261_v39, %v1933_v31 }
 0x494   : > { %v2005_v43 = vsub.f32 %v7264_v41, %v1928_v36 }
 0x496   : > { %v1943_v16 = vpop.permute.xlu1 %1942 }
 0x497   : > { %v1938_v33 = vpop.permute.xlu0 %1937  ;;  %v2008_v50 = vsub.f32 %v7275_v46, %v1943_v16 }
 0x498   : > { %v2007_v57 = vsub.f32 %v7280_v56, %v1938_v33 }
 0x49a   : > { %v1953_v47 = vpop.permute.xlu1 %1952 }
 0x49b   : > { %v1948_v42 = vpop.permute.xlu0 %1947  ;;  %v2010_v8 = vsub.f32 %v7291_v52, %v1953_v47 }
 0x49c   : > { %v2009_v55 = vsub.f32 %v7298_v25, %v1948_v42 }
 0x49e   : > { %v1963_v37 = vpop.permute.xlu1 %1962 }
 0x49f   : > { %v1958_v35 = vpop.permute.xlu0 %1957  ;;  %v2012_v23 = vsub.f32 %v7309_v59, %v1963_v37 }
 0x4a0   : > { %v2011_v29 = vsub.f32 %v7316_v60, %v1958_v35 }
 0x4a2   : > { %v1973_v38 = vpop.permute.xlu1 %1972 }
 0x4a3   : > { %v1968_v19 = vpop.permute.xlu0 %1967  ;;  %v2014_v30 = vsub.f32 %v7327_v2, %v1973_v38 }
 0x4a4   : > { %v2013_v34 = vsub.f32 %v7334_v4, %v1968_v19 }
 0x4a6   : > { %v2061_v21 = vpop.permute.xlu1 %2060 }
 0x4a7   : > { %v2056_v44 = vpop.permute.xlu0 %2055  ;;  %v2134_v48 = vmul.f32 %v2061_v21, %v2006_v20 }
 0x4a8   : > { %v2133_v45 = vmul.f32 %v2056_v44, %v2005_v43 }
 0x4aa   : > { %v1983_v49 = vpop.permute.xlu1 %1982  ;;  %5854 = vmatprep.mubr.msk.f32.mxu1 %vm560_vm0, %v2133_v45 }
 0x4ab   : > { %5855 = vmatmul.mubr.msk.f32.vlgmr.msra.gmra.mrb[40].mxu1 %vm560_vm0, %v2134_v48  ;;  %v1978_v22 = vpop.permute.xlu0 %1977  ;;  %v2016_v36 = vsub.f32 %v7345_v27, %v1983_v49 }
 0x4ac   : > { %6319 = vmatpush3.bf16.msra.mxu1 %v6751_v1  ;;  %v2015_v40 = vsub.f32 %v7352_v11, %v1978_v22  ;;  %v2379_v22 = vld [vmem:[#allocation2 + $0x30] sm:$0xff] }
 0x4ad   : > { %6320 = vmatprep.subr.bf16.mxu1 %v6751_v1 }
 0x4ae   : > { %v2071_v24 = vpop.permute.xlu1 %2070 }
 0x4af   : > { %v2066_v51 = vpop.permute.xlu0 %2065  ;;  %v2136_v53 = vmul.f32 %v2071_v24, %v2008_v50  ;;  %v7470_v50 = vld [vmem:[%s8073_s6] ss:$0 sm:$0xff] }
 0x4b0   : > { %v2135_v63 = vmul.f32 %v2066_v51, %v2007_v57  ;;  %6321 = vmatpush3.bf16.msra.mxu1 %v6751_v1  ;;  %v2380_v57 = vld [vmem:[#allocation2 + $0x38] sm:$0xff] }
 0x4b1   : > { %6322 = vmatprep.subr.bf16.mxu1 %v6751_v1  ;;  %v6314_v24 = vpack.c.bf16 %v2380_v57, %v2379_v22 }
 0x4b2   : > { %v1993_v0 = vpop.permute.xlu1 %1992  ;;  %5857 = vmatprep.mubr.msk.f32.mxu1 %vm560_vm0, %v2135_v63 }
 0x4b3   : > { %5858 = vmatmul.mubr.msk.f32.gmra.mrb[42].mxu1 %vm560_vm0, %v2136_v53  ;;  %v1988_v54 = vpop.permute.xlu0 %1987  ;;  %v2018_v35 = vsub.f32 %v7363_v18, %v1993_v0  ;;  %6315 = vmatprep.subr.bf16.mxu0 %v6314_v24 }
 0x4b4   : > { %6323 = vmatpush3.bf16.msra.mxu1 %v6751_v1  ;;  %v2017_v42 = vsub.f32 %v7370_v12, %v1988_v54  ;;  %6317 = vmatpush3.bf16.msra.mxu0 %v6314_v24 }
 0x4b5   : > { %6324 = vmatprep.subr.bf16.mxu1 %v6751_v1  ;;  %6326 = vmatprep.subr.bf16.mxu0 %v6751_v1 }
 0x4b6   : > { %v2081_v58 = vpop.permute.xlu1 %2080 }
 0x4b7   : > { %v2076_v61 = vpop.permute.xlu0 %2075  ;;  %v2138_v62 = vmul.f32 %v2081_v58, %v2010_v8 }
 0x4b8   : > { %v2137_v9 = vmul.f32 %v2076_v61, %v2009_v55  ;;  %6325 = vmatpush3.bf16.msra.mxu1 %v6751_v1 }
 0x4ba   : > { %v2003_v26 = vpop.permute.xlu1 %2002  ;;  %5860 = vmatprep.mubr.msk.f32.mxu1 %vm560_vm0, %v2137_v9 }
 0x4bb   : > { %5861 = vmatmul.mubr.msk.f32.gmra.mrb[44].mxu1 %vm560_vm0, %v2138_v62  ;;  %v1998_v3 = vpop.permute.xlu0 %1997  ;;  %v2020_v44 = vsub.f32 %v7381_v32, %v2003_v26 }
 0x4bc   : > { %v2019_v21 = vsub.f32 %v7388_v28, %v1998_v3 }
 0x4be   : > { %v2091_v5 = vpop.permute.xlu1 %2090 }
 0x4bf   : > { %v2086_v7 = vpop.permute.xlu0 %2085  ;;  %v2140_v6 = vmul.f32 %v2091_v5, %v2012_v23 }
 0x4c0   : > { %v2139_v10 = vmul.f32 %v2086_v7, %v2011_v29 }
 0x4c2   : > { %v2101_v14 = vpop.permute.xlu1 %2100  ;;  %5863 = vmatprep.mubr.msk.f32.mxu1 %vm560_vm0, %v2139_v10 }
 0x4c3   : > { %5864 = vmatmul.mubr.msk.f32.gmra.mrb[46].mxu1 %vm560_vm0, %v2140_v6  ;;  %v2096_v13 = vpop.permute.xlu0 %2095  ;;  %v2142_v17 = vmul.f32 %v2101_v14, %v2014_v30 }
 0x4c4   : > { %v2141_v15 = vmul.f32 %v2096_v13, %v2013_v34 }
 0x4c6   : > { %v2111_v31 = vpop.permute.xlu1 %2110  ;;  %5866 = vmatprep.mubr.msk.f32.mxu1 %vm560_vm0, %v2141_v15 }
 0x4c7   : > { %5867 = vmatmul.mubr.msk.f32.gmra.mrb[48].mxu1 %vm560_vm0, %v2142_v17  ;;  %v2106_v16 = vpop.permute.xlu0 %2105  ;;  %v2144_v47 = vmul.f32 %v2111_v31, %v2016_v36 }
 0x4c8   : > { %v2143_v33 = vmul.f32 %v2106_v16, %v2015_v40 }
 0x4ca   : > { %v2121_v37 = vpop.permute.xlu1 %2120  ;;  %5869 = vmatprep.mubr.msk.f32.mxu1 %vm560_vm0, %v2143_v33 }
 0x4cb   : > { %5870 = vmatmul.mubr.msk.f32.gmra.mrb[50].mxu1 %vm560_vm0, %v2144_v47  ;;  %v2116_v38 = vpop.permute.xlu0 %2115  ;;  %v2146_v43 = vmul.f32 %v2121_v37, %v2018_v35 }
 0x4cc   : > { %v2145_v19 = vmul.f32 %v2116_v38, %v2017_v42 }
 0x4ce   : > { %v2131_v20 = vpop.permute.xlu1 %2130  ;;  %5872 = vmatprep.mubr.msk.f32.mxu1 %vm560_vm0, %v2145_v19 }
 0x4cf   : > { %5873 = vmatmul.mubr.msk.f32.gmra.mrb[52].mxu1 %vm560_vm0, %v2146_v43  ;;  %v2126_v45 = vpop.permute.xlu0 %2125  ;;  %v2148_v49 = vmul.f32 %v2131_v20, %v2020_v44 }
 0x4d0   : > { %v2147_v48 = vmul.f32 %v2126_v45, %v2019_v21 }
 0x4d2   : > { %5875 = vmatprep.mubr.msk.f32.mxu1 %vm560_vm0, %v2147_v48 }
 0x4d3   : > { %5876 = vmatmul.mubr.msk.f32.gmra.mrb[54].mxu1 %vm560_vm0, %v2148_v49 }
 0x57e   : > { %v5856_v51 = vpop.f32.mrb[40].mxu1 }
 0x57f   : > { %v2284_v63 = vadd.f32 %v5856_v51, %v7470_v50  ;;  %v2278_v53 = vpop.f32.mrb[41].mxu1 }
 0x580   : > { %v2279_v0 = vadd.f32 %v7470_v50, %v2278_v53 }
 0x581   : > { %v2358_v55 = vmax.f32 %v2284_v63, 0.0 }
 0x582   : > { %v2357_v54 = vmax.f32 %v2279_v0, 0.0  ;;  %v7515_v0 = vld [vmem:[%s8075_s8] ss:$0 sm:$0xff] }
 0x584   : > { %5894 = vmatprep.mubr.msk.f32.mxu0 %vm560_vm0, %v2357_v54 }
 0x585   : > { %5895 = vmatmul.mubr.msk.f32.vlgmr.msra.gmra.mrb[40].mxu0 %vm560_vm0, %v2358_v55 }
 0x586   : > { %v5859_v58 = vpop.f32.mrb[42].mxu1  ;;  %6327 = vmatpush3.bf16.msra.mxu0 %v6751_v1 }
 0x587   : > { %v2294_v8 = vadd.f32 %v5859_v58, %v7470_v50  ;;  %v2288_v61 = vpop.f32.mrb[43].mxu1  ;;  %6328 = vmatprep.subr.bf16.mxu0 %v6751_v1 }
 0x588   : > { %v2289_v9 = vadd.f32 %v7470_v50, %v2288_v61 }
 0x589   : > { %v2360_v26 = vmax.f32 %v2294_v8, 0.0 }
 0x58a   : > { %v2359_v62 = vmax.f32 %v2289_v9, 0.0  ;;  %6329 = vmatpush3.bf16.msra.mxu0 %v6751_v1 }
 0x58b   : > { %6330 = vmatprep.subr.bf16.mxu0 %v6751_v1 }
 0x58c   : > { %5897 = vmatprep.mubr.msk.f32.mxu0 %vm560_vm0, %v2359_v62 }
 0x58d   : > { %5898 = vmatmul.mubr.msk.f32.gmra.mrb[42].mxu0 %vm560_vm0, %v2360_v26 }
 0x58e   : > { %v5862_v3 = vpop.f32.mrb[44].mxu1  ;;  %6331 = vmatpush3.bf16.msra.mxu0 %v6751_v1 }
 0x58f   : > { %v2304_v29 = vadd.f32 %v5862_v3, %v7470_v50  ;;  %v2298_v5 = vpop.f32.mrb[45].mxu1  ;;  %6332 = vmatprep.subr.bf16.mxu0 %v6751_v1 }
 0x590   : > { %v2299_v23 = vadd.f32 %v7470_v50, %v2298_v5 }
 0x591   : > { %v2362_v10 = vmax.f32 %v2304_v29, 0.0 }
 0x592   : > { %v2361_v7 = vmax.f32 %v2299_v23, 0.0  ;;  %6333 = vmatpush3.bf16.msra.mxu0 %v6751_v1 }
 0x593   : > { %6350 = vmatprep.subr.bf16.mxu0 %v6751_v1 }
 0x594   : > { %5900 = vmatprep.mubr.msk.f32.mxu0 %vm560_vm0, %v2361_v7 }
 0x595   : > { %5901 = vmatmul.mubr.msk.f32.gmra.mrb[44].mxu0 %vm560_vm0, %v2362_v10 }
 0x596   : > { %v5865_v6 = vpop.f32.mrb[46].mxu1 }
 0x597   : > { %v2314_v34 = vadd.f32 %v5865_v6, %v7470_v50  ;;  %v2308_v14 = vpop.f32.mrb[47].mxu1 }
 0x598   : > { %v2309_v30 = vadd.f32 %v7470_v50, %v2308_v14 }
 0x599   : > { %v2364_v17 = vmax.f32 %v2314_v34, 0.0 }
 0x59a   : > { %v2363_v13 = vmax.f32 %v2309_v30, 0.0  ;;  %v5868_v15 = vpop.f32.mrb[48].mxu1 }
 0x59b   : > { %v2324_v40 = vadd.f32 %v5868_v15, %v7470_v50  ;;  %v2318_v31 = vpop.f32.mrb[49].mxu1 }
 0x59c   : > { %v2319_v36 = vadd.f32 %v7470_v50, %v2318_v31  ;;  %5903 = vmatprep.mubr.msk.f32.mxu0 %vm560_vm0, %v2363_v13 }
 0x59d   : > { %5904 = vmatmul.mubr.msk.f32.gmra.mrb[46].mxu0 %vm560_vm0, %v2364_v17  ;;  %v2366_v47 = vmax.f32 %v2324_v40, 0.0 }
 0x59e   : > { %v2365_v16 = vmax.f32 %v2319_v36, 0.0  ;;  %v5871_v33 = vpop.f32.mrb[50].mxu1 }
 0x59f   : > { %v2334_v42 = vadd.f32 %v5871_v33, %v7470_v50  ;;  %v2328_v37 = vpop.f32.mrb[51].mxu1 }
 0x5a0   : > { %v2329_v35 = vadd.f32 %v7470_v50, %v2328_v37  ;;  %5906 = vmatprep.mubr.msk.f32.mxu0 %vm560_vm0, %v2365_v16 }
 0x5a1   : > { %5907 = vmatmul.mubr.msk.f32.gmra.mrb[48].mxu0 %vm560_vm0, %v2366_v47  ;;  %v2368_v43 = vmax.f32 %v2334_v42, 0.0 }
 0x5a2   : > { %v2367_v38 = vmax.f32 %v2329_v35, 0.0  ;;  %v5874_v19 = vpop.f32.mrb[52].mxu1 }
 0x5a3   : > { %v2344_v21 = vadd.f32 %v5874_v19, %v7470_v50  ;;  %v2338_v20 = vpop.f32.mrb[53].mxu1 }
 0x5a4   : > { %v2339_v44 = vadd.f32 %v7470_v50, %v2338_v20  ;;  %5909 = vmatprep.mubr.msk.f32.mxu0 %vm560_vm0, %v2367_v38 }
 0x5a5   : > { %5910 = vmatmul.mubr.msk.f32.gmra.mrb[50].mxu0 %vm560_vm0, %v2368_v43  ;;  %v2370_v49 = vmax.f32 %v2344_v21, 0.0 }
 0x5a6   : > { %v2369_v45 = vmax.f32 %v2339_v44, 0.0  ;;  %v5877_v48 = vpop.f32.mrb[54].mxu1 }
 0x5a7   : > { %v2354_v22 = vadd.f32 %v5877_v48, %v7470_v50  ;;  %v2348_v57 = vpop.f32.mrb[55].mxu1 }
 0x5a8   : > { %v2349_v24 = vadd.f32 %v7470_v50, %v2348_v57  ;;  %5912 = vmatprep.mubr.msk.f32.mxu0 %vm560_vm0, %v2369_v45 }
 0x5a9   : > { %5913 = vmatmul.mubr.msk.f32.gmra.mrb[52].mxu0 %vm560_vm0, %v2370_v49  ;;  %v2372_v63 = vmax.f32 %v2354_v22, 0.0 }
 0x5aa   : > { %v2371_v51 = vmax.f32 %v2349_v24, 0.0 }
 0x5ac   : > { %5915 = vmatprep.mubr.msk.f32.mxu0 %vm560_vm0, %v2371_v51 }
 0x5ad   : > { %5916 = vmatmul.mubr.msk.f32.gmra.mrb[54].mxu0 %vm560_vm0, %v2372_v63 }
 0x658   : > { %v5896_v53 = vpop.f32.mrb[40].mxu0 }
 0x659   : > { %v2575_v54 = vadd.f32 %v5896_v53, %v7261_v39  ;;  %v2495_v55 = vpop.f32.mrb[41].mxu0 }
 0x65a   : > { %v2574_v50 = vadd.f32 %v2495_v55, %v7264_v41 }
 0x65b   : > { %v7520_v58 = vadd.f32 %v7515_v0, %v2575_v54 }
 0x65c   : > { %v7523_v8 = vadd.f32 %v7515_v0, %v2574_v50 }
 0x65d   : > { %v2807_v9 = vmul.f32 %v7520_v58, %v7520_v58 }
 0x65e   : > { %5934 = vmatprep.mubr.msk.f32.mxu1 %vm560_vm0, %v7523_v8  ;;  %v2806_v61 = vmul.f32 %v7523_v8, %v7523_v8 }
 0x65f   : > { %5935 = vmatmul.mubr.msk.f32.vlgmr.msra.gmra.mrb[56].mxu1 %vm560_vm0, %v7520_v58 }
 0x660   : > { %v5899_v39 = vpop.f32.mrb[42].mxu0  ;;  %5974 = vmatprep.mubr.msk.f32.mxu0 %vm560_vm0, %v2806_v61 }
 0x661   : > { %v2577_v41 = vadd.f32 %v5899_v39, %v7275_v46  ;;  %v2505_v62 = vpop.f32.mrb[43].mxu0  ;;  %5975 = vmatmul.mubr.msk.f32.vlgmr.msra.gmra.mrb[56].mxu0 %vm560_vm0, %v2807_v9 }
 0x662   : > { %v2576_v26 = vadd.f32 %v2505_v62, %v7280_v56  ;;  %6351 = vmatpush3.bf16.msra.mxu0 %v6751_v1 }
 0x663   : > { %v7539_v3 = vadd.f32 %v7515_v0, %v2577_v41  ;;  %6352 = vmatprep.subr.bf16.mxu0 %v6751_v1 }
 0x664   : > { %v7543_v29 = vadd.f32 %v7515_v0, %v2576_v26 }
 0x665   : > { %v2809_v56 = vmul.f32 %v7539_v3, %v7539_v3 }
 0x666   : > { %5937 = vmatprep.mubr.msk.f32.mxu1 %vm560_vm0, %v7543_v29  ;;  %v2808_v46 = vmul.f32 %v7543_v29, %v7543_v29  ;;  %6353 = vmatpush3.bf16.msra.mxu0 %v6751_v1 }
 0x667   : > { %5938 = vmatmul.mubr.msk.f32.gmra.mrb[58].mxu1 %vm560_vm0, %v7539_v3  ;;  %6354 = vmatprep.subr.bf16.mxu0 %v6751_v1 }
 0x668   : > { %v5902_v5 = vpop.f32.mrb[44].mxu0  ;;  %5977 = vmatprep.mubr.msk.f32.mxu0 %vm560_vm0, %v2808_v46 }
 0x669   : > { %v2579_v23 = vadd.f32 %v5902_v5, %v7291_v52  ;;  %v2515_v7 = vpop.f32.mrb[45].mxu0  ;;  %5978 = vmatmul.mubr.msk.f32.gmra.mrb[58].mxu0 %vm560_vm0, %v2809_v56 }
 0x66a   : > { %v2578_v10 = vadd.f32 %v2515_v7, %v7298_v25  ;;  %6355 = vmatpush3.bf16.msra.mxu0 %v6751_v1  ;;  %v5153_v7 = vld [vmem:[%s8070_s3 + $0x40] sm:$0xff] }
 0x66b   : > { %v7561_v6 = vadd.f32 %v7515_v0, %v2579_v23  ;;  %6356 = vmatprep.subr.bf16.mxu0 %v6751_v1 }
 0x66c   : > { %v7565_v34 = vadd.f32 %v7515_v0, %v2578_v10  ;;  %v5154_v10 = vld [vmem:[%s8070_s3 + $0x48] sm:$0xff] }
 0x66d   : > { %v2811_v25 = vmul.f32 %v7561_v6, %v7561_v6 }
 0x66e   : > { %5940 = vmatprep.mubr.msk.f32.mxu1 %vm560_vm0, %v7565_v34  ;;  %v2810_v52 = vmul.f32 %v7565_v34, %v7565_v34  ;;  %6357 = vmatpush3.bf16.msra.mxu0 %v6751_v1 }
 0x66f   : > { %5941 = vmatmul.mubr.msk.f32.gmra.mrb[60].mxu1 %vm560_vm0, %v7561_v6 }
 0x670   : > { %v5905_v14 = vpop.f32.mrb[46].mxu0  ;;  %5980 = vmatprep.mubr.msk.f32.mxu0 %vm560_vm0, %v2810_v52 }
 0x671   : > { %v2581_v30 = vadd.f32 %v5905_v14, %v7309_v59  ;;  %v2525_v13 = vpop.f32.mrb[47].mxu0  ;;  %5981 = vmatmul.mubr.msk.f32.gmra.mrb[60].mxu0 %vm560_vm0, %v2811_v25  ;;  %v6334_v14 = vpack.c.bf16 %v5154_v10, %v5153_v7 }
 0x672   : > { %v2580_v15 = vadd.f32 %v2525_v13, %v7316_v60 }
 0x673   : > { %v7581_v17 = vadd.f32 %v7515_v0, %v2581_v30  ;;  %6335 = vmatprep.subr.bf16.mxu1 %v6334_v14 }
 0x674   : > { %v7584_v40 = vadd.f32 %v7515_v0, %v2580_v15  ;;  %v5908_v31 = vpop.f32.mrb[48].mxu0  ;;  %6337 = vmatpush3.bf16.msra.mxu1 %v6334_v14 }
 0x675   : > { %v2583_v36 = vadd.f32 %v5908_v31, %v7327_v2  ;;  %v2535_v16 = vpop.f32.mrb[49].mxu0  ;;  %v2813_v47 = vmul.f32 %v7581_v17, %v7581_v17 }
 0x676   : > { %v2582_v33 = vadd.f32 %v2535_v16, %v7334_v4  ;;  %5943 = vmatprep.mubr.msk.f32.mxu1 %vm560_vm0, %v7584_v40  ;;  %v2812_v59 = vmul.f32 %v7584_v40, %v7584_v40 }
 0x677   : > { %v7593_v60 = vadd.f32 %v7515_v0, %v2583_v36  ;;  %5944 = vmatmul.mubr.msk.f32.gmra.mrb[62].mxu1 %vm560_vm0, %v7581_v17 }
 0x678   : > { %v7600_v2 = vadd.f32 %v7515_v0, %v2582_v33  ;;  %v5911_v42 = vpop.f32.mrb[50].mxu0  ;;  %5983 = vmatprep.mubr.msk.f32.mxu0 %vm560_vm0, %v2812_v59 }
 0x679   : > { %v2585_v4 = vadd.f32 %v5911_v42, %v7345_v27  ;;  %v2545_v37 = vpop.f32.mrb[51].mxu0  ;;  %5984 = vmatmul.mubr.msk.f32.gmra.mrb[62].mxu0 %vm560_vm0, %v2813_v47  ;;  %v2815_v27 = vmul.f32 %v7593_v60, %v7593_v60  ;;  %v5155_v42 = vld [vmem:[%s8070_s3 + $0x50] sm:$0xff] }
 0x67a   : > { %v2584_v35 = vadd.f32 %v2545_v37, %v7352_v11  ;;  %5946 = vmatprep.mubr.msk.f32.mxu1 %vm560_vm0, %v7600_v2  ;;  %v2814_v38 = vmul.f32 %v7600_v2, %v7600_v2 }
 0x67b   : > { %v7611_v19 = vadd.f32 %v7515_v0, %v2585_v4  ;;  %5947 = vmatmul.mubr.msk.f32.gmra.mrb[64].mxu1 %vm560_vm0, %v7593_v60  ;;  %v5156_v4 = vld [vmem:[%s8070_s3 + $0x58] sm:$0xff] }
 0x67c   : > { %v7618_v43 = vadd.f32 %v7515_v0, %v2584_v35  ;;  %v5914_v21 = vpop.f32.mrb[52].mxu0  ;;  %5986 = vmatprep.mubr.msk.f32.mxu0 %vm560_vm0, %v2814_v38 }
 0x67d   : > { %v2587_v11 = vadd.f32 %v5914_v21, %v7363_v18  ;;  %v2555_v20 = vpop.f32.mrb[53].mxu0  ;;  %5987 = vmatmul.mubr.msk.f32.gmra.mrb[64].mxu0 %vm560_vm0, %v2815_v27  ;;  %v2817_v18 = vmul.f32 %v7611_v19, %v7611_v19  ;;  %v6338_v27 = vpack.c.bf16 %v5156_v4, %v5155_v42 }
 0x67e   : > { %v2586_v44 = vadd.f32 %v2555_v20, %v7370_v12  ;;  %5949 = vmatprep.mubr.msk.f32.mxu1 %vm560_vm0, %v7618_v43  ;;  %v2816_v45 = vmul.f32 %v7618_v43, %v7618_v43 }
 0x67f   : > { %v7629_v48 = vadd.f32 %v7515_v0, %v2587_v11  ;;  %5950 = vmatmul.mubr.msk.f32.gmra.mrb[66].mxu1 %vm560_vm0, %v7611_v19  ;;  %6339 = vmatprep.subr.bf16.mxu1 %v6338_v27 }
 0x680   : > { %v7636_v49 = vadd.f32 %v7515_v0, %v2586_v44  ;;  %v5917_v22 = vpop.f32.mrb[54].mxu0  ;;  %5989 = vmatprep.mubr.msk.f32.mxu0 %vm560_vm0, %v2816_v45  ;;  %6341 = vmatpush3.bf16.msra.mxu1 %v6338_v27 }
 0x681   : > { %v2589_v12 = vadd.f32 %v5917_v22, %v7381_v32  ;;  %v2565_v57 = vpop.f32.mrb[55].mxu0  ;;  %5990 = vmatmul.mubr.msk.f32.gmra.mrb[66].mxu0 %vm560_vm0, %v2817_v18  ;;  %v2819_v32 = vmul.f32 %v7629_v48, %v7629_v48 }
 0x682   : > { %v2588_v24 = vadd.f32 %v2565_v57, %v7388_v28  ;;  %5952 = vmatprep.mubr.msk.f32.mxu1 %vm560_vm0, %v7636_v49  ;;  %v2818_v51 = vmul.f32 %v7636_v49, %v7636_v49 }
 0x683   : > { %v7647_v63 = vadd.f32 %v7515_v0, %v2589_v12  ;;  %5953 = vmatmul.mubr.msk.f32.gmra.mrb[68].mxu1 %vm560_vm0, %v7629_v48 }
 0x684   : > { %v7654_v53 = vadd.f32 %v7515_v0, %v2588_v24  ;;  %5992 = vmatprep.mubr.msk.f32.mxu0 %vm560_vm0, %v2818_v51 }
 0x685   : > { %5993 = vmatmul.mubr.msk.f32.gmra.mrb[68].mxu0 %vm560_vm0, %v2819_v32  ;;  %v2821_v54 = vmul.f32 %v7647_v63, %v7647_v63 }
 0x686   : > { %5955 = vmatprep.mubr.msk.f32.mxu1 %vm560_vm0, %v7654_v53  ;;  %v2820_v28 = vmul.f32 %v7654_v53, %v7654_v53 }
 0x687   : > { %5956 = vmatmul.mubr.msk.f32.gmra.mrb[70].mxu1 %vm560_vm0, %v7647_v63 }
 0x688   : > { %5995 = vmatprep.mubr.msk.f32.mxu0 %vm560_vm0, %v2820_v28  ;;  %v5157_v28 = vld [vmem:[%s8070_s3 + $0x60] sm:$0xff] }
 0x689   : > { %5996 = vmatmul.mubr.msk.f32.gmra.mrb[70].mxu0 %vm560_vm0, %v2821_v54  ;;  %v5158_v54 = vld [vmem:[%s8070_s3 + $0x68] sm:$0xff] }
 0x732   : > { %v5936_v0 = vpop.f32.mrb[56].mxu1 }
 0x733   : > { %v3016_v55 = vmul.f32 %v5936_v0, %v5936_v0  ;;  %3070 = vperm.xlu1 %6489, %v5936_v0   ;;  %v2727_v50 = vpop.f32.mrb[57].mxu1 }
 0x734   : > { %v3015_v61 = vmul.f32 %v2727_v50, %v2727_v50  ;;  %3065 = vperm.xlu0 %6488, %v2727_v50   ;;  %v5976_v9 = vpop.f32.mrb[56].mxu0  ;;  %v6342_v50 = vpack.c.bf16 %v5158_v54, %v5157_v28 }
 0x735   : > { %v3032_v39 = vsub.f32 %v5976_v9, %v3016_v55  ;;  %v2936_v41 = vpop.f32.mrb[57].mxu0 }
 0x736   : > { %v3031_v62 = vsub.f32 %v2936_v41, %v3015_v61  ;;  %6343 = vmatprep.subr.bf16.mxu1 %v6342_v50 }
 0x737   : > { %v3048_v13 = vmax.f32 %v3032_v39, 0.0  ;;  %6345 = vmatpush3.bf16.msra.mxu1 %v6342_v50 }
 0x738   : > { %v3047_v15 = vmax.f32 %v3031_v62, 0.0 }
 0x739   : > { %v3160_v33 = vadd.f32 1e-05, %v3048_v13 }
 0x73a   : > { %v5939_v26 = vpop.f32.mrb[58].mxu1  ;;  %v3159_v37 = vadd.f32 1e-05, %v3047_v15 }
 0x73b   : > { %v3018_v46 = vmul.f32 %v5939_v26, %v5939_v26  ;;  %3080 = vperm.xlu1 %6489, %v5939_v26   ;;  %v2737_v56 = vpop.f32.mrb[59].mxu1  ;;  %6554 = vrsqrt.f32 %v3160_v33 }
 0x73c   : > { %v3017_v5 = vmul.f32 %v2737_v56, %v2737_v56  ;;  %3075 = vperm.xlu0 %6488, %v2737_v56   ;;  %v5979_v23 = vpop.f32.mrb[58].mxu0  ;;  %6556 = vrsqrt.f32 %v3159_v37 }
 0x73d   : > { %v3034_v52 = vsub.f32 %v5979_v23, %v3018_v46  ;;  %v2946_v25 = vpop.f32.mrb[59].mxu0  ;;  %v5160_v23 = vld [vmem:[%s8070_s3 + $0x78] sm:$0xff] }
 0x73e   : > { %v3033_v30 = vsub.f32 %v2946_v25, %v3017_v5  ;;  %v5159_v5 = vld [vmem:[%s8070_s3 + $0x70] sm:$0xff] }
 0x73f   : > { %v3050_v11 = vmax.f32 %v3034_v52, 0.0  ;;  %v6346_v25 = vpack.c.bf16 %v5160_v23, %v5159_v5 }
 0x740   : > { %v3049_v20 = vmax.f32 %v3033_v30, 0.0 }
 0x741   : > { %v3162_v22 = vadd.f32 1e-05, %v3050_v11  ;;  %6347 = vmatprep.subr.bf16.mxu1 %v6346_v25 }
 0x742   : > { %v5942_v31 = vpop.f32.mrb[60].mxu1  ;;  %v3161_v24 = vadd.f32 1e-05, %v3049_v20  ;;  %6349 = vmatpush3.bf16.msra.mxu1 %v6346_v25 }
 0x743   : > { %v3020_v36 = vmul.f32 %v5942_v31, %v5942_v31  ;;  %3090 = vperm.xlu1 %6489, %v5942_v31   ;;  %v2747_v16 = vpop.f32.mrb[61].mxu1  ;;  %6558 = vrsqrt.f32 %v3162_v22  ;;  %6358 = vmatprep.subr.bf16.mxu1 %v6751_v1 }
 0x744   : > { %v3019_v59 = vmul.f32 %v2747_v16, %v2747_v16  ;;  %3085 = vperm.xlu0 %6488, %v2747_v16   ;;  %v5982_v47 = vpop.f32.mrb[60].mxu0  ;;  %6560 = vrsqrt.f32 %v3161_v24 }
 0x745   : > { %v3036_v35 = vsub.f32 %v5982_v47, %v3020_v36  ;;  %v2956_v38 = vpop.f32.mrb[61].mxu0  ;;  %v6555_v7 = vpop.eup %6554 }
 0x746   : > { %v3035_v21 = vsub.f32 %v2956_v38, %v3019_v59  ;;  %v6557_v14 = vpop.eup %6556 }
 0x747   : > { %v3052_v39 = vmax.f32 %v3036_v35, 0.0 }
 0x748   : > { %v3051_v26 = vmax.f32 %v3035_v21, 0.0 }
 0x749   : > { %v3164_v15 = vadd.f32 1e-05, %v3052_v39 }
 0x74a   : > { %v5945_v44 = vpop.f32.mrb[62].mxu1  ;;  %v3163_v16 = vadd.f32 1e-05, %v3051_v26 }
 0x74b   : > { %v3022_v45 = vmul.f32 %v5945_v44, %v5945_v44  ;;  %3100 = vperm.xlu1 %6489, %v5945_v44   ;;  %v2757_v18 = vpop.f32.mrb[63].mxu1  ;;  %6562 = vrsqrt.f32 %v3164_v15 }
 0x74c   : > { %v3021_v12 = vmul.f32 %v2757_v18, %v2757_v18  ;;  %3095 = vperm.xlu0 %6488, %v2757_v18   ;;  %v5985_v57 = vpop.f32.mrb[62].mxu0  ;;  %6564 = vrsqrt.f32 %v3163_v16 }
 0x74d   : > { %v3038_v51 = vsub.f32 %v5985_v57, %v3022_v45  ;;  %v2966_v32 = vpop.f32.mrb[63].mxu0  ;;  %v6559_v44 = vpop.eup %6558 }
 0x74e   : > { %v3037_v0 = vsub.f32 %v2966_v32, %v3021_v12  ;;  %v5948_v55 = vpop.f32.mrb[64].mxu1  ;;  %v6561_v22 = vpop.eup %6560 }
 0x74f   : > { %v3024_v61 = vmul.f32 %v5948_v55, %v5948_v55  ;;  %3110 = vperm.xlu1 %6489, %v5948_v55   ;;  %v2767_v9 = vpop.f32.mrb[65].mxu1  ;;  %v3054_v35 = vmax.f32 %v3038_v51, 0.0 }
 0x750   : > { %v3023_v41 = vmul.f32 %v2767_v9, %v2767_v9  ;;  %3105 = vperm.xlu0 %6488, %v2767_v9   ;;  %v5988_v62 = vpop.f32.mrb[64].mxu0  ;;  %v3053_v21 = vmax.f32 %v3037_v0, 0.0 }
 0x751   : > { %v3040_v46 = vsub.f32 %v5988_v62, %v3024_v61  ;;  %v2976_v56 = vpop.f32.mrb[65].mxu0  ;;  %v3166_v24 = vadd.f32 1e-05, %v3054_v35 }
 0x752   : > { %v3039_v10 = vsub.f32 %v2976_v56, %v3023_v41  ;;  %v5951_v52 = vpop.f32.mrb[66].mxu1  ;;  %v3165_v51 = vadd.f32 1e-05, %v3053_v21 }
 0x753   : > { %v3026_v30 = vmul.f32 %v5951_v52, %v5951_v52  ;;  %v2777_v13 = vpop.f32.mrb[67].mxu1  ;;  %3198 = vperm.xlu1 %6489, %v6555_v7   ;;  %v3056_v32 = vmax.f32 %v3040_v46, 0.0  ;;  %6566 = vrsqrt.f32 %v3166_v24 }
 0x754   : > { %v3025_v31 = vmul.f32 %v2777_v13, %v2777_v13  ;;  %3193 = vperm.xlu0 %6488, %v6557_v14   ;;  %v5991_v36 = vpop.f32.mrb[66].mxu0  ;;  %v3055_v55 = vmax.f32 %v3039_v10, 0.0  ;;  %6568 = vrsqrt.f32 %v3165_v51 }
 0x755   : > { %v3042_v33 = vsub.f32 %v5991_v36, %v3026_v30  ;;  %v2986_v59 = vpop.f32.mrb[67].mxu0  ;;  %v3168_v0 = vadd.f32 1e-05, %v3056_v32  ;;  %v6563_v26 = vpop.eup %6562 }
 0x756   : > { %v3041_v47 = vsub.f32 %v2986_v59, %v3025_v31  ;;  %v5954_v42 = vpop.f32.mrb[68].mxu1  ;;  %v3167_v41 = vadd.f32 1e-05, %v3055_v55  ;;  %v6565_v56 = vpop.eup %6564 }
 0x757   : > { %v3028_v4 = vmul.f32 %v5954_v42, %v5954_v42  ;;  %v2787_v37 = vpop.f32.mrb[69].mxu1  ;;  %3120 = vperm.xlu1 %6489, %v5951_v52   ;;  %v3058_v39 = vmax.f32 %v3042_v33, 0.0  ;;  %6570 = vrsqrt.f32 %v3168_v0 }
 0x758   : > { %v3027_v38 = vmul.f32 %v2787_v37, %v2787_v37  ;;  %3115 = vperm.xlu0 %6488, %v2777_v13   ;;  %v5994_v27 = vpop.f32.mrb[68].mxu0  ;;  %v3057_v62 = vmax.f32 %v3041_v47, 0.0  ;;  %6572 = vrsqrt.f32 %v3167_v41 }
 0x759   : > { %v3044_v11 = vsub.f32 %v5994_v27, %v3028_v4  ;;  %v2996_v20 = vpop.f32.mrb[69].mxu0  ;;  %v3170_v46 = vadd.f32 1e-05, %v3058_v39 }
 0x75a   : > { %v3043_v45 = vsub.f32 %v2996_v20, %v3027_v38  ;;  %v5957_v18 = vpop.f32.mrb[70].mxu1  ;;  %v3169_v23 = vadd.f32 1e-05, %v3057_v62 }
 0x75b   : > { %v3030_v12 = vmul.f32 %v5957_v18, %v5957_v18  ;;  %3208 = vperm.xlu1 %6489, %v6559_v44   ;;  %v2797_v57 = vpop.f32.mrb[71].mxu1  ;;  %v3060_v5 = vmax.f32 %v3044_v11, 0.0  ;;  %6574 = vrsqrt.f32 %v3170_v46 }
 0x75c   : > { %v3029_v28 = vmul.f32 %v2797_v57, %v2797_v57  ;;  %3203 = vperm.xlu0 %6488, %v6561_v22   ;;  %v5997_v54 = vpop.f32.mrb[70].mxu0  ;;  %v3059_v7 = vmax.f32 %v3043_v45, 0.0  ;;  %6576 = vrsqrt.f32 %v3169_v23 }
 0x75d   : > { %v3046_v50 = vsub.f32 %v5997_v54, %v3030_v12  ;;  %v3006_v61 = vpop.f32.mrb[71].mxu0  ;;  %v3172_v10 = vadd.f32 1e-05, %v3060_v5  ;;  %v6567_v30 = vpop.eup %6566 }
 0x75e   : > { %v3045_v9 = vsub.f32 %v3006_v61, %v3029_v28  ;;  %v3171_v25 = vadd.f32 1e-05, %v3059_v7  ;;  %v6569_v13 = vpop.eup %6568 }
 0x75f   : > { %3130 = vperm.xlu1 %6489, %v5954_v42   ;;  %v3062_v52 = vmax.f32 %v3046_v50, 0.0  ;;  %6578 = vrsqrt.f32 %v3172_v10 }
 0x760   : > { %3125 = vperm.xlu0 %6488, %v2787_v37   ;;  %v3061_v14 = vmax.f32 %v3045_v9, 0.0  ;;  %6580 = vrsqrt.f32 %v3171_v25 }
 0x761   : > { %v3174_v15 = vadd.f32 1e-05, %v3062_v52  ;;  %v6571_v36 = vpop.eup %6570 }
 0x762   : > { %v3173_v31 = vadd.f32 1e-05, %v3061_v14  ;;  %v6573_v16 = vpop.eup %6572 }
 0x763   : > { %3218 = vperm.xlu1 %6489, %v6563_v26   ;;  %6582 = vrsqrt.f32 %v3174_v15 }
 0x764   : > { %3213 = vperm.xlu0 %6488, %v6565_v56   ;;  %6584 = vrsqrt.f32 %v3173_v31 }
 0x765   : > { %v6575_v33 = vpop.eup %6574 }
 0x766   : > { %v6577_v59 = vpop.eup %6576 }
 0x767   : > { %3140 = vperm.xlu1 %6489, %v5957_v18  }
 0x768   : > { %3135 = vperm.xlu0 %6488, %v2797_v57  }
 0x769   : > { %v6579_v47 = vpop.eup %6578 }
 0x76a   : > { %v6581_v42 = vpop.eup %6580 }
 0x76b   : > { %3228 = vperm.xlu1 %6489, %v6567_v30  }
 0x76c   : > { %3223 = vperm.xlu0 %6488, %v6569_v13  }
 0x76d   : > { %v6583_v4 = vpop.eup %6582 }
 0x76e   : > { %v6585_v37 = vpop.eup %6584 }
 0x76f   : > { %3238 = vperm.xlu1 %6489, %v6571_v36  }
 0x770   : > { %3233 = vperm.xlu0 %6488, %v6573_v16  }
 0x773   : > { %3248 = vperm.xlu1 %6489, %v6575_v33  }
 0x774   : > { %3243 = vperm.xlu0 %6488, %v6577_v59  }
 0x777   : > { %3258 = vperm.xlu1 %6489, %v6579_v47  }
 0x778   : > { %3253 = vperm.xlu0 %6488, %v6581_v42  }
 0x77b   : > { %3268 = vperm.xlu1 %6489, %v6583_v4  }
 0x77c   : > { %3263 = vperm.xlu0 %6488, %v6585_v37  }
 0x7b2   : > { %v3071_v35 = vpop.permute.xlu1 %3070 }
 0x7b3   : > { %v3066_v38 = vpop.permute.xlu0 %3065  ;;  %v3144_v24 = vsub.f32 %v7520_v58, %v3071_v35 }
 0x7b4   : > { %v3143_v12 = vsub.f32 %v7523_v8, %v3066_v38 }
 0x7ba   : > { %v3081_v27 = vpop.permute.xlu1 %3080 }
 0x7bb   : > { %v3076_v21 = vpop.permute.xlu0 %3075  ;;  %v3146_v9 = vsub.f32 %v7539_v3, %v3081_v27 }
 0x7bc   : > { %v3145_v50 = vsub.f32 %v7543_v29, %v3076_v21 }
 0x7c2   : > { %v3091_v11 = vpop.permute.xlu1 %3090 }
 0x7c3   : > { %v3086_v20 = vpop.permute.xlu0 %3085  ;;  %v3148_v5 = vsub.f32 %v7561_v6, %v3091_v11 }
 0x7c4   : > { %v3147_v56 = vsub.f32 %v7565_v34, %v3086_v20 }
 0x7ca   : > { %v3101_v44 = vpop.permute.xlu1 %3100 }
 0x7cb   : > { %v3096_v45 = vpop.permute.xlu0 %3095  ;;  %v3150_v13 = vsub.f32 %v7581_v17, %v3101_v44 }
 0x7cc   : > { %v3149_v14 = vsub.f32 %v7584_v40, %v3096_v45 }
 0x7ce   : > { %v3111_v18 = vpop.permute.xlu1 %3110 }
 0x7cf   : > { %v3106_v22 = vpop.permute.xlu0 %3105 }
 0x7d0   : > { %v3151_v16 = vsub.f32 %v7600_v2, %v3106_v22 }
 0x7d2   : > { %v3199_v57 = vpop.permute.xlu1 %3198 }
 0x7d3   : > { %v3194_v32 = vpop.permute.xlu0 %3193  ;;  %v3272_v54 = vmul.f32 %v3199_v57, %v3144_v24 }
 0x7d4   : > { %v3271_v28 = vmul.f32 %v3194_v32, %v3143_v12 }
 0x7d6   : > { %v3121_v51 = vpop.permute.xlu1 %3120  ;;  %6014 = vmatprep.mubr.msk.f32.mxu1 %vm560_vm0, %v3271_v28 }
 0x7d7   : > { %v3116_v55 = vpop.permute.xlu0 %3115  ;;  %6015 = vmatmul.mubr.msk.f32.vlgmr.msra.gmra.mrb[72].mxu1 %vm560_vm0, %v3272_v54  ;;  %v3154_v35 = vsub.f32 %v7611_v19, %v3121_v51 }
 0x7d8   : > { %6359 = vmatpush3.bf16.msra.mxu1 %v6751_v1  ;;  %v3153_v4 = vsub.f32 %v7618_v43, %v3116_v55  ;;  %v7735_v55 = vld [vmem:[%s8071_s4 + $0x1] ss:$0 sm:$0xff] }
 0x7d9   : > { %6360 = vmatprep.subr.bf16.mxu1 %v6751_v1 }
 0x7da   : > { %v3209_v61 = vpop.permute.xlu1 %3208 }
 0x7db   : > { %v3204_v0 = vpop.permute.xlu0 %3203  ;;  %v3274_v41 = vmul.f32 %v3209_v61, %v3146_v9 }
 0x7dc   : > { %v3273_v39 = vmul.f32 %v3204_v0, %v3145_v50  ;;  %6361 = vmatpush3.bf16.msra.mxu1 %v6751_v1 }
 0x7dd   : > { %6362 = vmatprep.subr.bf16.mxu1 %v6751_v1 }
 0x7de   : > { %v3131_v62 = vpop.permute.xlu1 %3130  ;;  %6017 = vmatprep.mubr.msk.f32.mxu1 %vm560_vm0, %v3273_v39 }
 0x7df   : > { %v3126_v26 = vpop.permute.xlu0 %3125  ;;  %6018 = vmatmul.mubr.msk.f32.gmra.mrb[74].mxu1 %vm560_vm0, %v3274_v41  ;;  %v3156_v44 = vsub.f32 %v7629_v48, %v3131_v62 }
 0x7e0   : > { %6363 = vmatpush3.bf16.msra.mxu1 %v6751_v1  ;;  %v3155_v11 = vsub.f32 %v7636_v49, %v3126_v26 }
 0x7e1   : > { %6364 = vmatprep.subr.bf16.mxu1 %v6751_v1 }
 0x7e2   : > { %v3219_v46 = vpop.permute.xlu1 %3218 }
 0x7e3   : > { %v3214_v23 = vpop.permute.xlu0 %3213  ;;  %v3276_v10 = vmul.f32 %v3219_v46, %v3148_v5 }
 0x7e4   : > { %v3275_v7 = vmul.f32 %v3214_v23, %v3147_v56  ;;  %6365 = vmatpush3.bf16.msra.mxu1 %v6751_v1  ;;  %v3152_v1 = vsub.f32 %v7593_v60, %v3111_v18 }
 0x7e6   : > { %6020 = vmatprep.mubr.msk.f32.mxu1 %vm560_vm0, %v3275_v7  ;;  %v3141_v52 = vpop.permute.xlu1 %3140 }
 0x7e7   : > { %6021 = vmatmul.mubr.msk.f32.gmra.mrb[76].mxu1 %vm560_vm0, %v3276_v10  ;;  %v3136_v25 = vpop.permute.xlu0 %3135  ;;  %v3158_v24 = vsub.f32 %v7647_v63, %v3141_v52 }
 0x7e8   : > { %v3157_v12 = vsub.f32 %v7654_v53, %v3136_v25 }
 0x7ea   : > { %v3229_v30 = vpop.permute.xlu1 %3228 }
 0x7eb   : > { %v3224_v15 = vpop.permute.xlu0 %3223  ;;  %v3278_v36 = vmul.f32 %v3229_v30, %v3150_v13 }
 0x7ec   : > { %v3277_v31 = vmul.f32 %v3224_v15, %v3149_v14 }
 0x7ee   : > { %v3239_v33 = vpop.permute.xlu1 %3238  ;;  %6023 = vmatprep.mubr.msk.f32.mxu1 %vm560_vm0, %v3277_v31 }
 0x7ef   : > { %6024 = vmatmul.mubr.msk.f32.gmra.mrb[78].mxu1 %vm560_vm0, %v3278_v36  ;;  %v3234_v59 = vpop.permute.xlu0 %3233  ;;  %v3280_v42 = vmul.f32 %v3239_v33, %v3152_v1 }
 0x7f0   : > { %v3279_v47 = vmul.f32 %v3234_v59, %v3151_v16 }
 0x7f2   : > { %v3249_v37 = vpop.permute.xlu1 %3248  ;;  %6026 = vmatprep.mubr.msk.f32.mxu1 %vm560_vm0, %v3279_v47 }
 0x7f3   : > { %6027 = vmatmul.mubr.msk.f32.gmra.mrb[80].mxu1 %vm560_vm0, %v3280_v42  ;;  %v3244_v38 = vpop.permute.xlu0 %3243  ;;  %v3282_v21 = vmul.f32 %v3249_v37, %v3154_v35 }
 0x7f4   : > { %v3281_v27 = vmul.f32 %v3244_v38, %v3153_v4 }
 0x7f6   : > { %v3259_v20 = vpop.permute.xlu1 %3258  ;;  %6029 = vmatprep.mubr.msk.f32.mxu1 %vm560_vm0, %v3281_v27 }
 0x7f7   : > { %6030 = vmatmul.mubr.msk.f32.gmra.mrb[82].mxu1 %vm560_vm0, %v3282_v21  ;;  %v3254_v45 = vpop.permute.xlu0 %3253  ;;  %v3284_v22 = vmul.f32 %v3259_v20, %v3156_v44 }
 0x7f8   : > { %v3283_v18 = vmul.f32 %v3254_v45, %v3155_v11 }
 0x7fa   : > { %v3269_v57 = vpop.permute.xlu1 %3268  ;;  %6032 = vmatprep.mubr.msk.f32.mxu1 %vm560_vm0, %v3283_v18 }
 0x7fb   : > { %6033 = vmatmul.mubr.msk.f32.gmra.mrb[84].mxu1 %vm560_vm0, %v3284_v22  ;;  %v3264_v32 = vpop.permute.xlu0 %3263  ;;  %v3286_v54 = vmul.f32 %v3269_v57, %v3158_v24 }
 0x7fc   : > { %v3285_v28 = vmul.f32 %v3264_v32, %v3157_v12 }
 0x7fe   : > { %6035 = vmatprep.mubr.msk.f32.mxu1 %vm560_vm0, %v3285_v28 }
 0x7ff   : > { %6036 = vmatmul.mubr.msk.f32.gmra.mrb[86].mxu1 %vm560_vm0, %v3286_v54 }
 0x8aa   : > { %v6016_v51 = vpop.f32.mrb[72].mxu1 }
 0x8ab   : > { %v3490_v50 = vadd.f32 %v6016_v51, %v7520_v58  ;;  %v3410_v61 = vpop.f32.mrb[73].mxu1 }
 0x8ac   : > { %v3489_v9 = vadd.f32 %v3410_v61, %v7523_v8 }
 0x8ad   : > { %v7740_v0 = vadd.f32 %v7735_v55, %v3490_v50 }
 0x8ae   : > { %v7743_v39 = vadd.f32 %v7735_v55, %v3489_v9 }
 0x8af   : > { %v3723_v62 = vmul.f32 %v7740_v0, %v7740_v0 }
 0x8b0   : > { %6054 = vmatprep.mubr.msk.f32.mxu0 %vm560_vm0, %v7743_v39  ;;  %v3722_v41 = vmul.f32 %v7743_v39, %v7743_v39 }
 0x8b1   : > { %6055 = vmatmul.mubr.msk.f32.vlgmr.msra.gmra.mrb[72].mxu0 %vm560_vm0, %v7740_v0 }
 0x8b2   : > { %v6019_v58 = vpop.f32.mrb[74].mxu1  ;;  %6094 = vmatprep.mubr.msk.f32.mxu1 %vm560_vm0, %v3722_v41 }
 0x8b3   : > { %v3492_v8 = vadd.f32 %v6019_v58, %v7539_v3  ;;  %v3420_v26 = vpop.f32.mrb[75].mxu1  ;;  %6095 = vmatmul.mubr.msk.f32.vlgmr.msra.gmra.mrb[88].mxu1 %vm560_vm0, %v3723_v62 }
 0x8b4   : > { %v3491_v56 = vadd.f32 %v3420_v26, %v7543_v29 }
 0x8b5   : > { %v7758_v46 = vadd.f32 %v7735_v55, %v3492_v8 }
 0x8b6   : > { %v7761_v5 = vadd.f32 %v7735_v55, %v3491_v56 }
 0x8b7   : > { %v3725_v3 = vmul.f32 %v7758_v46, %v7758_v46 }
 0x8b8   : > { %6057 = vmatprep.mubr.msk.f32.mxu0 %vm560_vm0, %v7761_v5  ;;  %v3724_v23 = vmul.f32 %v7761_v5, %v7761_v5 }
 0x8b9   : > { %6058 = vmatmul.mubr.msk.f32.gmra.mrb[74].mxu0 %vm560_vm0, %v7758_v46 }
 0x8ba   : > { %v6022_v7 = vpop.f32.mrb[76].mxu1  ;;  %6097 = vmatprep.mubr.msk.f32.mxu1 %vm560_vm0, %v3724_v23 }
 0x8bb   : > { %v3494_v29 = vadd.f32 %v6022_v7, %v7561_v6  ;;  %v3430_v10 = vpop.f32.mrb[77].mxu1  ;;  %6098 = vmatmul.mubr.msk.f32.gmra.mrb[90].mxu1 %vm560_vm0, %v3725_v3 }
 0x8bc   : > { %v3493_v52 = vadd.f32 %v3430_v10, %v7565_v34  ;;  %v5212_v10 = vld [vmem:[%s8072_s5 + $0x48] sm:$0xff] }
 0x8bd   : > { %v7776_v25 = vadd.f32 %v7735_v55, %v3494_v29  ;;  %v5211_v29 = vld [vmem:[%s8072_s5 + $0x40] sm:$0xff] }
 0x8be   : > { %v7779_v14 = vadd.f32 %v7735_v55, %v3493_v52 }
 0x8bf   : > { %v3727_v6 = vmul.f32 %v7776_v25, %v7776_v25 }
 0x8c0   : > { %6060 = vmatprep.mubr.msk.f32.mxu0 %vm560_vm0, %v7779_v14  ;;  %v3726_v30 = vmul.f32 %v7779_v14, %v7779_v14 }
 0x8c1   : > { %6061 = vmatmul.mubr.msk.f32.gmra.mrb[76].mxu0 %vm560_vm0, %v7776_v25 }
 0x8c2   : > { %v6025_v13 = vpop.f32.mrb[78].mxu1  ;;  %6100 = vmatprep.mubr.msk.f32.mxu1 %vm560_vm0, %v3726_v30 }
 0x8c3   : > { %v3496_v34 = vadd.f32 %v6025_v13, %v7581_v17  ;;  %v3440_v15 = vpop.f32.mrb[79].mxu1  ;;  %6101 = vmatmul.mubr.msk.f32.gmra.mrb[92].mxu1 %vm560_vm0, %v3727_v6  ;;  %v6366_v6 = vpack.c.bf16 %v5212_v10, %v5211_v29 }
 0x8c4   : > { %v3495_v31 = vadd.f32 %v3440_v15, %v7584_v40 }
 0x8c5   : > { %v7794_v36 = vadd.f32 %v7735_v55, %v3496_v34  ;;  %6367 = vmatprep.subr.bf16.mxu0 %v6366_v6 }
 0x8c6   : > { %v7797_v16 = vadd.f32 %v7735_v55, %v3495_v31  ;;  %v6028_v33 = vpop.f32.mrb[80].mxu1  ;;  %6369 = vmatpush3.bf16.msra.mxu0 %v6366_v6 }
 0x8c7   : > { %v3498_v1 = vadd.f32 %v6028_v33, %v7593_v60  ;;  %v3450_v59 = vpop.f32.mrb[81].mxu1  ;;  %v3729_v42 = vmul.f32 %v7794_v36, %v7794_v36 }
 0x8c8   : > { %v3497_v47 = vadd.f32 %v3450_v59, %v7600_v2  ;;  %6063 = vmatprep.mubr.msk.f32.mxu0 %vm560_vm0, %v7797_v16  ;;  %v3728_v17 = vmul.f32 %v7797_v16, %v7797_v16 }
 0x8c9   : > { %v7806_v40 = vadd.f32 %v7735_v55, %v3498_v1  ;;  %6064 = vmatmul.mubr.msk.f32.gmra.mrb[78].mxu0 %vm560_vm0, %v7794_v36 }
 0x8ca   : > { %v7813_v60 = vadd.f32 %v7735_v55, %v3497_v47  ;;  %v6031_v4 = vpop.f32.mrb[82].mxu1  ;;  %6103 = vmatprep.mubr.msk.f32.mxu1 %vm560_vm0, %v3728_v17 }
 0x8cb   : > { %v3500_v2 = vadd.f32 %v6031_v4, %v7611_v19  ;;  %v3460_v37 = vpop.f32.mrb[83].mxu1  ;;  %6104 = vmatmul.mubr.msk.f32.gmra.mrb[94].mxu1 %vm560_vm0, %v3729_v42  ;;  %v3731_v19 = vmul.f32 %v7806_v40, %v7806_v40  ;;  %v5213_v42 = vld [vmem:[%s8072_s5 + $0x50] sm:$0xff]  ;;  %v5214_v4 = vld [vmem:[%s8072_s5 + $0x58] sm:$0xff] }
 0x8cc   : > { %v3499_v35 = vadd.f32 %v3460_v37, %v7618_v43  ;;  %6066 = vmatprep.mubr.msk.f32.mxu0 %vm560_vm0, %v7813_v60  ;;  %v3730_v38 = vmul.f32 %v7813_v60, %v7813_v60 }
 0x8cd   : > { %v7824_v27 = vadd.f32 %v7735_v55, %v3500_v2  ;;  %6067 = vmatmul.mubr.msk.f32.gmra.mrb[80].mxu0 %vm560_vm0, %v7806_v40 }
 0x8ce   : > { %v7831_v21 = vadd.f32 %v7735_v55, %v3499_v35  ;;  %v6034_v11 = vpop.f32.mrb[84].mxu1  ;;  %6106 = vmatprep.mubr.msk.f32.mxu1 %vm560_vm0, %v3730_v38  ;;  %v6370_v38 = vpack.c.bf16 %v5214_v4, %v5213_v42 }
 0x8cf   : > { %v3502_v43 = vadd.f32 %v6034_v11, %v7629_v48  ;;  %v3470_v20 = vpop.f32.mrb[85].mxu1  ;;  %6107 = vmatmul.mubr.msk.f32.gmra.mrb[96].mxu1 %vm560_vm0, %v3731_v19  ;;  %v3733_v48 = vmul.f32 %v7824_v27, %v7824_v27 }
 0x8d0   : > { %v3501_v44 = vadd.f32 %v3470_v20, %v7636_v49  ;;  %6069 = vmatprep.mubr.msk.f32.mxu0 %vm560_vm0, %v7831_v21  ;;  %v3732_v45 = vmul.f32 %v7831_v21, %v7831_v21  ;;  %6371 = vmatprep.subr.bf16.mxu0 %v6370_v38 }
 0x8d1   : > { %v7842_v18 = vadd.f32 %v7735_v55, %v3502_v43  ;;  %6070 = vmatmul.mubr.msk.f32.gmra.mrb[82].mxu0 %vm560_vm0, %v7824_v27 }
 0x8d2   : > { %v7849_v22 = vadd.f32 %v7735_v55, %v3501_v44  ;;  %v6037_v12 = vpop.f32.mrb[86].mxu1  ;;  %6109 = vmatprep.mubr.msk.f32.mxu1 %vm560_vm0, %v3732_v45  ;;  %6373 = vmatpush3.bf16.msra.mxu0 %v6370_v38 }
 0x8d3   : > { %v3504_v49 = vadd.f32 %v6037_v12, %v7647_v63  ;;  %v3480_v57 = vpop.f32.mrb[87].mxu1  ;;  %6110 = vmatmul.mubr.msk.f32.gmra.mrb[98].mxu1 %vm560_vm0, %v3733_v48  ;;  %v3735_v63 = vmul.f32 %v7842_v18, %v7842_v18 }
 0x8d4   : > { %v3503_v24 = vadd.f32 %v3480_v57, %v7654_v53  ;;  %6072 = vmatprep.mubr.msk.f32.mxu0 %vm560_vm0, %v7849_v22  ;;  %v3734_v32 = vmul.f32 %v7849_v22, %v7849_v22 }
 0x8d5   : > { %v7860_v28 = vadd.f32 %v7735_v55, %v3504_v49  ;;  %6073 = vmatmul.mubr.msk.f32.gmra.mrb[84].mxu0 %vm560_vm0, %v7842_v18 }
 0x8d6   : > { %v7867_v54 = vadd.f32 %v7735_v55, %v3503_v24  ;;  %6112 = vmatprep.mubr.msk.f32.mxu1 %vm560_vm0, %v3734_v32 }
 0x8d7   : > { %6113 = vmatmul.mubr.msk.f32.gmra.mrb[100].mxu1 %vm560_vm0, %v3735_v63  ;;  %v3737_v51 = vmul.f32 %v7860_v28, %v7860_v28  ;;  %v5215_v63 = vld [vmem:[%s8072_s5 + $0x60] sm:$0xff] }
 0x8d8   : > { %6075 = vmatprep.mubr.msk.f32.mxu0 %vm560_vm0, %v7867_v54  ;;  %v3736_v53 = vmul.f32 %v7867_v54, %v7867_v54 }
 0x8d9   : > { %6076 = vmatmul.mubr.msk.f32.gmra.mrb[86].mxu0 %vm560_vm0, %v7860_v28 }
 0x8da   : > { %6115 = vmatprep.mubr.msk.f32.mxu1 %vm560_vm0, %v3736_v53  ;;  %v5216_v53 = vld [vmem:[%s8072_s5 + $0x68] sm:$0xff] }
 0x8db   : > { %6116 = vmatmul.mubr.msk.f32.gmra.mrb[102].mxu1 %vm560_vm0, %v3737_v51 }
 0x984   : > { %v6056_v55 = vpop.f32.mrb[72].mxu0 }
 0x985   : > { %v3932_v50 = vmul.f32 %v6056_v55, %v6056_v55  ;;  %3986 = vperm.xlu1 %6489, %v6056_v55   ;;  %v3643_v61 = vpop.f32.mrb[73].mxu0 }
 0x986   : > { %v3931_v9 = vmul.f32 %v3643_v61, %v3643_v61  ;;  %3981 = vperm.xlu0 %6488, %v3643_v61   ;;  %v6096_v41 = vpop.f32.mrb[88].mxu1 }
 0x987   : > { %v3948_v62 = vsub.f32 %v6096_v41, %v3932_v50  ;;  %v3852_v58 = vpop.f32.mrb[89].mxu1  ;;  %v6374_v50 = vpack.c.bf16 %v5216_v53, %v5215_v63 }
 0x988   : > { %v3947_v8 = vsub.f32 %v3852_v58, %v3931_v9 }
 0x989   : > { %v3964_v34 = vmax.f32 %v3948_v62, 0.0  ;;  %6375 = vmatprep.subr.bf16.mxu0 %v6374_v50 }
 0x98a   : > { %v3963_v15 = vmax.f32 %v3947_v8, 0.0  ;;  %6377 = vmatpush3.bf16.msra.mxu0 %v6374_v50 }
 0x98b   : > { %v4076_v59 = vadd.f32 1e-05, %v3964_v34 }
 0x98c   : > { %v6059_v26 = vpop.f32.mrb[74].mxu0  ;;  %v4075_v2 = vadd.f32 1e-05, %v3963_v15 }
 0x98d   : > { %v3934_v56 = vmul.f32 %v6059_v26, %v6059_v26  ;;  %3996 = vperm.xlu1 %6489, %v6059_v26   ;;  %v3653_v23 = vpop.f32.mrb[75].mxu0  ;;  %6586 = vrsqrt.f32 %v4076_v59 }
 0x98e   : > { %v3933_v3 = vmul.f32 %v3653_v23, %v3653_v23  ;;  %3991 = vperm.xlu0 %6488, %v3653_v23   ;;  %v6099_v7 = vpop.f32.mrb[90].mxu1  ;;  %6588 = vrsqrt.f32 %v4075_v2  ;;  %v5217_v23 = vld [vmem:[%s8072_s5 + $0x70] sm:$0xff] }
 0x98f   : > { %v3950_v52 = vsub.f32 %v6099_v7, %v3934_v56  ;;  %v3862_v30 = vpop.f32.mrb[91].mxu1 }
 0x990   : > { %v3949_v13 = vsub.f32 %v3862_v30, %v3933_v3  ;;  %v5218_v3 = vld [vmem:[%s8072_s5 + $0x78] sm:$0xff] }
 0x991   : > { %v3966_v11 = vmax.f32 %v3950_v52, 0.0  ;;  %v6378_v52 = vpack.c.bf16 %v5218_v3, %v5217_v23 }
 0x992   : > { %v3965_v43 = vmax.f32 %v3949_v13, 0.0 }
 0x993   : > { %v4078_v48 = vadd.f32 1e-05, %v3966_v11  ;;  %6379 = vmatprep.subr.bf16.mxu0 %v6378_v52 }
 0x994   : > { %v6062_v31 = vpop.f32.mrb[76].mxu0  ;;  %v4077_v57 = vadd.f32 1e-05, %v3965_v43  ;;  %6381 = vmatpush3.bf16.msra.mxu0 %v6378_v52 }
 0x995   : > { %v3936_v33 = vmul.f32 %v6062_v31, %v6062_v31  ;;  %4006 = vperm.xlu1 %6489, %v6062_v31   ;;  %v3663_v1 = vpop.f32.mrb[77].mxu0  ;;  %6590 = vrsqrt.f32 %v4078_v48 }
 0x996   : > { %v3935_v47 = vmul.f32 %v3663_v1, %v3663_v1  ;;  %4001 = vperm.xlu0 %6488, %v3663_v1   ;;  %v6102_v17 = vpop.f32.mrb[92].mxu1  ;;  %6592 = vrsqrt.f32 %v4077_v57 }
 0x997   : > { %v3952_v37 = vsub.f32 %v6102_v17, %v3936_v33  ;;  %v3872_v35 = vpop.f32.mrb[93].mxu1  ;;  %v6587_v7 = vpop.eup %6586 }
 0x998   : > { %v3951_v19 = vsub.f32 %v3872_v35, %v3935_v47  ;;  %v6589_v30 = vpop.eup %6588 }
 0x999   : > { %v3968_v41 = vmax.f32 %v3952_v37, 0.0 }
 0x99a   : > { %v3967_v8 = vmax.f32 %v3951_v19, 0.0 }
 0x99b   : > { %v4080_v34 = vadd.f32 1e-05, %v3968_v41 }
 0x99c   : > { %v6065_v20 = vpop.f32.mrb[78].mxu0  ;;  %v4079_v33 = vadd.f32 1e-05, %v3967_v8 }
 0x99d   : > { %v3938_v44 = vmul.f32 %v6065_v20, %v6065_v20  ;;  %4016 = vperm.xlu1 %6489, %v6065_v20   ;;  %v3673_v45 = vpop.f32.mrb[79].mxu0  ;;  %6594 = vrsqrt.f32 %v4080_v34 }
 0x99e   : > { %v3937_v12 = vmul.f32 %v3673_v45, %v3673_v45  ;;  %4011 = vperm.xlu0 %6488, %v3673_v45   ;;  %v6105_v49 = vpop.f32.mrb[94].mxu1  ;;  %6596 = vrsqrt.f32 %v4079_v33 }
 0x99f   : > { %v3954_v24 = vsub.f32 %v6105_v49, %v3938_v44  ;;  %v3882_v32 = vpop.f32.mrb[95].mxu1  ;;  %v6591_v43 = vpop.eup %6590 }
 0x9a0   : > { %v3953_v51 = vsub.f32 %v3882_v32, %v3937_v12  ;;  %v6068_v55 = vpop.f32.mrb[80].mxu0  ;;  %v6593_v45 = vpop.eup %6592 }
 0x9a1   : > { %v3940_v61 = vmul.f32 %v6068_v55, %v6068_v55  ;;  %4026 = vperm.xlu1 %6489, %v6068_v55   ;;  %v3683_v9 = vpop.f32.mrb[81].mxu0  ;;  %v3970_v2 = vmax.f32 %v3954_v24, 0.0 }
 0x9a2   : > { %v3939_v62 = vmul.f32 %v3683_v9, %v3683_v9  ;;  %4021 = vperm.xlu0 %6488, %v3683_v9   ;;  %v6108_v58 = vpop.f32.mrb[96].mxu1  ;;  %v3969_v38 = vmax.f32 %v3953_v51, 0.0 }
 0x9a3   : > { %v3956_v26 = vsub.f32 %v6108_v58, %v3940_v61  ;;  %v3892_v56 = vpop.f32.mrb[97].mxu1  ;;  %v4082_v49 = vadd.f32 1e-05, %v3970_v2  ;;  %v4431_v2 = vld [vmem:[#allocation2 + $0x48] sm:$0xff] }
 0x9a4   : > { %v3955_v29 = vsub.f32 %v3892_v56, %v3939_v62  ;;  %v6071_v10 = vpop.f32.mrb[82].mxu0  ;;  %v4081_v24 = vadd.f32 1e-05, %v3969_v38  ;;  %v4433_v38 = vld [vmem:[#allocation2 + $0x58] sm:$0xff] }
 0x9a5   : > { %v3942_v6 = vmul.f32 %v6071_v10, %v6071_v10  ;;  %v3693_v13 = vpop.f32.mrb[83].mxu0  ;;  %4114 = vperm.xlu1 %6489, %v6587_v7   ;;  %v3972_v57 = vmax.f32 %v3956_v26, 0.0  ;;  %6598 = vrsqrt.f32 %v4082_v49 }
 0x9a6   : > { %v3941_v15 = vmul.f32 %v3693_v13, %v3693_v13  ;;  %4109 = vperm.xlu0 %6488, %v6589_v30   ;;  %v6111_v31 = vpop.f32.mrb[98].mxu1  ;;  %v3971_v53 = vmax.f32 %v3955_v29, 0.0  ;;  %6600 = vrsqrt.f32 %v4081_v24 }
 0x9a7   : > { %v3958_v1 = vsub.f32 %v6111_v31, %v3942_v6  ;;  %v3902_v59 = vpop.f32.mrb[99].mxu1  ;;  %v4084_v51 = vadd.f32 1e-05, %v3972_v57  ;;  %v6595_v58 = vpop.eup %6594 }
 0x9a8   : > { %v3957_v47 = vsub.f32 %v3902_v59, %v3941_v15  ;;  %v6074_v17 = vpop.f32.mrb[84].mxu0  ;;  %v4083_v41 = vadd.f32 1e-05, %v3971_v53  ;;  %v6597_v8 = vpop.eup %6596 }
 0x9a9   : > { %v3944_v42 = vmul.f32 %v6074_v17, %v6074_v17  ;;  %v3703_v4 = vpop.f32.mrb[85].mxu0  ;;  %4036 = vperm.xlu1 %6489, %v6071_v10   ;;  %v3974_v9 = vmax.f32 %v3958_v1, 0.0  ;;  %6602 = vrsqrt.f32 %v4084_v51 }
 0x9aa   : > { %v3943_v37 = vmul.f32 %v3703_v4, %v3703_v4  ;;  %4031 = vperm.xlu0 %6488, %v3693_v13   ;;  %v6114_v35 = vpop.f32.mrb[100].mxu1  ;;  %v3973_v62 = vmax.f32 %v3957_v47, 0.0  ;;  %6604 = vrsqrt.f32 %v4083_v41 }
 0x9ab   : > { %v3960_v19 = vsub.f32 %v6114_v35, %v3944_v42  ;;  %v3912_v11 = vpop.f32.mrb[101].mxu1  ;;  %v4086_v26 = vadd.f32 1e-05, %v3974_v9 }
 0x9ac   : > { %v3959_v20 = vsub.f32 %v3912_v11, %v3943_v37  ;;  %v6077_v44 = vpop.f32.mrb[86].mxu0  ;;  %v4085_v23 = vadd.f32 1e-05, %v3973_v62  ;;  %v4432_v37 = vld [vmem:[#allocation2 + $0x50] sm:$0xff]  ;;  %v4434_v11 = vld [vmem:[#allocation2 + $0x60] sm:$0xff] }
 0x9ad   : > { %v3946_v48 = vmul.f32 %v6077_v44, %v6077_v44  ;;  %4124 = vperm.xlu1 %6489, %v6591_v43   ;;  %v3713_v12 = vpop.f32.mrb[87].mxu0  ;;  %v3976_v56 = vmax.f32 %v3960_v19, 0.0  ;;  %6606 = vrsqrt.f32 %v4086_v26  ;;  %v6386_v19 = vpack.c.bf16 %v4433_v38, %v4432_v37  ;;  %v4435_v43 = vld [vmem:[#allocation2 + $0x68] sm:$0xff] }
 0x9ae   : > { %v3945_v32 = vmul.f32 %v3713_v12, %v3713_v12  ;;  %4119 = vperm.xlu0 %6488, %v6593_v45   ;;  %v6117_v63 = vpop.f32.mrb[102].mxu1  ;;  %v3975_v3 = vmax.f32 %v3959_v20, 0.0  ;;  %6608 = vrsqrt.f32 %v4085_v23  ;;  %v6390_v20 = vpack.c.bf16 %v4435_v43, %v4434_v11 }
 0x9af   : > { %v3962_v55 = vsub.f32 %v6117_v63, %v3946_v48  ;;  %v3922_v50 = vpop.f32.mrb[103].mxu1  ;;  %v4088_v7 = vadd.f32 1e-05, %v3976_v56  ;;  %v6599_v30 = vpop.eup %6598 }
 0x9b0   : > { %v3961_v61 = vsub.f32 %v3922_v50, %v3945_v32  ;;  %v4087_v10 = vadd.f32 1e-05, %v3975_v3  ;;  %v6601_v6 = vpop.eup %6600 }
 0x9b1   : > { %4046 = vperm.xlu1 %6489, %v6074_v17   ;;  %v3978_v29 = vmax.f32 %v3962_v55, 0.0  ;;  %6610 = vrsqrt.f32 %v4088_v7 }
 0x9b2   : > { %4041 = vperm.xlu0 %6488, %v3703_v4   ;;  %v3977_v52 = vmax.f32 %v3961_v61, 0.0  ;;  %6612 = vrsqrt.f32 %v4087_v10  ;;  %v4430_v4 = vld [vmem:[#allocation2 + $0x40] sm:$0xff] }
 0x9b3   : > { %v4090_v13 = vadd.f32 1e-05, %v3978_v29  ;;  %v6603_v15 = vpop.eup %6602  ;;  %v6382_v35 = vpack.c.bf16 %v4431_v2, %v4430_v4 }
 0x9b4   : > { %v4089_v34 = vadd.f32 1e-05, %v3977_v52  ;;  %v6605_v31 = vpop.eup %6604 }
 0x9b5   : > { %4134 = vperm.xlu1 %6489, %v6595_v58   ;;  %6614 = vrsqrt.f32 %v4090_v13  ;;  %6383 = vmatprep.subr.bf16.mxu1 %v6382_v35 }
 0x9b6   : > { %4129 = vperm.xlu0 %6488, %v6597_v8   ;;  %6616 = vrsqrt.f32 %v4089_v34  ;;  %6385 = vmatpush3.bf16.msra.mxu1 %v6382_v35 }
 0x9b7   : > { %v6607_v33 = vpop.eup %6606  ;;  %6387 = vmatprep.subr.bf16.mxu1 %v6386_v19 }
 0x9b8   : > { %v6609_v1 = vpop.eup %6608 }
 0x9b9   : > { %4056 = vperm.xlu1 %6489, %v6077_v44  }
 0x9ba   : > { %4051 = vperm.xlu0 %6488, %v3713_v12   ;;  %6389 = vmatpush3.bf16.msra.mxu1 %v6386_v19 }
 0x9bb   : > { %v6611_v59 = vpop.eup %6610  ;;  %6391 = vmatprep.subr.bf16.mxu1 %v6390_v20 }
 0x9bc   : > { %v6613_v47 = vpop.eup %6612 }
 0x9bd   : > { %4144 = vperm.xlu1 %6489, %v6599_v30  }
 0x9be   : > { %4139 = vperm.xlu0 %6488, %v6601_v6   ;;  %6393 = vmatpush3.bf16.msra.mxu1 %v6390_v20 }
 0x9bf   : > { %v6615_v17 = vpop.eup %6614 }
 0x9c0   : > { %v6617_v42 = vpop.eup %6616 }
 0x9c1   : > { %4154 = vperm.xlu1 %6489, %v6603_v15  }
 0x9c2   : > { %4149 = vperm.xlu0 %6488, %v6605_v31  }
 0x9c5   : > { %4164 = vperm.xlu1 %6489, %v6607_v33  }
 0x9c6   : > { %4159 = vperm.xlu0 %6488, %v6609_v1  }
 0x9c9   : > { %4174 = vperm.xlu1 %6489, %v6611_v59  }
 0x9ca   : > { %4169 = vperm.xlu0 %6488, %v6613_v47  }
 0x9cd   : > { %4184 = vperm.xlu1 %6489, %v6615_v17  }
 0x9ce   : > { %4179 = vperm.xlu0 %6488, %v6617_v42  }
 0xa04   : > { %v3987_v44 = vpop.permute.xlu1 %3986 }
 0xa05   : > { %v3982_v45 = vpop.permute.xlu0 %3981  ;;  %v4060_v61 = vsub.f32 %v7740_v0, %v3987_v44 }
 0xa06   : > { %v4059_v55 = vsub.f32 %v7743_v39, %v3982_v45 }
 0xa0c   : > { %v3997_v48 = vpop.permute.xlu1 %3996 }
 0xa0d   : > { %v3992_v12 = vpop.permute.xlu0 %3991  ;;  %v4062_v56 = vsub.f32 %v7758_v46, %v3997_v48 }
 0xa0e   : > { %v4061_v8 = vsub.f32 %v7761_v5, %v3992_v12 }
 0xa14   : > { %v4007_v49 = vpop.permute.xlu1 %4006 }
 0xa15   : > { %v4002_v57 = vpop.permute.xlu0 %4001  ;;  %v4064_v6 = vsub.f32 %v7776_v25, %v4007_v49 }
 0xa16   : > { %v4063_v52 = vsub.f32 %v7779_v14, %v4002_v57 }
 0xa1c   : > { %v4017_v32 = vpop.permute.xlu1 %4016 }
 0xa1d   : > { %v4012_v63 = vpop.permute.xlu0 %4011  ;;  %v4066_v47 = vsub.f32 %v7794_v36, %v4017_v32 }
 0xa1e   : > { %v4065_v1 = vsub.f32 %v7797_v16, %v4012_v63 }
 0xa20   : > { %v4027_v24 = vpop.permute.xlu1 %4026 }
 0xa21   : > { %v4022_v53 = vpop.permute.xlu0 %4021  ;;  %v4068_v35 = vsub.f32 %v7806_v40, %v4027_v24 }
 0xa22   : > { %v4067_v2 = vsub.f32 %v7813_v60, %v4022_v53 }
 0xa24   : > { %v4115_v50 = vpop.permute.xlu1 %4114 }
 0xa25   : > { %v4110_v51 = vpop.permute.xlu0 %4109  ;;  %v4188_v41 = vmul.f32 %v4115_v50, %v4060_v61 }
 0xa26   : > { %v4187_v9 = vmul.f32 %v4110_v51, %v4059_v55 }
 0xa28   : > { %v4037_v62 = vpop.permute.xlu1 %4036  ;;  %6134 = vmatprep.mubr.msk.f32.mxu0 %vm560_vm0, %v4187_v9 }
 0xa29   : > { %6135 = vmatmul.mubr.msk.f32.vlgmr.msra.gmra.mrb[88].mxu0 %vm560_vm0, %v4188_v41  ;;  %v4032_v58 = vpop.permute.xlu0 %4031  ;;  %v4070_v44 = vsub.f32 %v7824_v27, %v4037_v62  ;;  %v4436_v62 = vld [vmem:[#allocation2 + $0x70] sm:$0xff] }
 0xa2a   : > { %v4069_v43 = vsub.f32 %v7831_v21, %v4032_v58  ;;  %v4437_v58 = vld [vmem:[#allocation2 + $0x78] sm:$0xff] }
 0xa2c   : > { %v4125_v26 = vpop.permute.xlu1 %4124 }
 0xa2d   : > { %v4120_v23 = vpop.permute.xlu0 %4119  ;;  %v4190_v7 = vmul.f32 %v4125_v26, %v4062_v56  ;;  %v4671_v26 = vld [vmem:[#allocation5] sm:$0xff]  ;;  %v4672_v56 = vld [vmem:[#allocation5 + $0x8] sm:$0xff] }
 0xa2e   : > { %v4189_v3 = vmul.f32 %v4120_v23, %v4061_v8  ;;  %v6394_v8 = vpack.c.bf16 %v4437_v58, %v4436_v62  ;;  %v4673_v23 = vld [vmem:[#allocation5 + $0x10] sm:$0xff] }
 0xa30   : > { %v4047_v29 = vpop.permute.xlu1 %4046  ;;  %6137 = vmatprep.mubr.msk.f32.mxu0 %vm560_vm0, %v4189_v3  ;;  %6395 = vmatprep.subr.bf16.mxu1 %v6394_v8  ;;  %v6398_v3 = vpack.c.bf16 %v4672_v56, %v4671_v26 }
 0xa31   : > { %6138 = vmatmul.mubr.msk.f32.gmra.mrb[90].mxu0 %vm560_vm0, %v4190_v7  ;;  %v4042_v10 = vpop.permute.xlu0 %4041  ;;  %v4072_v32 = vsub.f32 %v7842_v18, %v4047_v29  ;;  %6397 = vmatpush3.bf16.msra.mxu1 %v6394_v8  ;;  %v4674_v7 = vld [vmem:[#allocation5 + $0x18] sm:$0xff] }
 0xa32   : > { %v4071_v49 = vsub.f32 %v7849_v22, %v4042_v10  ;;  %v6402_v29 = vpack.c.bf16 %v4674_v7, %v4673_v23  ;;  %v4675_v10 = vld [vmem:[#allocation5 + $0x20] sm:$0xff]  ;;  %6399 = vmatprep.subr.bf16.mxu0 %v6398_v3 }
 0xa33   : > { %6401 = vmatpush3.bf16.msra.mxu0 %v6398_v3 }
 0xa34   : > { %v4135_v30 = vpop.permute.xlu1 %4134  ;;  %6403 = vmatprep.subr.bf16.mxu0 %v6402_v29 }
 0xa35   : > { %v4130_v13 = vpop.permute.xlu0 %4129  ;;  %v4192_v15 = vmul.f32 %v4135_v30, %v4064_v6  ;;  %v5220_v6 = vld [vmem:[%s8073_s6 + $0x1] ss:$0 sm:$0xff] }
 0xa36   : > { %v4191_v34 = vmul.f32 %v4130_v13, %v4063_v52  ;;  %v4676_v52 = vld [vmem:[#allocation5 + $0x28] sm:$0xff] }
 0xa37   : > { %v6406_v30 = vpack.c.bf16 %v4676_v52, %v4675_v10  ;;  %6405 = vmatpush3.bf16.msra.mxu0 %v6402_v29 }
 0xa38   : > { %v4057_v31 = vpop.permute.xlu1 %4056  ;;  %6140 = vmatprep.mubr.msk.f32.mxu0 %vm560_vm0, %v4191_v34 }
 0xa39   : > { %6141 = vmatmul.mubr.msk.f32.gmra.mrb[92].mxu0 %vm560_vm0, %v4192_v15  ;;  %v4052_v33 = vpop.permute.xlu0 %4051  ;;  %v4074_v61 = vsub.f32 %v7860_v28, %v4057_v31  ;;  %6407 = vmatprep.subr.bf16.mxu0 %v6406_v30 }
 0xa3a   : > { %v4073_v55 = vsub.f32 %v7867_v54, %v4052_v33 }
 0xa3b   : > { %6409 = vmatpush3.bf16.msra.mxu0 %v6406_v30 }
 0xa3c   : > { %v4145_v59 = vpop.permute.xlu1 %4144 }
 0xa3d   : > { %v4140_v17 = vpop.permute.xlu0 %4139  ;;  %v4194_v4 = vmul.f32 %v4145_v59, %v4066_v47 }
 0xa3e   : > { %v4193_v42 = vmul.f32 %v4140_v17, %v4065_v1 }
 0xa40   : > { %v4155_v37 = vpop.permute.xlu1 %4154  ;;  %6143 = vmatprep.mubr.msk.f32.mxu0 %vm560_vm0, %v4193_v42 }
 0xa41   : > { %6144 = vmatmul.mubr.msk.f32.gmra.mrb[94].mxu0 %vm560_vm0, %v4194_v4  ;;  %v4150_v38 = vpop.permute.xlu0 %4149  ;;  %v4196_v11 = vmul.f32 %v4155_v37, %v4068_v35 }
 0xa42   : > { %v4195_v19 = vmul.f32 %v4150_v38, %v4067_v2 }
 0xa44   : > { %v4165_v20 = vpop.permute.xlu1 %4164  ;;  %6146 = vmatprep.mubr.msk.f32.mxu0 %vm560_vm0, %v4195_v19 }
 0xa45   : > { %6147 = vmatmul.mubr.msk.f32.gmra.mrb[96].mxu0 %vm560_vm0, %v4196_v11  ;;  %v4160_v45 = vpop.permute.xlu0 %4159  ;;  %v4198_v12 = vmul.f32 %v4165_v20, %v4070_v44 }
 0xa46   : > { %v4197_v48 = vmul.f32 %v4160_v45, %v4069_v43 }
 0xa48   : > { %v4175_v57 = vpop.permute.xlu1 %4174  ;;  %6149 = vmatprep.mubr.msk.f32.mxu0 %vm560_vm0, %v4197_v48 }
 0xa49   : > { %6150 = vmatmul.mubr.msk.f32.gmra.mrb[98].mxu0 %vm560_vm0, %v4198_v12  ;;  %v4170_v63 = vpop.permute.xlu0 %4169  ;;  %v4200_v53 = vmul.f32 %v4175_v57, %v4072_v32 }
 0xa4a   : > { %v4199_v24 = vmul.f32 %v4170_v63, %v4071_v49 }
 0xa4c   : > { %v4185_v50 = vpop.permute.xlu1 %4184  ;;  %6152 = vmatprep.mubr.msk.f32.mxu0 %vm560_vm0, %v4199_v24 }
 0xa4d   : > { %6153 = vmatmul.mubr.msk.f32.gmra.mrb[100].mxu0 %vm560_vm0, %v4200_v53  ;;  %v4180_v51 = vpop.permute.xlu0 %4179  ;;  %v4202_v41 = vmul.f32 %v4185_v50, %v4074_v61 }
 0xa4e   : > { %v4201_v9 = vmul.f32 %v4180_v51, %v4073_v55 }
 0xa50   : > { %6155 = vmatprep.mubr.msk.f32.mxu0 %vm560_vm0, %v4201_v9 }
 0xa51   : > { %6156 = vmatmul.mubr.msk.f32.gmra.mrb[102].mxu0 %vm560_vm0, %v4202_v41 }
 0xafc   : > { %v6136_v13 = vpop.f32.mrb[88].mxu0 }
 0xafd   : > { %v4340_v34 = vadd.f32 %v6136_v13, %v5220_v6  ;;  %v4334_v15 = vpop.f32.mrb[89].mxu0 }
 0xafe   : > { %v4335_v31 = vadd.f32 %v5220_v6, %v4334_v15  ;;  %v4678_v15 = vld [vmem:[#allocation5 + $0x38] sm:$0xff] }
 0xaff   : > { %v4414_v1 = vmax.f32 %v4340_v34, 0.0  ;;  %v4677_v34 = vld [vmem:[#allocation5 + $0x30] sm:$0xff] }
 0xb00   : > { %v4413_v33 = vmax.f32 %v4335_v31, 0.0  ;;  %v6410_v31 = vpack.c.bf16 %v4678_v15, %v4677_v34 }
 0xb02   : > { %6174 = vmatprep.mubr.msk.f32.mxu1 %vm560_vm0, %v4413_v33  ;;  %6411 = vmatprep.subr.bf16.mxu0 %v6410_v31 }
 0xb03   : > { %6175 = vmatmul.mubr.msk.f32.vlgmr.msra.gmra.mrb[104].mxu1 %vm560_vm0, %v4414_v1  ;;  %6413 = vmatpush3.bf16.msra.mxu0 %v6410_v31 }
 0xb04   : > { %v6139_v59 = vpop.f32.mrb[90].mxu0 }
 0xb05   : > { %v4350_v47 = vadd.f32 %v6139_v59, %v5220_v6  ;;  %v4344_v17 = vpop.f32.mrb[91].mxu0 }
 0xb06   : > { %v4345_v42 = vadd.f32 %v5220_v6, %v4344_v17 }
 0xb07   : > { %v4416_v2 = vmax.f32 %v4350_v47, 0.0 }
 0xb08   : > { %v4415_v4 = vmax.f32 %v4345_v42, 0.0 }
 0xb0a   : > { %6177 = vmatprep.mubr.msk.f32.mxu1 %vm560_vm0, %v4415_v4 }
 0xb0b   : > { %6178 = vmatmul.mubr.msk.f32.gmra.mrb[106].mxu1 %vm560_vm0, %v4416_v2 }
 0xb0c   : > { %v6142_v37 = vpop.f32.mrb[92].mxu0 }
 0xb0d   : > { %v4360_v35 = vadd.f32 %v6142_v37, %v5220_v6  ;;  %v4354_v38 = vpop.f32.mrb[93].mxu0 }
 0xb0e   : > { %v4355_v19 = vadd.f32 %v5220_v6, %v4354_v38 }
 0xb0f   : > { %v4418_v43 = vmax.f32 %v4360_v35, 0.0 }
 0xb10   : > { %v4417_v11 = vmax.f32 %v4355_v19, 0.0 }
 0xb12   : > { %6180 = vmatprep.mubr.msk.f32.mxu1 %vm560_vm0, %v4417_v11 }
 0xb13   : > { %6181 = vmatmul.mubr.msk.f32.gmra.mrb[108].mxu1 %vm560_vm0, %v4418_v43 }
 0xb14   : > { %v6145_v20 = vpop.f32.mrb[94].mxu0 }
 0xb15   : > { %v4370_v44 = vadd.f32 %v6145_v20, %v5220_v6  ;;  %v4364_v45 = vpop.f32.mrb[95].mxu0 }
 0xb16   : > { %v4365_v48 = vadd.f32 %v5220_v6, %v4364_v45 }
 0xb17   : > { %v4420_v57 = vmax.f32 %v4370_v44, 0.0 }
 0xb18   : > { %v4419_v12 = vmax.f32 %v4365_v48, 0.0  ;;  %v6148_v49 = vpop.f32.mrb[96].mxu0 }
 0xb19   : > { %v4380_v32 = vadd.f32 %v6148_v49, %v5220_v6  ;;  %v4374_v63 = vpop.f32.mrb[97].mxu0 }
 0xb1a   : > { %v4375_v24 = vadd.f32 %v5220_v6, %v4374_v63  ;;  %6183 = vmatprep.mubr.msk.f32.mxu1 %vm560_vm0, %v4419_v12 }
 0xb1b   : > { %6184 = vmatmul.mubr.msk.f32.gmra.mrb[110].mxu1 %vm560_vm0, %v4420_v57  ;;  %v4422_v50 = vmax.f32 %v4380_v32, 0.0 }
 0xb1c   : > { %v4421_v53 = vmax.f32 %v4375_v24, 0.0  ;;  %v6151_v55 = vpop.f32.mrb[98].mxu0 }
 0xb1d   : > { %v4390_v61 = vadd.f32 %v6151_v55, %v5220_v6  ;;  %v4384_v51 = vpop.f32.mrb[99].mxu0 }
 0xb1e   : > { %v4385_v9 = vadd.f32 %v5220_v6, %v4384_v51  ;;  %6186 = vmatprep.mubr.msk.f32.mxu1 %vm560_vm0, %v4421_v53 }
 0xb1f   : > { %6187 = vmatmul.mubr.msk.f32.gmra.mrb[112].mxu1 %vm560_vm0, %v4422_v50  ;;  %v4424_v58 = vmax.f32 %v4390_v61, 0.0 }
 0xb20   : > { %v4423_v41 = vmax.f32 %v4385_v9, 0.0  ;;  %v6154_v62 = vpop.f32.mrb[100].mxu0 }
 0xb21   : > { %v4400_v8 = vadd.f32 %v6154_v62, %v5220_v6  ;;  %v4394_v26 = vpop.f32.mrb[101].mxu0 }
 0xb22   : > { %v4395_v56 = vadd.f32 %v5220_v6, %v4394_v26  ;;  %6189 = vmatprep.mubr.msk.f32.mxu1 %vm560_vm0, %v4423_v41 }
 0xb23   : > { %6190 = vmatmul.mubr.msk.f32.gmra.mrb[114].mxu1 %vm560_vm0, %v4424_v58  ;;  %v4426_v7 = vmax.f32 %v4400_v8, 0.0 }
 0xb24   : > { %v4425_v23 = vmax.f32 %v4395_v56, 0.0  ;;  %v6157_v3 = vpop.f32.mrb[102].mxu0 }
 0xb25   : > { %v4410_v29 = vadd.f32 %v6157_v3, %v5220_v6  ;;  %v4404_v10 = vpop.f32.mrb[103].mxu0 }
 0xb26   : > { %v4405_v52 = vadd.f32 %v5220_v6, %v4404_v10  ;;  %6192 = vmatprep.mubr.msk.f32.mxu1 %vm560_vm0, %v4425_v23  ;;  %v5254_v6 = vld [vmem:[%s8075_s8 + $0x1] ss:$0 sm:$0xff] }
 0xb27   : > { %6193 = vmatmul.mubr.msk.f32.gmra.mrb[116].mxu1 %vm560_vm0, %v4426_v7  ;;  %v4428_v13 = vmax.f32 %v4410_v29, 0.0 }
 0xb28   : > { %v4427_v30 = vmax.f32 %v4405_v52, 0.0 }
 0xb2a   : > { %6195 = vmatprep.mubr.msk.f32.mxu1 %vm560_vm0, %v4427_v30 }
 0xb2b   : > { %6196 = vmatmul.mubr.msk.f32.gmra.mrb[118].mxu1 %vm560_vm0, %v4428_v13 }
 0xbd6   : > { %v6176_v33 = vpop.f32.mrb[104].mxu1 }
 0xbd7   : > { %v4632_v1 = vadd.f32 %v6176_v33, %v7740_v0  ;;  %v4552_v59 = vpop.f32.mrb[105].mxu1 }
 0xbd8   : > { %v4631_v47 = vadd.f32 %v4552_v59, %v7743_v39 }
 0xbd9   : > { %v4656_v42 = vadd.f32 %v5254_v6, %v4632_v1 }
 0xbda   : > { %v4655_v17 = vadd.f32 %v5254_v6, %v4631_v47 }
 0xbdc   : > { %6214 = vmatprep.mubr.msk.f32.mxu0 %vm560_vm0, %v4655_v17 }
 0xbdd   : > { %6215 = vmatmul.mubr.msk.f32.vlgmr.msra.gmra.mrb[104].mxu0 %vm560_vm0, %v4656_v42 }
 0xbde   : > { %v6179_v4 = vpop.f32.mrb[106].mxu1 }
 0xbdf   : > { %v4634_v2 = vadd.f32 %v6179_v4, %v7758_v46  ;;  %v4562_v37 = vpop.f32.mrb[107].mxu1 }
 0xbe0   : > { %v4633_v35 = vadd.f32 %v4562_v37, %v7761_v5 }
 0xbe1   : > { %v4658_v38 = vadd.f32 %v5254_v6, %v4634_v2 }
 0xbe2   : > { %v4657_v0 = vadd.f32 %v5254_v6, %v4633_v35 }
 0xbe4   : > { %6217 = vmatprep.mubr.msk.f32.mxu0 %vm560_vm0, %v4657_v0 }
 0xbe5   : > { %6218 = vmatmul.mubr.msk.f32.gmra.mrb[106].mxu0 %vm560_vm0, %v4658_v38 }
 0xbe6   : > { %v6182_v19 = vpop.f32.mrb[108].mxu1 }
 0xbe7   : > { %v4636_v39 = vadd.f32 %v6182_v19, %v7776_v25  ;;  %v4572_v11 = vpop.f32.mrb[109].mxu1 }
 0xbe8   : > { %v4635_v43 = vadd.f32 %v4572_v11, %v7779_v14 }
 0xbe9   : > { %v4660_v44 = vadd.f32 %v5254_v6, %v4636_v39 }
 0xbea   : > { %v4659_v20 = vadd.f32 %v5254_v6, %v4635_v43 }
 0xbec   : > { %6220 = vmatprep.mubr.msk.f32.mxu0 %vm560_vm0, %v4659_v20 }
 0xbed   : > { %6221 = vmatmul.mubr.msk.f32.gmra.mrb[108].mxu0 %vm560_vm0, %v4660_v44 }
 0xbee   : > { %v6185_v46 = vpop.f32.mrb[110].mxu1 }
 0xbef   : > { %v4638_v5 = vadd.f32 %v6185_v46, %v7794_v36  ;;  %v4582_v45 = vpop.f32.mrb[111].mxu1 }
 0xbf0   : > { %v4637_v48 = vadd.f32 %v4582_v45, %v7797_v16 }
 0xbf1   : > { %v4662_v57 = vadd.f32 %v5254_v6, %v4638_v5 }
 0xbf2   : > { %v4661_v12 = vadd.f32 %v5254_v6, %v4637_v48  ;;  %v6188_v49 = vpop.f32.mrb[112].mxu1 }
 0xbf3   : > { %v4640_v25 = vadd.f32 %v6188_v49, %v7806_v40  ;;  %v4592_v32 = vpop.f32.mrb[113].mxu1 }
 0xbf4   : > { %v4639_v14 = vadd.f32 %v4592_v32, %v7813_v60  ;;  %6223 = vmatprep.mubr.msk.f32.mxu0 %vm560_vm0, %v4661_v12 }
 0xbf5   : > { %6224 = vmatmul.mubr.msk.f32.gmra.mrb[110].mxu0 %vm560_vm0, %v4662_v57  ;;  %v4664_v53 = vadd.f32 %v5254_v6, %v4640_v25 }
 0xbf6   : > { %v4663_v63 = vadd.f32 %v5254_v6, %v4639_v14  ;;  %v6191_v24 = vpop.f32.mrb[114].mxu1 }
 0xbf7   : > { %v4642_v36 = vadd.f32 %v6191_v24, %v7824_v27  ;;  %v4602_v55 = vpop.f32.mrb[115].mxu1 }
 0xbf8   : > { %v4641_v16 = vadd.f32 %v4602_v55, %v7831_v21  ;;  %6226 = vmatprep.mubr.msk.f32.mxu0 %vm560_vm0, %v4663_v63 }
 0xbf9   : > { %6227 = vmatmul.mubr.msk.f32.gmra.mrb[112].mxu0 %vm560_vm0, %v4664_v53  ;;  %v4666_v61 = vadd.f32 %v5254_v6, %v4642_v36 }
 0xbfa   : > { %v4665_v40 = vadd.f32 %v5254_v6, %v4641_v16  ;;  %v6194_v50 = vpop.f32.mrb[116].mxu1 }
 0xbfb   : > { %v4644_v60 = vadd.f32 %v6194_v50, %v7842_v18  ;;  %v4612_v51 = vpop.f32.mrb[117].mxu1 }
 0xbfc   : > { %v4643_v9 = vadd.f32 %v4612_v51, %v7849_v22  ;;  %6229 = vmatprep.mubr.msk.f32.mxu0 %vm560_vm0, %v4665_v40  ;;  %v5255_v22 = vld [vmem:[%s8077_s10] ss:$0 sm:$0xff] }
 0xbfd   : > { %6230 = vmatmul.mubr.msk.f32.gmra.mrb[114].mxu0 %vm560_vm0, %v4666_v61  ;;  %v4668_v41 = vadd.f32 %v5254_v6, %v4644_v60 }
 0xbfe   : > { %v4667_v27 = vadd.f32 %v5254_v6, %v4643_v9  ;;  %v6197_v21 = vpop.f32.mrb[118].mxu1 }
 0xbff   : > { %v4646_v62 = vadd.f32 %v6197_v21, %v7860_v28  ;;  %v4622_v58 = vpop.f32.mrb[119].mxu1 }
 0xc00   : > { %v4645_v8 = vadd.f32 %v4622_v58, %v7867_v54  ;;  %6232 = vmatprep.mubr.msk.f32.mxu0 %vm560_vm0, %v4667_v27 }
 0xc01   : > { %6233 = vmatmul.mubr.msk.f32.gmra.mrb[116].mxu0 %vm560_vm0, %v4668_v41  ;;  %v4670_v26 = vadd.f32 %v5254_v6, %v4646_v62 }
 0xc02   : > { %v4669_v18 = vadd.f32 %v5254_v6, %v4645_v8 }
 0xc04   : > { %6235 = vmatprep.mubr.msk.f32.mxu0 %vm560_vm0, %v4669_v18 }
 0xc05   : > { %6236 = vmatmul.mubr.msk.f32.gmra.mrb[118].mxu0 %vm560_vm0, %v4670_v26 }
 0xcb0   : > { %v6216_v28 = vpop.f32.mrb[104].mxu0 }
 0xcb1   : > { %v4806_v56 = vadd.f32 %v6216_v28, %v5255_v22  ;;  %v4800_v54 = vpop.f32.mrb[105].mxu0 }
 0xcb2   : > { %v4801_v23 = vadd.f32 %v5255_v22, %v4800_v54 }
 0xcb3   : > { %4880 = vst [vmem:[%s7997_s23 + $0x8] sm:$0xff] %v4806_v56 }
 0xcb4   : > { %4879 = vst [vmem:[%s7997_s23] sm:$0xff] %v4801_v23 }
 0xcb8   : > { %v6219_v3 = vpop.f32.mrb[106].mxu0 }
 0xcb9   : > { %v4816_v7 = vadd.f32 %v6219_v3, %v5255_v22  ;;  %v4810_v29 = vpop.f32.mrb[107].mxu0 }
 0xcba   : > { %v4811_v10 = vadd.f32 %v5255_v22, %v4810_v29 }
 0xcbb   : > { %4882 = vst [vmem:[%s7997_s23 + $0x18] sm:$0xff] %v4816_v7 }
 0xcbc   : > { %4881 = vst [vmem:[%s7997_s23 + $0x10] sm:$0xff] %v4811_v10 }
 0xcc0   : > { %v6222_v52 = vpop.f32.mrb[108].mxu0 }
 0xcc1   : > { %v4826_v30 = vadd.f32 %v6222_v52, %v5255_v22  ;;  %v4820_v13 = vpop.f32.mrb[109].mxu0 }
 0xcc2   : > { %v4821_v34 = vadd.f32 %v5255_v22, %v4820_v13 }
 0xcc3   : > { %4884 = vst [vmem:[%s7997_s23 + $0x28] sm:$0xff] %v4826_v30 }
 0xcc4   : > { %4883 = vst [vmem:[%s7997_s23 + $0x20] sm:$0xff] %v4821_v34 }
 0xcc8   : > { %v6225_v15 = vpop.f32.mrb[110].mxu0 }
 0xcc9   : > { %v4836_v31 = vadd.f32 %v6225_v15, %v5255_v22  ;;  %v4830_v33 = vpop.f32.mrb[111].mxu0 }
 0xcca   : > { %v4831_v1 = vadd.f32 %v5255_v22, %v4830_v33 }
 0xccb   : > { %4886 = vst [vmem:[%s7997_s23 + $0x38] sm:$0xff] %v4836_v31 }
 0xccc   : > { %4885 = vst [vmem:[%s7997_s23 + $0x30] sm:$0xff] %v4831_v1  ;;  %v6228_v6 = vpop.f32.mrb[112].mxu0 }
 0xccd   : > { %v4846_v59 = vadd.f32 %v6228_v6, %v5255_v22  ;;  %v4840_v47 = vpop.f32.mrb[113].mxu0 }
 0xcce   : > { %v4841_v17 = vadd.f32 %v5255_v22, %v4840_v47 }
 0xccf   : > { %4888 = vst [vmem:[%s7997_s23 + $0x48] sm:$0xff] %v4846_v59 }
 0xcd0   : > { %4887 = vst [vmem:[%s7997_s23 + $0x40] sm:$0xff] %v4841_v17  ;;  %v6231_v42 = vpop.f32.mrb[114].mxu0 }
 0xcd1   : > { %v4856_v4 = vadd.f32 %v6231_v42, %v5255_v22  ;;  %v4850_v2 = vpop.f32.mrb[115].mxu0 }
 0xcd2   : > { %v4851_v37 = vadd.f32 %v5255_v22, %v4850_v2 }
 0xcd3   : > { %4890 = vst [vmem:[%s7997_s23 + $0x58] sm:$0xff] %v4856_v4 }
 0xcd4   : > { %4889 = vst [vmem:[%s7997_s23 + $0x50] sm:$0xff] %v4851_v37  ;;  %v6234_v35 = vpop.f32.mrb[116].mxu0 }
 0xcd5   : > { %v4866_v0 = vadd.f32 %v6234_v35, %v5255_v22  ;;  %v4860_v38 = vpop.f32.mrb[117].mxu0 }
 0xcd6   : > { %v4861_v19 = vadd.f32 %v5255_v22, %v4860_v38 }
 0xcd7   : > { %4892 = vst [vmem:[%s7997_s23 + $0x68] sm:$0xff] %v4866_v0 }
 0xcd8   : > { %4891 = vst [vmem:[%s7997_s23 + $0x60] sm:$0xff] %v4861_v19  ;;  %v6237_v39 = vpop.f32.mrb[118].mxu0 }
 0xcd9   : > { %v4876_v11 = vadd.f32 %v6237_v39, %v5255_v22  ;;  %v4870_v43 = vpop.f32.mrb[119].mxu0 }
 0xcda   : > { %v4871_v20 = vadd.f32 %v5255_v22, %v4870_v43 }
 0xcdb   : > { %4894 = vst [vmem:[%s7997_s23 + $0x78] sm:$0xff] %v4876_v11 }
 0xcdc   : > { %4893 = vst [vmem:[%s7997_s23 + $0x70] sm:$0xff] %v4871_v20 }
 0xcdd   : > { %6687 = shalt.err (!%p6684_p11)
}
 0xcde   : > { %s6688_s25 = scalar_lea.hbm %s8018_s16, 2048  ;;  %s6692_s12 = scalar_lea.hbm %s8078_s11, 4096 }
 0xcdf   : > { %p6689_p13 = scmp.ne.s32.totalorder %s8018_s16, %s6688_s25  ;;  %p6693_p6 = scmp.lt.u32.totalorder %s8018_s16, %s8078_s11 }
 0xce0   : > { %p6694_p9 = scmp.lt.u32.totalorder %s6692_s12, %s6688_s25  ;;  %p6696_p10 = scmp.lt.u32.totalorder %s6688_s25, %s8018_s16 }
 0xce1   : > { %p6690_p5 = pnand %p6689_p13, %p8101_p1 }
 0xce2   : > { %p6695_p12 = por %p6694_p9, %p6693_p6 }
 0xce3   : > { %p6691_p0 = pneg %p6690_p5 }
 0xce4   : > { %p6697_p2 = por %p6696_p10, %p6695_p12 }
 0xce6   : > { %p6698_p3 = pnand %p6697_p2, %p6691_p0 }
 0xce8   : > { %6701 = shalt.err (!%p6698_p3)
}
 0xce9   : > { %s6753_s28 = smov 128   ;;  %s6754_s13 = smov 8  }
 0xcea   : > { %6430 = dma.vmem_to_hbm [thread:$0]  (%p8101_p1), %s8020_s29, 2048, %s8018_s16, %s8026_s21, %s6753_s28, %s6753_s28, %s6754_s13  }
 0xceb PF: > { %s8102_s15 = sld [smem:[#allocation11_spill]]  ;;  %s8103_s22 = sld [smem:[#allocation15_spill]] }
 0xcec   : > { %p6447_p4 = scmp.ge.s32.totalorder %s6744_s20, 2 }
 0xcf1   : > { %s4924_s19 = sand.u32 1, %s8102_s15   ;;  %p8104_p7 = scmp.ne.s32.totalorder %s8103_s22, 0 }
 0xcf2   : > { %s4925_s26 = scalar_lea.sflag [#allocation4], %s4924_s19 }
 0xcf3   : > { %p6440_p8 = pnand %p6447_p4, %p8104_p7 }
 0xcf5   : > { %6727 = dma.done.wait (!%p6440_p8), %s4925_s26, 2048  }
 0xcf6   : > { %6729 = vsyncadd (!%p6440_p8), %s4925_s26, 4294965248  ;;  %s8105_s20 = sld [smem:[#allocation13_spill]]  ;;  %s8106_s24 = sld [smem:[#allocation12_spill]] }
 0xcf7   : > { %s8107_s19 = sld [smem:[#allocation14_spill]]  ;;  %s8108_s17 = smov %s6736_s18 }
 0xcfc   : > { %p23_p11 = scmp.ge.s32.totalorder %s8105_s20, 4   ;;  %s8109_s18 = smov %s8106_s24 }
 0xcfe   :  { %25 = sbr.rel (!%p23_p11) target bundleno = 5 (0x5), region = 114 }
 0xd05   :  { %4930 = vsyncpa [#allocation3], 1 }
 0xd06   :  { %4932 = vsyncpa [#allocation3 + $0x1], 1 }
 0xd07   :  { %4933 = vsyncpa [#allocation6], 1 }
 0xd08   :  { %4934 = vsyncpa [#allocation4], 1 }
 0xd09   :  { %4936 = vsyncpa [#allocation4 + $0x1], 1 }

</bundles_post_ra>
